<compile_context>
chip_gen: v5e
topology: v5e:2x2
jax: 0.10.0
libtpu: 0.0.40
codegen_flags: <defaults>
</compile_context>

<pallas_src>
import numpy as np
import jax
import jax.numpy as jnp
from jax.experimental import pallas as pl
from jax.experimental.pallas import tpu as pltpu

# ---- BrainConfig defaults ----
INPUT_SIZE = 16
HIDDEN = 64
HALF = HIDDEN // 2          # 32 (attention embed dim)
WISDOM = 48
OUTPUT = 8
NUM_AGENTS = 8
LANES = 128

OBS_FLAT = NUM_AGENTS * INPUT_SIZE   # 128  (lane-dense obs row)
ENC1_OUT = NUM_AGENTS * HIDDEN       # 512  (block-diag encoder layer 1 width)
ENC2_OUT = NUM_AGENTS * HALF         # 256  (block-diag encoder layer 2 width)

# Batch tile.  Multiple of 256 (fills a 2x256x256 MXU pass on v6e/v7x; 128-aligned
# is enough on v5e).  VMEM footprint at TB=256 is ~3 MiB — far under the 16 MiB
# (v5e) / 32 MiB (v6e/v7x) default scoped limits, so no vmem_limit_bytes needed.
TB = 256

# ---- single parameter slab layout (rows, 512 lanes), all offsets 8-aligned ----
SLAB_COLS = 512
R_BD1 = 0        # (128, 512) block-diag enc_w1,              cols 0:512
R_BD2 = 128      # (512, 256) block-diag enc_w2,              cols 0:256
R_WC = 128       # (256, 128) folded AVG@(wv@wo)@[wis|dec_a], cols 256:384
R_WIS2 = 384     # (64, 48)   wis_w2,                         cols 256:304
R_D1B = 448      # (48, 64)   dec_w1b,                        cols 256:320
R_D2 = 496       # (64, 8)    dec_w2,                         cols 256:264
R_BIAS = 640     # 4 bias rows (padded to 8)
SLAB_ROWS = 648


def collective_brain_kernel(obs_ref, w_ref, out_ref):
    f32 = jnp.float32
    x = obs_ref[...]                                              # (TB, 128) lane-dense

    # -------- static slab views (zero-cost) --------
    bd1 = w_ref[R_BD1:R_BD1 + OBS_FLAT, 0:ENC1_OUT]               # (128, 512)
    bd2 = w_ref[R_BD2:R_BD2 + ENC1_OUT, 0:ENC2_OUT]               # (512, 256)
    w_comb = w_ref[R_WC:R_WC + ENC2_OUT, 256:256 + LANES]         # (256, 128)
    wis_w2 = w_ref[R_WIS2:R_WIS2 + HIDDEN, 256:256 + WISDOM]      # (64, 48)
    dec_w1b = w_ref[R_D1B:R_D1B + WISDOM, 256:256 + HIDDEN]       # (48, 64)
    dec_w2 = w_ref[R_D2:R_D2 + HIDDEN, 256:256 + OUTPUT]          # (64, 8)

    b_enc1 = w_ref[R_BIAS:R_BIAS + 1, 0:ENC1_OUT]                 # (1, 512) tiled enc_b1
    b_enc2 = w_ref[R_BIAS + 1:R_BIAS + 2, 0:ENC2_OUT]             # (1, 256) tiled enc_b2
    b_comb = w_ref[R_BIAS + 2:R_BIAS + 3, 0:LANES]                # (1, 128)
    b_wis2 = w_ref[R_BIAS + 3:R_BIAS + 4, 0:WISDOM]               # (1, 48)
    b_dec2 = w_ref[R_BIAS + 3:R_BIAS + 4, WISDOM:WISDOM + OUTPUT] # (1, 8)

    # -------- per-agent encoder via block-diagonal matmuls (lane-dense) --------
    h = jnp.maximum(jnp.dot(x, bd1, preferred_element_type=f32) + b_enc1, 0.0)   # (TB, 512)
    e = jnp.dot(h, bd2, preferred_element_type=f32) + b_enc2                     # (TB, 256)

    # -------- agent-mean + attention v/out fold + fused [wis_w1 | dec_w1a] ------
    # (all folded offline into one (256,128) matmul; exact up to fp reassociation)
    fused = jnp.dot(e, w_comb, preferred_element_type=f32) + b_comb              # (TB, 128)
    wh = jnp.maximum(fused[:, 0:HIDDEN], 0.0)                                    # (TB, 64)
    dec_part = fused[:, HIDDEN:2 * HIDDEN]                                       # (TB, 64)

    # -------- collective_wisdom_net second layer --------
    wisdom = jnp.dot(wh, wis_w2, preferred_element_type=f32) + b_wis2            # (TB, 48)

    # -------- collective_decision_net (Dropout identity in eval) --------
    dh = jnp.maximum(dec_part + jnp.dot(wisdom, dec_w1b, preferred_element_type=f32), 0.0)
    logits = jnp.dot(dh, dec_w2, preferred_element_type=f32) + b_dec2            # (TB, 8)

    # -------- softmax (EUP exp + approx reciprocal) --------
    m = jnp.max(logits, axis=-1, keepdims=True)
    ez = jnp.exp(logits - m)
    probs = ez * pl.reciprocal(jnp.sum(ez, axis=-1, keepdims=True), approx=True)

    # -------- single lane-dense output write: [probs | wisdom | zero pad] ----
    pad = jnp.zeros((probs.shape[0], LANES - OUTPUT - WISDOM), f32)
    out_ref[...] = jnp.concatenate([probs, wisdom, pad], axis=-1)                # (TB, 128)


def init_params(key):
    """Deterministic parameter init (PyTorch-Linear-style uniform bounds)."""
    def lin(k, fan_in, fan_out):
        k1, k2 = jax.random.split(k)
        bound = 1.0 / np.sqrt(fan_in)
        w = jax.random.uniform(k1, (fan_in, fan_out), jnp.float32, -bound, bound)
        b = jax.random.uniform(k2, (1, fan_out), jnp.float32, -bound, bound)
        return w, b

    keys = jax.random.split(key, 10)
    p = {}
    p["enc_w1"], p["enc_b1"] = lin(keys[0], INPUT_SIZE, HIDDEN)
    p["enc_w2"], p["enc_b2"] = lin(keys[1], HIDDEN, HALF)
    # MHA projections (embed = HALF).  q/k exist in the torch module but with
    # seq_len == 1 cannot influence the output; only v/out are used.
    p["wq"], p["bq"] = lin(keys[2], HALF, HALF)
    p["wk"], p["bk"] = lin(keys[3], HALF, HALF)
    p["wv"], p["bv"] = lin(keys[4], HALF, HALF)
    p["wo"], p["bo"] = lin(keys[5], HALF, HALF)
    p["wis_w1"], p["wis_b1"] = lin(keys[6], HALF, HIDDEN)
    p["wis_w2"], p["wis_b2"] = lin(keys[7], HIDDEN, WISDOM)
    dec_w1, dec_b1 = lin(keys[8], HALF + WISDOM, HIDDEN)             # (80, 64)
    p["dec_w1a"] = dec_w1[:HALF]      # multiplies mean(attended) part
    p["dec_w1b"] = dec_w1[HALF:]      # multiplies collective_wisdom part
    p["dec_b1"] = dec_b1
    p["dec_w2"], p["dec_b2"] = lin(keys[9], HIDDEN, OUTPUT)
    return p


def pack_params(p):
    """Fold everything that is linear offline and pack into one lane-dense slab."""
    eye = jnp.eye(NUM_AGENTS, dtype=jnp.float32)
    bd1 = jnp.kron(eye, p["enc_w1"])                                 # (128, 512)
    bd2 = jnp.kron(eye, p["enc_w2"])                                 # (512, 256)

    # mean over agents (linear), attention v/out fold, fused [wis_w1 | dec_w1a]
    w_vo = p["wv"] @ p["wo"]                                         # (32, 32)
    b_vo = p["bv"] @ p["wo"] + p["bo"]                               # (1, 32)
    wd_w1 = jnp.concatenate([p["wis_w1"], p["dec_w1a"]], axis=1)     # (32, 128)
    wd_b1 = jnp.concatenate([p["wis_b1"], p["dec_b1"]], axis=1)      # (1, 128)
    avg = jnp.tile(jnp.eye(HALF, dtype=jnp.float32), (NUM_AGENTS, 1)) / NUM_AGENTS  # (256, 32)
    w_comb = avg @ (w_vo @ wd_w1)                                    # (256, 128)
    b_comb = b_vo @ wd_w1 + wd_b1                                    # (1, 128)

    w = jnp.zeros((SLAB_ROWS, SLAB_COLS), jnp.float32)
    w = w.at[R_BD1:R_BD1 + OBS_FLAT, 0:ENC1_OUT].set(bd1)
    w = w.at[R_BD2:R_BD2 + ENC1_OUT, 0:ENC2_OUT].set(bd2)
    w = w.at[R_WC:R_WC + ENC2_OUT, 256:256 + LANES].set(w_comb)
    w = w.at[R_WIS2:R_WIS2 + HIDDEN, 256:256 + WISDOM].set(p["wis_w2"])
    w = w.at[R_D1B:R_D1B + WISDOM, 256:256 + HIDDEN].set(p["dec_w1b"])
    w = w.at[R_D2:R_D2 + HIDDEN, 256:256 + OUTPUT].set(p["dec_w2"])
    # biases
    w = w.at[R_BIAS, 0:ENC1_OUT].set(jnp.tile(p["enc_b1"][0], NUM_AGENTS))
    w = w.at[R_BIAS + 1, 0:ENC2_OUT].set(jnp.tile(p["enc_b2"][0], NUM_AGENTS))
    w = w.at[R_BIAS + 2, 0:LANES].set(b_comb[0])
    w = w.at[R_BIAS + 3, 0:WISDOM].set(p["wis_b2"][0])
    w = w.at[R_BIAS + 3, WISDOM:WISDOM + OUTPUT].set(p["dec_b2"][0])
    return w


@jax.jit
def collective_brain_forward(obs, w_slab):
    """obs: (B, NUM_AGENTS, INPUT_SIZE) — B independent CollectiveBrain forwards."""
    B = obs.shape[0]
    obs_flat = obs.reshape(B, OBS_FLAT)                      # (B, 128) lane-dense
    n_blocks = (B + TB - 1) // TB
    b_pad = n_blocks * TB
    if b_pad != B:
        obs_flat = jnp.pad(obs_flat, ((0, b_pad - B), (0, 0)))

    out = pl.pallas_call(
        collective_brain_kernel,
        out_shape=jax.ShapeDtypeStruct((b_pad, LANES), jnp.float32),
        grid=(n_blocks,),
        in_specs=[
            pl.BlockSpec((TB, OBS_FLAT), lambda b: (b, 0)),
            # constant index_map => parameter slab resident in VMEM across the grid
            pl.BlockSpec((SLAB_ROWS, SLAB_COLS), lambda b: (0, 0)),
        ],
        out_specs=pl.BlockSpec((TB, LANES), lambda b: (b, 0)),
        compiler_params=pltpu.CompilerParams(dimension_semantics=("parallel",)),
    )(obs_flat, w_slab)

    probs = out[:B, 0:OUTPUT]                                # (B, 8)
    wisdom = out[:B, OUTPUT:OUTPUT + WISDOM]                 # (B, 48)
    # Attention weights with seq_len == 1 are identically 1.0 (head-averaged);
    # returned from the wrapper instead of being written by the kernel.
    attn = jnp.ones((B, NUM_AGENTS, 1, 1), jnp.float32)
    return probs, wisdom, attn


def reference_forward(obs_b, p):
    """Pure-JAX reference of the unfused/unfolded torch forward (eval mode)."""
    def one(obs):
        h = jax.nn.relu(obs @ p["enc_w1"] + p["enc_b1"])
        e = h @ p["enc_w2"] + p["enc_b2"]
        attended = (e @ p["wv"] + p["bv"]) @ p["wo"] + p["bo"]
        mean_att = jnp.mean(attended, axis=0, keepdims=True)
        wh = jax.nn.relu(mean_att @ p["wis_w1"] + p["wis_b1"])
        wisdom = wh @ p["wis_w2"] + p["wis_b2"]
        dh = jax.nn.relu(mean_att @ p["dec_w1a"] + wisdom @ p["dec_w1b"] + p["dec_b1"])
        logits = dh @ p["dec_w2"] + p["dec_b2"]
        return jax.nn.softmax(logits, axis=-1)[0], wisdom[0]
    return jax.vmap(one)(obs_b)


def calculate_consensus(attn_weights):
    """Glue replicating CollectiveBrain._calculate_consensus (numpy)."""
    aw = np.asarray(attn_weights)                      # (A, 1, 1)
    flat = aw.reshape(-1)
    entropy = float(-np.sum(flat * np.log(flat + 1e-8)))
    consensus_level = 1.0 / (1.0 + entropy)
    mean_attention = aw.mean(axis=-1)                  # (A, 1)
    thr = mean_attention.mean() + mean_attention.std(ddof=1)
    dominant_agents = np.nonzero((mean_attention > thr).reshape(-1))[0].tolist()
    return {"consensus_level": consensus_level,
            "dominant_agents": dominant_agents,
            "attention_entropy": entropy}


if __name__ == "__main__":
    key = jax.random.PRNGKey(0)
    pkey, okey = jax.random.split(key)
    params = init_params(pkey)
    w_slab = pack_params(params)

    # B deliberately NOT a multiple of TB (exercises padding); padded grid has 2
    # steps so the batch blocks can shard across v7x's two TensorCores.
    B = 300
    obs = jax.random.normal(okey, (B, NUM_AGENTS, INPUT_SIZE), jnp.float32)

    probs, wisdom, attn = collective_brain_forward(obs, w_slab)
    jax.block_until_ready((probs, wisdom, attn))

    # Validate against the pure-JAX reference.  Tolerance covers fp reassociation
    # from the offline folds and the ~2^-12 relative error of the approx reciprocal.
    ref_probs, ref_wisdom = reference_forward(obs, params)
    np.testing.assert_allclose(np.asarray(probs), np.asarray(ref_probs), atol=2e-3, rtol=2e-3)
    np.testing.assert_allclose(np.asarray(wisdom), np.asarray(ref_wisdom), atol=1e-3, rtol=1e-3)

    # Replicate the torch module's return structure for the first batch element.
    collective_action_probs = probs[0]                              # (8,)
    attention_weights = np.asarray(attn[0])                         # (A, 1, 1)
    consensus = calculate_consensus(attention_weights)
    collective_info = {
        "collective_wisdom": np.asarray(wisdom[0]).tolist(),
        "attention_distribution": attention_weights.tolist(),
        "consensus_level": consensus["consensus_level"],
        "dominant_agents": consensus["dominant_agents"],
    }

    assert probs.shape == (B, OUTPUT)
    assert wisdom.shape == (B, WISDOM)
    assert np.allclose(np.asarray(jnp.sum(probs, axis=-1)), 1.0, atol=3e-3)
    print("KERNEL_OK")
</pallas_src>

<mosaic_0001>
module attributes {stable_mosaic.version = 11 : i64} {
  func.func @collective_brain_kernel(%arg0: i32, %arg1: memref<256x128xf32, #tpu.memory_space<vmem>>, %arg2: memref<648x512xf32, #tpu.memory_space<vmem>>, %arg3: memref<256x128xf32, #tpu.memory_space<vmem>>) attributes {dimension_semantics = [#tpu.dimension_semantics<parallel>], iteration_bounds = array<i64: 2>, scalar_prefetch = 0 : i64, scratch_operands = 0 : i64, tpu.core_type = #tpu.core_type<tc>, window_params = [{transform_indices = @transform_0, window_bounds = array<i64: 256, 128>}, {pipeline_mode = #tpu.pipeline_mode<synchronous>, transform_indices = @transform_1, window_bounds = array<i64: 648, 512>}, {transform_indices = @transform_2, window_bounds = array<i64: 256, 128>}]} {
    %c0 = arith.constant 0 : index
    %c0_0 = arith.constant 0 : index
    %0 = vector.load %arg1[%c0, %c0_0] : memref<256x128xf32, #tpu.memory_space<vmem>>, vector<256x128xf32>
    %c0_1 = arith.constant 0 : index
    %c0_2 = arith.constant 0 : index
    %1 = vector.load %arg2[%c0_1, %c0_2] : memref<648x512xf32, #tpu.memory_space<vmem>>, vector<128x512xf32>
    %c128 = arith.constant 128 : index
    %c0_3 = arith.constant 0 : index
    %2 = vector.load %arg2[%c128, %c0_3] : memref<648x512xf32, #tpu.memory_space<vmem>>, vector<512x256xf32>
    %c128_4 = arith.constant 128 : index
    %c256 = arith.constant 256 : index
    %3 = vector.load %arg2[%c128_4, %c256] : memref<648x512xf32, #tpu.memory_space<vmem>>, vector<256x128xf32>
    %c384 = arith.constant 384 : index
    %c256_5 = arith.constant 256 : index
    %4 = vector.load %arg2[%c384, %c256_5] : memref<648x512xf32, #tpu.memory_space<vmem>>, vector<64x48xf32>
    %c448 = arith.constant 448 : index
    %c256_6 = arith.constant 256 : index
    %5 = vector.load %arg2[%c448, %c256_6] : memref<648x512xf32, #tpu.memory_space<vmem>>, vector<48x64xf32>
    %c496 = arith.constant 496 : index
    %c256_7 = arith.constant 256 : index
    %6 = vector.load %arg2[%c496, %c256_7] : memref<648x512xf32, #tpu.memory_space<vmem>>, vector<64x8xf32>
    %c640 = arith.constant 640 : index
    %c0_8 = arith.constant 0 : index
    %7 = vector.load %arg2[%c640, %c0_8] : memref<648x512xf32, #tpu.memory_space<vmem>>, vector<1x512xf32>
    %c641 = arith.constant 641 : index
    %c0_9 = arith.constant 0 : index
    %8 = vector.load %arg2[%c641, %c0_9] : memref<648x512xf32, #tpu.memory_space<vmem>>, vector<1x256xf32>
    %c642 = arith.constant 642 : index
    %c0_10 = arith.constant 0 : index
    %9 = vector.load %arg2[%c642, %c0_10] : memref<648x512xf32, #tpu.memory_space<vmem>>, vector<1x128xf32>
    %c643 = arith.constant 643 : index
    %c0_11 = arith.constant 0 : index
    %10 = vector.load %arg2[%c643, %c0_11] : memref<648x512xf32, #tpu.memory_space<vmem>>, vector<1x48xf32>
    %c643_12 = arith.constant 643 : index
    %c48 = arith.constant 48 : index
    %11 = vector.load %arg2[%c643_12, %c48] : memref<648x512xf32, #tpu.memory_space<vmem>>, vector<1x8xf32>
    %cst = arith.constant dense<0.000000e+00> : vector<256x512xf32>
    %12 = tpu.matmul %0, %1, %cst {dimension_numbers = #tpu.dot_dimension_numbers<[1], [0], [0], [1], [0, 0, 1, 1], [], []>} : vector<256x128xf32>, vector<128x512xf32>, vector<256x512xf32> -> vector<256x512xf32>
    %13 = vector.broadcast %7 : vector<1x512xf32> to vector<256x512xf32>
    %14 = arith.addf %12, %13 : vector<256x512xf32>
    %cst_13 = arith.constant 0.000000e+00 : f32
    %15 = vector.broadcast %cst_13 : f32 to vector<256x512xf32>
    %16 = arith.maximumf %14, %15 : vector<256x512xf32>
    %cst_14 = arith.constant dense<0.000000e+00> : vector<256x256xf32>
    %17 = tpu.matmul %16, %2, %cst_14 {dimension_numbers = #tpu.dot_dimension_numbers<[1], [0], [0], [1], [0, 0, 1, 1], [], []>} : vector<256x512xf32>, vector<512x256xf32>, vector<256x256xf32> -> vector<256x256xf32>
    %18 = vector.broadcast %8 : vector<1x256xf32> to vector<256x256xf32>
    %19 = arith.addf %17, %18 : vector<256x256xf32>
    %cst_15 = arith.constant dense<0.000000e+00> : vector<256x128xf32>
    %20 = tpu.matmul %19, %3, %cst_15 {dimension_numbers = #tpu.dot_dimension_numbers<[1], [0], [0], [1], [0, 0, 1, 1], [], []>} : vector<256x256xf32>, vector<256x128xf32>, vector<256x128xf32> -> vector<256x128xf32>
    %21 = vector.broadcast %9 : vector<1x128xf32> to vector<256x128xf32>
    %22 = arith.addf %20, %21 : vector<256x128xf32>
    %23 = vector.extract_strided_slice %22 {offsets = [0, 0], sizes = [256, 64], strides = [1, 1]} : vector<256x128xf32> to vector<256x64xf32>
    %cst_16 = arith.constant 0.000000e+00 : f32
    %24 = vector.broadcast %cst_16 : f32 to vector<256x64xf32>
    %25 = arith.maximumf %23, %24 : vector<256x64xf32>
    %26 = vector.extract_strided_slice %22 {offsets = [0, 64], sizes = [256, 64], strides = [1, 1]} : vector<256x128xf32> to vector<256x64xf32>
    %cst_17 = arith.constant dense<0.000000e+00> : vector<256x48xf32>
    %27 = tpu.matmul %25, %4, %cst_17 {dimension_numbers = #tpu.dot_dimension_numbers<[1], [0], [0], [1], [0, 0, 1, 1], [], []>} : vector<256x64xf32>, vector<64x48xf32>, vector<256x48xf32> -> vector<256x48xf32>
    %28 = vector.broadcast %10 : vector<1x48xf32> to vector<256x48xf32>
    %29 = arith.addf %27, %28 : vector<256x48xf32>
    %cst_18 = arith.constant dense<0.000000e+00> : vector<256x64xf32>
    %30 = tpu.matmul %29, %5, %cst_18 {dimension_numbers = #tpu.dot_dimension_numbers<[1], [0], [0], [1], [0, 0, 1, 1], [], []>} : vector<256x48xf32>, vector<48x64xf32>, vector<256x64xf32> -> vector<256x64xf32>
    %31 = arith.addf %26, %30 : vector<256x64xf32>
    %cst_19 = arith.constant 0.000000e+00 : f32
    %32 = vector.broadcast %cst_19 : f32 to vector<256x64xf32>
    %33 = arith.maximumf %31, %32 : vector<256x64xf32>
    %cst_20 = arith.constant dense<0.000000e+00> : vector<256x8xf32>
    %34 = tpu.matmul %33, %6, %cst_20 {dimension_numbers = #tpu.dot_dimension_numbers<[1], [0], [0], [1], [0, 0, 1, 1], [], []>} : vector<256x64xf32>, vector<64x8xf32>, vector<256x8xf32> -> vector<256x8xf32>
    %35 = vector.broadcast %11 : vector<1x8xf32> to vector<256x8xf32>
    %36 = arith.addf %34, %35 : vector<256x8xf32>
    %cst_21 = arith.constant dense<0xFF800000> : vector<256xf32>
    %37 = vector.multi_reduction <maximumf>, %36, %cst_21 [1] : vector<256x8xf32> to vector<256xf32>
    %38 = vector.shape_cast %37 : vector<256xf32> to vector<256x1xf32>
    %39 = vector.broadcast %38 : vector<256x1xf32> to vector<256x8xf32>
    %40 = arith.subf %36, %39 : vector<256x8xf32>
    %41 = math.exp %40 : vector<256x8xf32>
    %cst_22 = arith.constant dense<0.000000e+00> : vector<256xf32>
    %42 = vector.multi_reduction <add>, %41, %cst_22 [1] : vector<256x8xf32> to vector<256xf32>
    %43 = vector.shape_cast %42 : vector<256xf32> to vector<256x1xf32>
    %44 = tpu.reciprocal %43 {approx = true} : vector<256x1xf32> -> vector<256x1xf32>
    %45 = vector.broadcast %44 : vector<256x1xf32> to vector<256x8xf32>
    %46 = arith.mulf %41, %45 : vector<256x8xf32>
    %cst_23 = arith.constant 0.000000e+00 : f32
    %47 = vector.broadcast %cst_23 : f32 to vector<256x72xf32>
    %48 = tpu.concatenate %46, %29, %47 in 1 : vector<256x8xf32>, vector<256x48xf32>, vector<256x72xf32> -> vector<256x128xf32>
    %c0_24 = arith.constant 0 : index
    %c0_25 = arith.constant 0 : index
    %49 = vector.load %arg3[%c0_24, %c0_25] : memref<256x128xf32, #tpu.memory_space<vmem>>, vector<256x128xf32>
    tpu.vector_store %arg3[%c0_24, %c0_25], %48 {strides = array<i32>} : memref<256x128xf32, #tpu.memory_space<vmem>>, vector<256x128xf32>,
    return
  }
  func.func @transform_0(%arg0: i32) -> (i32, i32) {
    %c0_i32 = arith.constant 0 : i32
    %c0_i32_0 = arith.constant 0 : i32
    return %arg0, %c0_i32 : i32, i32
  }
  func.func @transform_1(%arg0: i32) -> (i32, i32) {
    %c0_i32 = arith.constant 0 : i32
    %c0_i32_0 = arith.constant 0 : i32
    %c0_i32_1 = arith.constant 0 : i32
    return %c0_i32, %c0_i32_0 : i32, i32
  }
  func.func @transform_2(%arg0: i32) -> (i32, i32) {
    %c0_i32 = arith.constant 0 : i32
    %c0_i32_0 = arith.constant 0 : i32
    return %arg0, %c0_i32 : i32, i32
  }
}

</mosaic_0001>

<bundles_post_ra>
// kernel: collective_brain_forward.1
= control target key start
LH: loop header
LB: loop body
LE: loop exit
PB: predicated region body
PF: predicated region fallthrough
CT: control target
= control target key end

     0   :  { %7 = vsyncpa [#allocation3], 0  ;;  %s4080_s9 = smov 0   ;;  %s7330_s0 = inlined_call_operand.vmem [shape: f32[512,128], index: 0, kind: input, shape index: {}]   ;;  %s7331_s1 = inlined_call_operand.hbm [shape: f32[648,512], index: 1, kind: input, shape index: {}]   ;;  %s7332_s2 = inlined_call_operand.vmem [shape: f32[512,128], index: 2, kind: output, shape index: {}]  }
   0x1 LB: > { %s102_s12 = sshll.u32 %s7331_s1, 4  ;;  %s3707_s13 = sadd.s32 4294967295, %s4057_s9   ;;  %s4057_s9 = sphi %s4080_s9, %s13_s9   ;;  %s103_s12 = int_to_ptr.hbm [resolvable:$true] %s102_s12 }
   0x2   : > { %p3709_p0 = scmp.ge.s32.totalorder %s4057_s9, 1  ;;  %p91_p1 = scmp.lt.s32.totalorder %s4057_s9, 3 }
   0x3   : > { %p3872_p2 = scmp.eq.s32.totalorder %s3707_s13, 0  ;;  %s4059_s14 = smov [#allocation2]  }
   0x4   : > { %p92_p3 = pnand %p3709_p0, %p91_p1  ;;  %s104_s15 = sshll.u32 %s4059_s14, 4  ;;  %s105_s15 = int_to_ptr.vmem [resolvable:$true] %s104_s15 }
   0x5   : > { %s4060_s16 = smov 512   ;;  %s4061_s17 = smov 32  }
   0x6   : > { %p3868_p4 = pneg %p92_p3  ;;  %129 = sbr.rel (%p92_p3) target bundleno = 2361 (0x939), region = 28 }
   0x8   : > { %p3869_p5 = pnand %p3872_p2, %p3868_p4 }
   0xa   : > { %3871 = dma.hbm_to_vmem [thread:$0]  (!%p3869_p5), %s103_s12, 41472, %s105_s15, [#allocation3], %s4060_s16, %s4060_s16, %s4061_s17  }
   0xb   : > { %4052 = dma.done.wait (%p3872_p2), [#allocation3], 41472  }
   0xc   : > { %4054 = vsyncadd (%p3872_p2), [#allocation3], 4294925824  ;;  %v256_v0 = vld [vmem:[#allocation2 + $0x1e0] sm:$0xff]  ;;  %s3714_s18 = sshll.u32 %s3707_s13, 5  ;;  %v257_v20 = vld [vmem:[#allocation2 + $0x1e8] sm:$0xff]  ;;  %vm2204_vm0 = vcmask 523264  }
   0xd   : > { %v252_v1 = vld [vmem:[#allocation2 + $0x1c0] sm:$0xff]  ;;  %457 = vmatpush.msra.mxu0 %v256_v0  ;;  %3816 = vmatpush.msra.mxu1 %v256_v0  ;;  %p153_p6 = scmp.lt.s32.totalorder %s3714_s18, 63  ;;  %v253_v21 = vld [vmem:[#allocation2 + $0x1c8] sm:$0xff]  ;;  %v258_v22 = vld [vmem:[#allocation2 + $0x1f0] sm:$0xff]  ;;  %vm2414_vm1 = vcmask 392192   ;;  %s4062_s23 = smov 64  }
   0xe   : > { %3817 = vmatpush.msra.mxu2 %v256_v0  ;;  %3818 = vmatpush.msra.mxu3 %v256_v0  ;;  %v248_v2 = vld [vmem:[#allocation2 + $0x1a0] sm:$0xff]  ;;  %v259_v23 = vld [vmem:[#allocation2 + $0x1f8] sm:$0xff]  ;;  %v254_v24 = vld [vmem:[#allocation2 + $0x1d0] sm:$0xff]  ;;  %s4063_s24 = smov 80   ;;  %s4064_s25 = smov 8   ;;  %vm3093_vm2 = vcmask 64512  }
   0xf   : > { %458 = vmatpush.msra.mxu0 %v252_v1  ;;  %3819 = vmatpush.msra.mxu1 %v252_v1  ;;  %v244_v3 = vld [vmem:[#allocation2 + $0x180] sm:$0xff]  ;;  %s8093_s18 = smov (!%p153_p6, %s3714_s18), 63  ;;  %v255_v25 = vld [vmem:[#allocation2 + $0x1d8] sm:$0xff]  ;;  %v249_v26 = vld [vmem:[#allocation2 + $0x1a8] sm:$0xff]  ;;  %vm3574_vm3 = vcmask 457728  }
  0x10   : > { %3820 = vmatpush.msra.mxu2 %v252_v1  ;;  %3821 = vmatpush.msra.mxu3 %v252_v1  ;;  %v240_v4 = vld [vmem:[#allocation2 + $0x160] sm:$0xff]  ;;  %s3715_s19 = sshll.u32 %s8093_s18, 3  ;;  %v250_v27 = vld [vmem:[#allocation2 + $0x1b0] sm:$0xff]  ;;  %v251_v28 = vld [vmem:[#allocation2 + $0x1b8] sm:$0xff] }
  0x11   : > { %459 = vmatpush.msra.mxu0 %v248_v2  ;;  %3822 = vmatpush.msra.mxu1 %v248_v2  ;;  %v236_v5 = vld [vmem:[#allocation2 + $0x140] sm:$0xff]  ;;  %s4103_s22 = scalar_lea.vmem %s7330_s0, %s3715_s19  ;;  %v245_v33 = vld [vmem:[#allocation2 + $0x188] sm:$0xff]  ;;  %v246_v34 = vld [vmem:[#allocation2 + $0x190] sm:$0xff]  ;;  %s7069_s28 = scalar_lea.vmem %s7332_s2, %s3715_s19 }
  0x12   : > { %3823 = vmatpush.msra.mxu2 %v248_v2  ;;  %3824 = vmatpush.msra.mxu3 %v248_v2  ;;  %v232_v6 = vld [vmem:[#allocation2 + $0x120] sm:$0xff]  ;;  %v4122_v29 = vld [vmem:[%s4103_s22 + $0x8] sm:$0xff]  ;;  %v247_v35 = vld [vmem:[#allocation2 + $0x198] sm:$0xff] }
  0x13   : > { %460 = vmatpush.msra.mxu0 %v244_v3  ;;  %3825 = vmatpush.msra.mxu1 %v244_v3  ;;  %v228_v7 = vld [vmem:[#allocation2 + $0x100] sm:$0xff]  ;;  %v4125_v30 = vld [vmem:[%s4103_s22 + $0x48] sm:$0xff]  ;;  %v242_v37 = vld [vmem:[#allocation2 + $0x170] sm:$0xff] }
  0x14   : > { %3826 = vmatpush.msra.mxu2 %v244_v3  ;;  %3827 = vmatpush.msra.mxu3 %v244_v3  ;;  %v224_v8 = vld [vmem:[#allocation2 + $0xe0] sm:$0xff]  ;;  %v4128_v31 = vld [vmem:[%s4103_s22 + $0x88] sm:$0xff]  ;;  %v243_v38 = vld [vmem:[#allocation2 + $0x178] sm:$0xff] }
  0x15   : > { %461 = vmatpush.msra.mxu0 %v240_v4  ;;  %3828 = vmatpush.msra.mxu1 %v240_v4  ;;  %v220_v9 = vld [vmem:[#allocation2 + $0xc0] sm:$0xff]  ;;  %v4131_v32 = vld [vmem:[%s4103_s22 + $0xc8] sm:$0xff]  ;;  %v238_v40 = vld [vmem:[#allocation2 + $0x150] sm:$0xff] }
  0x16   : > { %3829 = vmatpush.msra.mxu2 %v240_v4  ;;  %3830 = vmatpush.msra.mxu3 %v240_v4  ;;  %v216_v10 = vld [vmem:[#allocation2 + $0xa0] sm:$0xff]  ;;  %v241_v36 = vld [vmem:[#allocation2 + $0x168] sm:$0xff]  ;;  %v239_v41 = vld [vmem:[#allocation2 + $0x158] sm:$0xff] }
  0x17   : > { %462 = vmatpush.msra.mxu0 %v236_v5  ;;  %3831 = vmatpush.msra.mxu1 %v236_v5  ;;  %v212_v11 = vld [vmem:[#allocation2 + $0x80] sm:$0xff]  ;;  %v237_v39 = vld [vmem:[#allocation2 + $0x148] sm:$0xff]  ;;  %v4138_v42 = vld [vmem:[%s4103_s22 + $0x10] sm:$0xff] }
  0x18   : > { %3832 = vmatpush.msra.mxu2 %v236_v5  ;;  %3833 = vmatpush.msra.mxu3 %v236_v5  ;;  %v208_v12 = vld [vmem:[#allocation2 + $0x60] sm:$0xff]  ;;  %v4141_v43 = vld [vmem:[%s4103_s22 + $0x50] sm:$0xff]  ;;  %v233_v46 = vld [vmem:[#allocation2 + $0x128] sm:$0xff] }
  0x19   : > { %463 = vmatpush.msra.mxu0 %v232_v6  ;;  %3834 = vmatpush.msra.mxu1 %v232_v6  ;;  %v204_v13 = vld [vmem:[#allocation2 + $0x40] sm:$0xff]  ;;  %v4144_v44 = vld [vmem:[%s4103_s22 + $0x90] sm:$0xff]  ;;  %v235_v48 = vld [vmem:[#allocation2 + $0x138] sm:$0xff] }
  0x1a   : > { %3835 = vmatpush.msra.mxu2 %v232_v6  ;;  %3836 = vmatpush.msra.mxu3 %v232_v6  ;;  %v200_v14 = vld [vmem:[#allocation2 + $0x20] sm:$0xff]  ;;  %v4147_v45 = vld [vmem:[%s4103_s22 + $0xd0] sm:$0xff]  ;;  %v229_v49 = vld [vmem:[#allocation2 + $0x108] sm:$0xff] }
  0x1b   : > { %464 = vmatpush.msra.mxu0 %v228_v7  ;;  %3837 = vmatpush.msra.mxu1 %v228_v7  ;;  %v196_v15 = vld [vmem:[#allocation2] sm:$0xff]  ;;  %v234_v47 = vld [vmem:[#allocation2 + $0x130] sm:$0xff]  ;;  %v231_v51 = vld [vmem:[#allocation2 + $0x118] sm:$0xff] }
  0x1c   : > { %3838 = vmatpush.msra.mxu2 %v228_v7  ;;  %3839 = vmatpush.msra.mxu3 %v228_v7  ;;  %v4106_v16 = vld [vmem:[%s4103_s22] sm:$0xff]  ;;  %v230_v50 = vld [vmem:[#allocation2 + $0x110] sm:$0xff]  ;;  %v225_v52 = vld [vmem:[#allocation2 + $0xe8] sm:$0xff] }
  0x1d   : > { %465 = vmatpush.msra.mxu0 %v224_v8  ;;  %3840 = vmatpush.msra.mxu1 %v224_v8  ;;  %v4109_v17 = vld [vmem:[%s4103_s22 + $0x40] sm:$0xff]  ;;  %v226_v53 = vld [vmem:[#allocation2 + $0xf0] sm:$0xff]  ;;  %v227_v54 = vld [vmem:[#allocation2 + $0xf8] sm:$0xff] }
  0x1e   : > { %3841 = vmatpush.msra.mxu2 %v224_v8  ;;  %3842 = vmatpush.msra.mxu3 %v224_v8  ;;  %v4112_v18 = vld [vmem:[%s4103_s22 + $0x80] sm:$0xff]  ;;  %v4154_v55 = vld [vmem:[%s4103_s22 + $0x18] sm:$0xff]  ;;  %v221_v59 = vld [vmem:[#allocation2 + $0xc8] sm:$0xff] }
  0x1f   : > { %466 = vmatpush.msra.mxu0 %v220_v9  ;;  %3843 = vmatpush.msra.mxu1 %v220_v9  ;;  %v4115_v19 = vld [vmem:[%s4103_s22 + $0xc0] sm:$0xff]  ;;  %v4157_v56 = vld [vmem:[%s4103_s22 + $0x58] sm:$0xff]  ;;  %v222_v60 = vld [vmem:[#allocation2 + $0xd0] sm:$0xff] }
  0x20   : > { %3844 = vmatpush.msra.mxu2 %v220_v9  ;;  %3845 = vmatpush.msra.mxu3 %v220_v9  ;;  %v4160_v57 = vld [vmem:[%s4103_s22 + $0x98] sm:$0xff]  ;;  %v217_v62 = vld [vmem:[#allocation2 + $0xa8] sm:$0xff]  ;;  %v218_v63 = vld [vmem:[#allocation2 + $0xb0] sm:$0xff] }
  0x21   : > { %467 = vmatpush.msra.mxu0 %v216_v10  ;;  %3846 = vmatpush.msra.mxu1 %v216_v10  ;;  %v4163_v58 = vld [vmem:[%s4103_s22 + $0xd8] sm:$0xff]  ;;  %v213_v1 = vld [vmem:[#allocation2 + $0x88] sm:$0xff]  ;;  %v214_v2 = vld [vmem:[#allocation2 + $0x90] sm:$0xff] }
  0x22   : > { %3847 = vmatpush.msra.mxu2 %v216_v10  ;;  %3848 = vmatpush.msra.mxu3 %v216_v10  ;;  %v223_v61 = vld [vmem:[#allocation2 + $0xd8] sm:$0xff]  ;;  %v4170_v4 = vld [vmem:[%s4103_s22 + $0x20] sm:$0xff]  ;;  %v209_v8 = vld [vmem:[#allocation2 + $0x68] sm:$0xff] }
  0x23   : > { %468 = vmatpush.msra.mxu0 %v212_v11  ;;  %3849 = vmatpush.msra.mxu1 %v212_v11  ;;  %v219_v0 = vld [vmem:[#allocation2 + $0xb8] sm:$0xff]  ;;  %v4173_v5 = vld [vmem:[%s4103_s22 + $0x60] sm:$0xff]  ;;  %v210_v9 = vld [vmem:[#allocation2 + $0x70] sm:$0xff] }
  0x24   : > { %3850 = vmatpush.msra.mxu2 %v212_v11  ;;  %3851 = vmatpush.msra.mxu3 %v212_v11  ;;  %v215_v3 = vld [vmem:[#allocation2 + $0x98] sm:$0xff]  ;;  %v4176_v6 = vld [vmem:[%s4103_s22 + $0xa0] sm:$0xff]  ;;  %v205_v11 = vld [vmem:[#allocation2 + $0x48] sm:$0xff] }
  0x25   : > { %469 = vmatpush.msra.mxu0 %v208_v12  ;;  %3852 = vmatpush.msra.mxu1 %v208_v12  ;;  %v4179_v7 = vld [vmem:[%s4103_s22 + $0xe0] sm:$0xff]  ;;  %v211_v10 = vld [vmem:[#allocation2 + $0x78] sm:$0xff] }
  0x26   : > { %3853 = vmatpush.msra.mxu2 %v208_v12  ;;  %3854 = vmatpush.msra.mxu3 %v208_v12  ;;  %v206_v12 = vld [vmem:[#allocation2 + $0x50] sm:$0xff] }
  0x27   : > { %470 = vmatpush.msra.mxu0 %v204_v13  ;;  %3855 = vmatpush.msra.mxu1 %v204_v13 }
  0x28   : > { %3856 = vmatpush.msra.mxu2 %v204_v13  ;;  %3857 = vmatpush.msra.mxu3 %v204_v13  ;;  %v207_v13 = vld [vmem:[#allocation2 + $0x58] sm:$0xff] }
  0x29   : > { %471 = vmatpush.msra.mxu0 %v200_v14  ;;  %3858 = vmatpush.msra.mxu1 %v200_v14 }
  0x2a   : > { %3859 = vmatpush.msra.mxu2 %v200_v14  ;;  %3860 = vmatpush.msra.mxu3 %v200_v14  ;;  %v201_v14 = vld [vmem:[#allocation2 + $0x28] sm:$0xff] }
  0x2b   : > { %472 = vmatpush.msra.mxu0 %v196_v15  ;;  %3861 = vmatpush.msra.mxu1 %v196_v15 }
  0x2c   : > { %3862 = vmatpush.msra.mxu2 %v196_v15  ;;  %3863 = vmatpush.msra.mxu3 %v196_v15  ;;  %v202_v15 = vld [vmem:[#allocation2 + $0x30] sm:$0xff] }
  0x2d   : > { %473 = vmatmul.f32.vlgmr.msra.gmra.mxu0 %v4106_v16  ;;  %497 = vmatmul.f32.vlgmr.msra.gmra.mxu1 %v4109_v17 }
  0x2e   : > { %521 = vmatmul.f32.vlgmr.msra.gmra.mxu2 %v4112_v18  ;;  %545 = vmatmul.f32.vlgmr.msra.gmra.mxu3 %v4115_v19 }
  0x2f   : > { %570 = vmatpush.msrb.mxu1 %v257_v20  ;;  %683 = vmatpush.msrb.mxu2 %v258_v22  ;;  %v203_v20 = vld [vmem:[#allocation2 + $0x38] sm:$0xff]  ;;  %v4189_v22 = vld [vmem:[%s4103_s22 + $0x68] sm:$0xff] }
  0x30   : > { %796 = vmatpush.msrb.mxu3 %v259_v23  ;;  %v4192_v23 = vld [vmem:[%s4103_s22 + $0xa8] sm:$0xff] }
  0x31   : > { %571 = vmatpush.msrb.mxu1 %v253_v21  ;;  %684 = vmatpush.msrb.mxu2 %v254_v24  ;;  %v4186_v21 = vld [vmem:[%s4103_s22 + $0x28] sm:$0xff] }
  0x32   : > { %797 = vmatpush.msrb.mxu3 %v255_v25  ;;  %v4195_v24 = vld [vmem:[%s4103_s22 + $0xe8] sm:$0xff] }
  0x33   : > { %572 = vmatpush.msrb.mxu1 %v249_v26  ;;  %685 = vmatpush.msrb.mxu2 %v250_v27  ;;  %v197_v25 = vld [vmem:[#allocation2 + $0x8] sm:$0xff]  ;;  %v198_v26 = vld [vmem:[#allocation2 + $0x10] sm:$0xff]  ;;  %v199_v27 = vld [vmem:[#allocation2 + $0x18] sm:$0xff] }
  0x34   : > { %798 = vmatpush.msrb.mxu3 %v251_v28  ;;  %v322_v28 = vld [vmem:[#allocation2 + $0x5e0] sm:$0xff] }
  0x35   : > { %476 = vmatmul.f32.gmra.mxu0 %v4122_v29  ;;  %500 = vmatmul.f32.gmra.mxu1 %v4125_v30 }
  0x36   : > { %524 = vmatmul.f32.gmra.mxu2 %v4128_v31  ;;  %548 = vmatmul.f32.gmra.mxu3 %v4131_v32 }
  0x37   : > { %573 = vmatpush.msrb.mxu1 %v245_v33  ;;  %686 = vmatpush.msrb.mxu2 %v246_v34  ;;  %v4202_v33 = vld [vmem:[%s4103_s22 + $0x30] sm:$0xff] }
  0x38   : > { %799 = vmatpush.msrb.mxu3 %v247_v35  ;;  %v4205_v34 = vld [vmem:[%s4103_s22 + $0x70] sm:$0xff] }
  0x39   : > { %574 = vmatpush.msrb.mxu1 %v241_v36  ;;  %687 = vmatpush.msrb.mxu2 %v242_v37  ;;  %v4208_v35 = vld [vmem:[%s4103_s22 + $0xb0] sm:$0xff]  ;;  %v320_v37 = vld [vmem:[#allocation2 + $0x5c0] sm:$0xff] }
  0x3a   : > { %800 = vmatpush.msrb.mxu3 %v243_v38  ;;  %v4211_v36 = vld [vmem:[%s4103_s22 + $0xf0] sm:$0xff]  ;;  %v4218_v38 = vld [vmem:[%s4103_s22 + $0x38] sm:$0xff] }
  0x3b   : > { %575 = vmatpush.msrb.mxu1 %v237_v39  ;;  %688 = vmatpush.msrb.mxu2 %v238_v40  ;;  %v4221_v39 = vld [vmem:[%s4103_s22 + $0x78] sm:$0xff] }
  0x3c   : > { %801 = vmatpush.msrb.mxu3 %v239_v41  ;;  %v4224_v40 = vld [vmem:[%s4103_s22 + $0xb8] sm:$0xff] }
  0x3d   : > { %479 = vmatmul.f32.gmra.mxu0 %v4138_v42  ;;  %503 = vmatmul.f32.gmra.mxu1 %v4141_v43  ;;  %v4227_v41 = vld [vmem:[%s4103_s22 + $0xf8] sm:$0xff] }
  0x3e   : > { %527 = vmatmul.f32.gmra.mxu2 %v4144_v44  ;;  %551 = vmatmul.f32.gmra.mxu3 %v4147_v45 }
  0x3f   : > { %576 = vmatpush.msrb.mxu1 %v233_v46  ;;  %689 = vmatpush.msrb.mxu2 %v234_v47  ;;  %v318_v46 = vld [vmem:[#allocation2 + $0x5a0] sm:$0xff] }
  0x40   : > { %802 = vmatpush.msrb.mxu3 %v235_v48  ;;  %v290_v47 = vld [vmem:[#allocation2 + $0x3e0] sm:$0xff] }
  0x41   : > { %577 = vmatpush.msrb.mxu1 %v229_v49  ;;  %690 = vmatpush.msrb.mxu2 %v230_v50  ;;  %v288_v48 = vld [vmem:[#allocation2 + $0x3c0] sm:$0xff] }
  0x42   : > { %803 = vmatpush.msrb.mxu3 %v231_v51  ;;  %1042 = vmatpush.msrb.mxu0 %v290_v47  ;;  %v286_v49 = vld [vmem:[#allocation2 + $0x3a0] sm:$0xff] }
  0x43   : > { %578 = vmatpush.msrb.mxu1 %v225_v52  ;;  %691 = vmatpush.msrb.mxu2 %v226_v53  ;;  %v284_v50 = vld [vmem:[#allocation2 + $0x380] sm:$0xff] }
  0x44   : > { %804 = vmatpush.msrb.mxu3 %v227_v54  ;;  %1043 = vmatpush.msrb.mxu0 %v288_v48  ;;  %v282_v51 = vld [vmem:[#allocation2 + $0x360] sm:$0xff] }
  0x45   : > { %482 = vmatmul.f32.gmra.mxu0 %v4154_v55  ;;  %506 = vmatmul.f32.gmra.mxu1 %v4157_v56  ;;  %v280_v52 = vld [vmem:[#allocation2 + $0x340] sm:$0xff] }
  0x46   : > { %530 = vmatmul.f32.gmra.mxu2 %v4160_v57  ;;  %554 = vmatmul.f32.gmra.mxu3 %v4163_v58  ;;  %v316_v53 = vld [vmem:[#allocation2 + $0x580] sm:$0xff] }
  0x47   : > { %579 = vmatpush.msrb.mxu1 %v221_v59  ;;  %692 = vmatpush.msrb.mxu2 %v222_v60  ;;  %v276_v54 = vld [vmem:[#allocation2 + $0x300] sm:$0xff] }
  0x48   : > { %805 = vmatpush.msrb.mxu3 %v223_v61  ;;  %1044 = vmatpush.msrb.mxu0 %v286_v49  ;;  %v274_v59 = vld [vmem:[#allocation2 + $0x2e0] sm:$0xff] }
  0x49   : > { %580 = vmatpush.msrb.mxu1 %v217_v62  ;;  %693 = vmatpush.msrb.mxu2 %v218_v63  ;;  %v270_v60 = vld [vmem:[#allocation2 + $0x2a0] sm:$0xff] }
  0x4a   : > { %806 = vmatpush.msrb.mxu3 %v219_v0  ;;  %1045 = vmatpush.msrb.mxu0 %v284_v50  ;;  %v268_v61 = vld [vmem:[#allocation2 + $0x280] sm:$0xff] }
  0x4b   : > { %581 = vmatpush.msrb.mxu1 %v213_v1  ;;  %694 = vmatpush.msrb.mxu2 %v214_v2  ;;  %v266_v62 = vld [vmem:[#allocation2 + $0x260] sm:$0xff] }
  0x4c   : > { %807 = vmatpush.msrb.mxu3 %v215_v3  ;;  %1046 = vmatpush.msrb.mxu0 %v282_v51  ;;  %v262_v63 = vld [vmem:[#allocation2 + $0x220] sm:$0xff] }
  0x4d   : > { %485 = vmatmul.f32.gmra.mxu0 %v4170_v4  ;;  %509 = vmatmul.f32.gmra.mxu1 %v4173_v5  ;;  %v314_v0 = vld [vmem:[#allocation2 + $0x560] sm:$0xff] }
  0x4e   : > { %533 = vmatmul.f32.gmra.mxu2 %v4176_v6  ;;  %557 = vmatmul.f32.gmra.mxu3 %v4179_v7  ;;  %v260_v1 = vld [vmem:[#allocation2 + $0x200] sm:$0xff] }
  0x4f   : > { %582 = vmatpush.msrb.mxu1 %v209_v8  ;;  %695 = vmatpush.msrb.mxu2 %v210_v9  ;;  %v4254_v2 = vld [vmem:[#allocation2 + $0xa00] ss:$8 sm:$0xf] }
  0x50   : > { %808 = vmatpush.msrb.mxu3 %v211_v10  ;;  %1047 = vmatpush.msrb.mxu0 %v280_v52  ;;  %v4260_v3 = vperm.slane %v4254_v2, 0  ;;  %v308_v48 = vld [vmem:[#allocation2 + $0x500] sm:$0xff] }
  0x51   : > { %583 = vmatpush.msrb.mxu1 %v205_v11  ;;  %696 = vmatpush.msrb.mxu2 %v206_v12  ;;  %v310_v12 = vld [vmem:[#allocation2 + $0x520] sm:$0xff] }
  0x52   : > { %809 = vmatpush.msrb.mxu3 %v207_v13 }
  0x53   : > { %584 = vmatpush.msrb.mxu1 %v201_v14  ;;  %697 = vmatpush.msrb.mxu2 %v202_v15 }
  0x54   : > { %810 = vmatpush.msrb.mxu3 %v203_v20 }
  0x55   : > { %488 = vmatmul.f32.gmra.mxu0 %v4186_v21  ;;  %512 = vmatmul.f32.gmra.mxu1 %v4189_v22 }
  0x56   : > { %536 = vmatmul.f32.gmra.mxu2 %v4192_v23  ;;  %560 = vmatmul.f32.gmra.mxu3 %v4195_v24 }
  0x57   : > { %585 = vmatpush.msrb.mxu1 %v197_v25  ;;  %698 = vmatpush.msrb.mxu2 %v198_v26 }
  0x58   : > { %811 = vmatpush.msrb.mxu3 %v199_v27 }
  0x59   : > { %1155 = vmatpush.msra.mxu1 %v322_v28 }
  0x5b   : > { %1156 = vmatpush.msra.mxu1 %v320_v37 }
  0x5d   : > { %491 = vmatmul.f32.gmra.mxu0 %v4202_v33  ;;  %515 = vmatmul.f32.gmra.mxu1 %v4205_v34 }
  0x5e   : > { %539 = vmatmul.f32.gmra.mxu2 %v4208_v35  ;;  %563 = vmatmul.f32.gmra.mxu3 %v4211_v36 }
  0x5f   : > { %1157 = vmatpush.msra.mxu1 %v318_v46 }
  0x61   : > { %1158 = vmatpush.msra.mxu1 %v316_v53 }
  0x63   : > { %1159 = vmatpush.msra.mxu1 %v314_v0 }
  0x65   : > { %494 = vmatmul.f32.gmra.mxu0 %v4218_v38  ;;  %518 = vmatmul.f32.gmra.mxu1 %v4221_v39 }
  0x66   : > { %542 = vmatmul.f32.gmra.mxu2 %v4224_v40  ;;  %566 = vmatmul.f32.gmra.mxu3 %v4227_v41 }
  0x6d   : > { %586 = vmatmul.f32.vlgmr.msrb.gmra.mxu1 %v4106_v16 }
  0x6e   : > { %699 = vmatmul.f32.vlgmr.msrb.gmra.mxu2 %v4106_v16  ;;  %812 = vmatmul.f32.vlgmr.msrb.gmra.mxu3 %v4106_v16  ;;  %v278_v16 = vld [vmem:[#allocation2 + $0x320] sm:$0xff] }
  0x6f   : > { %1048 = vmatpush.msrb.mxu0 %v278_v16 }
  0x71   : > { %1049 = vmatpush.msrb.mxu0 %v276_v54 }
  0x73   : > { %1050 = vmatpush.msrb.mxu0 %v274_v59  ;;  %v354_v59 = vld [vmem:[#allocation2 + $0x7e0] sm:$0xff] }
  0x74   : > { %1268 = vmatpush.msra.mxu2 %v354_v59 }
  0x75   : > { %589 = vmatmul.f32.gmra.mxu1 %v4122_v29 }
  0x76   : > { %702 = vmatmul.f32.gmra.mxu2 %v4122_v29  ;;  %815 = vmatmul.f32.gmra.mxu3 %v4122_v29  ;;  %v272_v29 = vld [vmem:[#allocation2 + $0x2c0] sm:$0xff] }
  0x77   : > { %1051 = vmatpush.msrb.mxu0 %v272_v29  ;;  %v386_v29 = vld [vmem:[#allocation2 + $0x9e0] sm:$0xff] }
  0x78   : > { %1381 = vmatpush.msra.mxu3 %v386_v29 }
  0x79   : > { %1052 = vmatpush.msrb.mxu0 %v270_v60 }
  0x7b   : > { %1053 = vmatpush.msrb.mxu0 %v268_v61 }
  0x7d   : > { %592 = vmatmul.f32.gmra.mxu1 %v4138_v42  ;;  %1054 = vmatpush.msrb.mxu0 %v266_v62 }
  0x7e   : > { %705 = vmatmul.f32.gmra.mxu2 %v4138_v42  ;;  %818 = vmatmul.f32.gmra.mxu3 %v4138_v42  ;;  %v264_v42 = vld [vmem:[#allocation2 + $0x240] sm:$0xff] }
  0x7f   : > { %1055 = vmatpush.msrb.mxu0 %v264_v42 }
  0x81   : > { %1056 = vmatpush.msrb.mxu0 %v262_v63 }
  0x83   : > { %1057 = vmatpush.msrb.mxu0 %v260_v1 }
  0x85   : > { %595 = vmatmul.f32.gmra.mxu1 %v4154_v55 }
  0x86   : > { %708 = vmatmul.f32.gmra.mxu2 %v4154_v55  ;;  %821 = vmatmul.f32.gmra.mxu3 %v4154_v55  ;;  %v312_v55 = vld [vmem:[#allocation2 + $0x540] sm:$0xff] }
  0x87   : > { %1160 = vmatpush.msra.mxu1 %v312_v55  ;;  %v306_v55 = vld [vmem:[#allocation2 + $0x4e0] sm:$0xff] }
  0x89   : > { %1161 = vmatpush.msra.mxu1 %v310_v12 }
  0x8b   : > { %1162 = vmatpush.msra.mxu1 %v308_v48 }
  0x8d   : > { %598 = vmatmul.f32.gmra.mxu1 %v4170_v4 }
  0x8e   : > { %711 = vmatmul.f32.gmra.mxu2 %v4170_v4  ;;  %824 = vmatmul.f32.gmra.mxu3 %v4170_v4 }
  0x8f   : > { %1163 = vmatpush.msra.mxu1 %v306_v55 }
  0x95   : > { %601 = vmatmul.f32.gmra.mxu1 %v4186_v21 }
  0x96   : > { %714 = vmatmul.f32.gmra.mxu2 %v4186_v21  ;;  %827 = vmatmul.f32.gmra.mxu3 %v4186_v21 }
  0x9d   : > { %604 = vmatmul.f32.gmra.mxu1 %v4202_v33 }
  0x9e   : > { %717 = vmatmul.f32.gmra.mxu2 %v4202_v33  ;;  %830 = vmatmul.f32.gmra.mxu3 %v4202_v33 }
  0xa5   : > { %607 = vmatmul.f32.gmra.mxu1 %v4218_v38 }
  0xa6   : > { %720 = vmatmul.f32.gmra.mxu2 %v4218_v38  ;;  %833 = vmatmul.f32.gmra.mxu3 %v4218_v38 }
  0xaa   : > { %v474_v4 = vpop.f32.mrf.mxu0  ;;  %v498_v8 = vpop.f32.mrf.mxu1 }
  0xab   : > { %v4263_v9 = vadd.f32 %v474_v4, %v4260_v3  ;;  %v4266_v10 = vadd.f32 %v498_v8, %v4260_v3 }
  0xad   : > { %7573 = vst [vmem:[#allocation5_spill] sm:$0xff] %v4266_v10  ;;  %v7343_v11 = vmax.f32 %v4263_v9, 0.0  ;;  %610 = vmatmul.f32.gmra.mxu1 %v4109_v17 }
  0xae   : > { %723 = vmatmul.f32.gmra.mxu2 %v4109_v17  ;;  %836 = vmatmul.f32.gmra.mxu3 %v4109_v17 }
  0xaf   : > { %1058 = vmatmul.f32.vlgmr.msrb.gmra.mxu0 %v7343_v11 }
  0xb1   : > { %v4274_v13 = vpop.f32.mrf.mxu2  ;;  %v546_v14 = vpop.f32.mrf.mxu3 }
  0xb2   : > { %v4277_v15 = vadd.f32 %v546_v14, %v4260_v3  ;;  %v477_v20 = vpop.f32.mrf.mxu0  ;;  %v501_v21 = vpop.f32.mrf.mxu1 }
  0xb3   : > { %v4280_v25 = vadd.f32 %v477_v20, %v4260_v3  ;;  %v4283_v26 = vadd.f32 %v501_v21, %v4260_v3 }
  0xb4   : > { %7574 = vst [vmem:[#allocation6_spill] sm:$0xff] %v4277_v15 }
  0xb5   : > { %7575 = vst [vmem:[#allocation7_spill] sm:$0xff] %v4280_v25  ;;  %613 = vmatmul.f32.gmra.mxu1 %v4125_v30  ;;  %v7342_v17 = vmax.f32 %v4280_v25, 0.0  ;;  %v334_v25 = vld [vmem:[#allocation2 + $0x6a0] sm:$0xff] }
  0xb6   : > { %7576 = vst [vmem:[#allocation8_spill] sm:$0xff] %v4283_v26  ;;  %726 = vmatmul.f32.gmra.mxu2 %v4125_v30  ;;  %839 = vmatmul.f32.gmra.mxu3 %v4125_v30 }
  0xb7   : > { %1061 = vmatmul.f32.gmra.mxu0 %v7342_v17 }
  0xb9   : > { %v4291_v27 = vpop.f32.mrf.mxu2  ;;  %v549_v28 = vpop.f32.mrf.mxu3 }
  0xba   : > { %v4294_v33 = vadd.f32 %v549_v28, %v4260_v3  ;;  %v480_v37 = vpop.f32.mrf.mxu0  ;;  %v504_v38 = vpop.f32.mrf.mxu1 }
  0xbb   : > { %v4297_v46 = vadd.f32 %v480_v37, %v4260_v3  ;;  %v4300_v47 = vadd.f32 %v504_v38, %v4260_v3  ;;  %v352_v37 = vld [vmem:[#allocation2 + $0x7c0] sm:$0xff] }
  0xbc   : > { %7577 = vst [vmem:[#allocation9_spill] sm:$0xff] %v4294_v33  ;;  %1269 = vmatpush.msra.mxu2 %v352_v37  ;;  %v384_v38 = vld [vmem:[#allocation2 + $0x9c0] sm:$0xff] }
  0xbd   : > { %7578 = vst [vmem:[#allocation10_spill] sm:$0xff] %v4297_v46  ;;  %616 = vmatmul.f32.gmra.mxu1 %v4141_v43  ;;  %v7341_v30 = vmax.f32 %v4297_v46, 0.0  ;;  %1382 = vmatpush.msra.mxu3 %v384_v38 }
  0xbe   : > { %7579 = vst [vmem:[#allocation11_spill] sm:$0xff] %v4300_v47  ;;  %729 = vmatmul.f32.gmra.mxu2 %v4141_v43  ;;  %842 = vmatmul.f32.gmra.mxu3 %v4141_v43 }
  0xbf   : > { %1064 = vmatmul.f32.gmra.mxu0 %v7341_v30 }
  0xc1   : > { %v4308_v49 = vpop.f32.mrf.mxu2  ;;  %v552_v50 = vpop.f32.mrf.mxu3 }
  0xc2   : > { %v4311_v51 = vadd.f32 %v552_v50, %v4260_v3  ;;  %v483_v52 = vpop.f32.mrf.mxu0  ;;  %v507_v16 = vpop.f32.mrf.mxu1 }
  0xc3   : > { %v4314_v53 = vadd.f32 %v483_v52, %v4260_v3  ;;  %v4317_v54 = vadd.f32 %v507_v16, %v4260_v3 }
  0xc4   : > { %7580 = vst [vmem:[#allocation12_spill] sm:$0xff] %v4311_v51 }
  0xc5   : > { %7581 = vst [vmem:[#allocation13_spill] sm:$0xff] %v4314_v53  ;;  %619 = vmatmul.f32.gmra.mxu1 %v4157_v56  ;;  %v7339_v43 = vmax.f32 %v4314_v53, 0.0 }
  0xc6   : > { %7582 = vst [vmem:[#allocation14_spill] sm:$0xff] %v4317_v54  ;;  %732 = vmatmul.f32.gmra.mxu2 %v4157_v56  ;;  %845 = vmatmul.f32.gmra.mxu3 %v4157_v56 }
  0xc7   : > { %1067 = vmatmul.f32.gmra.mxu0 %v7339_v43  ;;  %v7344_v43 = vmax.f32 %v4317_v54, 0.0 }
  0xc9   : > { %v4325_v60 = vpop.f32.mrf.mxu2  ;;  %v555_v61 = vpop.f32.mrf.mxu3 }
  0xca   : > { %v4328_v62 = vadd.f32 %v555_v61, %v4260_v3  ;;  %v486_v42 = vpop.f32.mrf.mxu0  ;;  %v510_v63 = vpop.f32.mrf.mxu1 }
  0xcb   : > { %v4331_v0 = vadd.f32 %v486_v42, %v4260_v3  ;;  %v4334_v56 = vadd.f32 %v510_v63, %v4260_v3  ;;  %v304_v42 = vld [vmem:[#allocation2 + $0x4c0] sm:$0xff] }
  0xcc   : > { %7583 = vst [vmem:[#allocation15_spill] sm:$0xff] %v4328_v62  ;;  %1164 = vmatpush.msra.mxu1 %v304_v42 }
  0xcd   : > { %7584 = vst [vmem:[#allocation16_spill] sm:$0xff] %v4331_v0  ;;  %622 = vmatmul.f32.gmra.mxu1 %v4173_v5  ;;  %v7337_v1 = vmax.f32 %v4331_v0, 0.0  ;;  %v7346_v11 = vmax.f32 %v4334_v56, 0.0 }
  0xce   : > { %7585 = vst [vmem:[#allocation17_spill] sm:$0xff] %v4334_v56  ;;  %735 = vmatmul.f32.gmra.mxu2 %v4173_v5  ;;  %848 = vmatmul.f32.gmra.mxu3 %v4173_v5 }
  0xcf   : > { %1070 = vmatmul.f32.gmra.mxu0 %v7337_v1  ;;  %v7340_v1 = vmax.f32 %v4300_v47, 0.0 }
  0xd1   : > { %v4342_v4 = vpop.f32.mrf.mxu2  ;;  %v558_v8 = vpop.f32.mrf.mxu3 }
  0xd2   : > { %v4345_v12 = vadd.f32 %v558_v8, %v4260_v3  ;;  %v489_v14 = vpop.f32.mrf.mxu0  ;;  %v513_v20 = vpop.f32.mrf.mxu1 }
  0xd3   : > { %v4348_v21 = vadd.f32 %v489_v14, %v4260_v3  ;;  %v4351_v28 = vadd.f32 %v513_v20, %v4260_v3 }
  0xd4   : > { %7586 = vst [vmem:[#allocation18_spill] sm:$0xff] %v4345_v12 }
  0xd5   : > { %7587 = vst [vmem:[#allocation19_spill] sm:$0xff] %v4348_v21  ;;  %625 = vmatmul.f32.gmra.mxu1 %v4189_v22  ;;  %v7336_v5 = vmax.f32 %v4348_v21, 0.0  ;;  %v7350_v54 = vmax.f32 %v4351_v28, 0.0 }
  0xd6   : > { %7588 = vst [vmem:[#allocation20_spill] sm:$0xff] %v4351_v28  ;;  %738 = vmatmul.f32.gmra.mxu2 %v4189_v22  ;;  %851 = vmatmul.f32.gmra.mxu3 %v4189_v22 }
  0xd7   : > { %1073 = vmatmul.f32.gmra.mxu0 %v7336_v5 }
  0xd9   : > { %v4359_v48 = vpop.f32.mrf.mxu2  ;;  %v561_v50 = vpop.f32.mrf.mxu3 }
  0xda   : > { %v4362_v52 = vadd.f32 %v561_v50, %v4260_v3  ;;  %v492_v16 = vpop.f32.mrf.mxu0  ;;  %v516_v59 = vpop.f32.mrf.mxu1  ;;  %v350_v50 = vld [vmem:[#allocation2 + $0x7a0] sm:$0xff] }
  0xdb   : > { %v4365_v29 = vadd.f32 %v492_v16, %v4260_v3  ;;  %v4368_v22 = vadd.f32 %v516_v59, %v4260_v3  ;;  %1270 = vmatpush.msra.mxu2 %v350_v50  ;;  %v382_v16 = vld [vmem:[#allocation2 + $0x9a0] sm:$0xff] }
  0xdc   : > { %7589 = vst [vmem:[#allocation21_spill] sm:$0xff] %v4362_v52  ;;  %1383 = vmatpush.msra.mxu3 %v382_v16 }
  0xdd   : > { %7590 = vst [vmem:[#allocation22_spill] sm:$0xff] %v4365_v29  ;;  %628 = vmatmul.f32.gmra.mxu1 %v4205_v34  ;;  %v7335_v61 = vmax.f32 %v4365_v29, 0.0 }
  0xde   : > { %7591 = vst [vmem:[#allocation23_spill] sm:$0xff] %v4368_v22  ;;  %741 = vmatmul.f32.gmra.mxu2 %v4205_v34  ;;  %854 = vmatmul.f32.gmra.mxu3 %v4205_v34 }
  0xdf   : > { %1076 = vmatmul.f32.gmra.mxu0 %v7335_v61 }
  0xe1   : > { %v4376_v63 = vpop.f32.mrf.mxu2  ;;  %v564_v55 = vpop.f32.mrf.mxu3 }
  0xe2   : > { %v4379_v8 = vadd.f32 %v564_v55, %v4260_v3  ;;  %v495_v14 = vpop.f32.mrf.mxu0  ;;  %v519_v20 = vpop.f32.mrf.mxu1 }
  0xe3   : > { %v4382_v37 = vadd.f32 %v495_v14, %v4260_v3  ;;  %v4385_v38 = vadd.f32 %v519_v20, %v4260_v3  ;;  %v7334_v20 = vmax.f32 %v4266_v10, 0.0 }
  0xe4   : > { %7592 = vst [vmem:[#allocation24_spill] sm:$0xff] %v4379_v8 }
  0xe5   : > { %7593 = vst [vmem:[#allocation25_spill] sm:$0xff] %v4382_v37  ;;  %631 = vmatmul.f32.gmra.mxu1 %v4221_v39  ;;  %v7333_v34 = vmax.f32 %v4382_v37, 0.0  ;;  %v7357_v28 = vmax.f32 %v4385_v38, 0.0 }
  0xe6   : > { %7594 = vst [vmem:[#allocation26_spill] sm:$0xff] %v4385_v38  ;;  %744 = vmatmul.f32.gmra.mxu2 %v4221_v39  ;;  %857 = vmatmul.f32.gmra.mxu3 %v4221_v39  ;;  %v302_v39 = vld [vmem:[#allocation2 + $0x4a0] sm:$0xff] }
  0xe7   : > { %1079 = vmatmul.f32.gmra.mxu0 %v7333_v34  ;;  %1165 = vmatpush.msra.mxu1 %v302_v39  ;;  %v7338_v34 = vmax.f32 %v4283_v26, 0.0  ;;  %v380_v39 = vld [vmem:[#allocation2 + $0x980] sm:$0xff]  ;;  %v7352_v26 = vmax.f32 %v4368_v22, 0.0 }
  0xe8   : > { %1384 = vmatpush.msra.mxu3 %v380_v39 }
  0xe9   : > { %v4393_v59 = vpop.f32.mrf.mxu2  ;;  %v567_v42 = vpop.f32.mrf.mxu3 }
  0xea   : > { %v4396_v55 = vadd.f32 %v567_v42, %v4260_v3  ;;  %v4398_v14 = vpop.f32.mrf.mxu1 }
  0xec   : > { %7595 = vst [vmem:[#allocation27_spill] sm:$0xff] %v4396_v55 }
  0xed   : > { %634 = vmatmul.f32.gmra.mxu1 %v4112_v18 }
  0xee   : > { %747 = vmatmul.f32.gmra.mxu2 %v4112_v18  ;;  %860 = vmatmul.f32.gmra.mxu3 %v4112_v18  ;;  %v348_v18 = vld [vmem:[#allocation2 + $0x780] sm:$0xff] }
  0xef   : > { %1082 = vmatmul.f32.gmra.mxu0 %v7334_v20  ;;  %1271 = vmatpush.msra.mxu2 %v348_v18 }
  0xf1   : > { %v4406_v50 = vpop.f32.mrf.mxu2  ;;  %v4408_v16 = vpop.f32.mrf.mxu3 }
  0xf2   : > { %v4410_v42 = vpop.f32.mrf.mxu1 }
  0xf5   : > { %637 = vmatmul.f32.gmra.mxu1 %v4128_v31 }
  0xf6   : > { %750 = vmatmul.f32.gmra.mxu2 %v4128_v31  ;;  %863 = vmatmul.f32.gmra.mxu3 %v4128_v31  ;;  %v300_v31 = vld [vmem:[#allocation2 + $0x480] sm:$0xff] }
  0xf7   : > { %1085 = vmatmul.f32.gmra.mxu0 %v7338_v34  ;;  %1166 = vmatpush.msra.mxu1 %v300_v31  ;;  %v378_v31 = vld [vmem:[#allocation2 + $0x960] sm:$0xff] }
  0xf8   : > { %1385 = vmatpush.msra.mxu3 %v378_v31 }
  0xf9   : > { %v4418_v20 = vpop.f32.mrf.mxu2  ;;  %v4420_v61 = vpop.f32.mrf.mxu3 }
  0xfa   : > { %v4422_v5 = vpop.f32.mrf.mxu1 }
  0xfd   : > { %640 = vmatmul.f32.gmra.mxu1 %v4144_v44 }
  0xfe   : > { %753 = vmatmul.f32.gmra.mxu2 %v4144_v44  ;;  %866 = vmatmul.f32.gmra.mxu3 %v4144_v44  ;;  %v346_v44 = vld [vmem:[#allocation2 + $0x760] sm:$0xff] }
  0xff   : > { %1088 = vmatmul.f32.gmra.mxu0 %v7340_v1  ;;  %1272 = vmatpush.msra.mxu2 %v346_v44 }
 0x101   : > { %v4430_v18 = vpop.f32.mrf.mxu2  ;;  %v4432_v39 = vpop.f32.mrf.mxu3 }
 0x102   : > { %v4434_v34 = vpop.f32.mrf.mxu1 }
 0x105   : > { %643 = vmatmul.f32.gmra.mxu1 %v4160_v57 }
 0x106   : > { %756 = vmatmul.f32.gmra.mxu2 %v4160_v57  ;;  %869 = vmatmul.f32.gmra.mxu3 %v4160_v57  ;;  %v298_v57 = vld [vmem:[#allocation2 + $0x460] sm:$0xff] }
 0x107   : > { %1091 = vmatmul.f32.gmra.mxu0 %v7344_v43  ;;  %1167 = vmatpush.msra.mxu1 %v298_v57  ;;  %v376_v57 = vld [vmem:[#allocation2 + $0x940] sm:$0xff] }
 0x108   : > { %1386 = vmatpush.msra.mxu3 %v376_v57 }
 0x109   : > { %v4442_v1 = vpop.f32.mrf.mxu2  ;;  %v4444_v30 = vpop.f32.mrf.mxu3 }
 0x10a   : > { %v4446_v17 = vpop.f32.mrf.mxu1 }
 0x10d   : > { %646 = vmatmul.f32.gmra.mxu1 %v4176_v6 }
 0x10e   : > { %759 = vmatmul.f32.gmra.mxu2 %v4176_v6  ;;  %872 = vmatmul.f32.gmra.mxu3 %v4176_v6  ;;  %v344_v6 = vld [vmem:[#allocation2 + $0x740] sm:$0xff] }
 0x10f   : > { %1094 = vmatmul.f32.gmra.mxu0 %v7346_v11  ;;  %1273 = vmatpush.msra.mxu2 %v344_v6 }
 0x111   : > { %v4454_v44 = vpop.f32.mrf.mxu2  ;;  %v4456_v31 = vpop.f32.mrf.mxu3 }
 0x112   : > { %v4458_v43 = vpop.f32.mrf.mxu1 }
 0x115   : > { %649 = vmatmul.f32.gmra.mxu1 %v4192_v23 }
 0x116   : > { %762 = vmatmul.f32.gmra.mxu2 %v4192_v23  ;;  %875 = vmatmul.f32.gmra.mxu3 %v4192_v23  ;;  %v296_v23 = vld [vmem:[#allocation2 + $0x440] sm:$0xff] }
 0x117   : > { %1097 = vmatmul.f32.gmra.mxu0 %v7350_v54  ;;  %1168 = vmatpush.msra.mxu1 %v296_v23  ;;  %v374_v23 = vld [vmem:[#allocation2 + $0x920] sm:$0xff] }
 0x118   : > { %1387 = vmatpush.msra.mxu3 %v374_v23 }
 0x119   : > { %v4466_v11 = vpop.f32.mrf.mxu2  ;;  %v4468_v56 = vpop.f32.mrf.mxu3 }
 0x11a   : > { %v4470_v47 = vpop.f32.mrf.mxu1 }
 0x11d   : > { %652 = vmatmul.f32.gmra.mxu1 %v4208_v35 }
 0x11e   : > { %765 = vmatmul.f32.gmra.mxu2 %v4208_v35  ;;  %878 = vmatmul.f32.gmra.mxu3 %v4208_v35  ;;  %v342_v35 = vld [vmem:[#allocation2 + $0x720] sm:$0xff] }
 0x11f   : > { %1100 = vmatmul.f32.gmra.mxu0 %v7352_v26  ;;  %1274 = vmatpush.msra.mxu2 %v342_v35  ;;  %v4492_v26 = vadd.f32 %v4274_v13, %v4260_v3  ;;  %v294_v35 = vld [vmem:[#allocation2 + $0x420] sm:$0xff]  ;;  %v4510_v13 = vadd.f32 %v4291_v27, %v4260_v3 }
 0x120   : > { %1169 = vmatpush.msra.mxu1 %v294_v35  ;;  %v372_v27 = vld [vmem:[#allocation2 + $0x900] sm:$0xff]  ;;  %v4528_v35 = vadd.f32 %v4308_v49, %v4260_v3 }
 0x121   : > { %v4478_v6 = vpop.f32.mrf.mxu2  ;;  %v4480_v57 = vpop.f32.mrf.mxu3  ;;  %7596 = vst [vmem:[#allocation28_spill] sm:$0xff] %v4492_v26  ;;  %v7363_v21 = vmax.f32 %v4510_v13, 0.0  ;;  %1388 = vmatpush.msra.mxu3 %v372_v27  ;;  %v338_v27 = vld [vmem:[#allocation2 + $0x6e0] sm:$0xff] }
 0x122   : > { %v4482_v54 = vpop.f32.mrf.mxu1  ;;  %7598 = vst [vmem:[#allocation30_spill] sm:$0xff] %v4510_v13  ;;  %v370_v49 = vld [vmem:[#allocation2 + $0x8e0] sm:$0xff] }
 0x123   : > { %7600 = vst [vmem:[#allocation32_spill] sm:$0xff] %v4528_v35  ;;  %1389 = vmatpush.msra.mxu3 %v370_v49  ;;  %v368_v13 = vld [vmem:[#allocation2 + $0x8c0] sm:$0xff] }
 0x124   : > { %v330_v49 = vld [vmem:[#allocation2 + $0x660] sm:$0xff] }
 0x125   : > { %655 = vmatmul.f32.gmra.mxu1 %v4224_v40  ;;  %1390 = vmatpush.msra.mxu3 %v368_v13  ;;  %v328_v13 = vld [vmem:[#allocation2 + $0x640] sm:$0xff] }
 0x126   : > { %768 = vmatmul.f32.gmra.mxu2 %v4224_v40  ;;  %881 = vmatmul.f32.gmra.mxu3 %v4224_v40  ;;  %v7360_v40 = vmax.f32 %v4492_v26, 0.0 }
 0x127   : > { %1103 = vmatmul.f32.gmra.mxu0 %v7357_v28 }
 0x129   : > { %v4494_v22 = vpop.f32.mrf.mxu2  ;;  %v4496_v10 = vpop.f32.mrf.mxu3 }
 0x12a   : > { %v4498_v37 = vpop.f32.mrf.mxu1 }
 0x12c   : > { %v4500_v29 = vpop.f32.mrf.mxu0 }
 0x12d   : > { %7597 = vst [vmem:[#allocation29_spill] sm:$0xff] %v4500_v29  ;;  %658 = vmatmul.f32.gmra.mxu1 %v4115_v19 }
 0x12e   : > { %771 = vmatmul.f32.gmra.mxu2 %v4115_v19  ;;  %884 = vmatmul.f32.gmra.mxu3 %v4115_v19  ;;  %v340_v19 = vld [vmem:[#allocation2 + $0x700] sm:$0xff] }
 0x12f   : > { %1106 = vmatmul.f32.gmra.mxu0 %v7360_v40  ;;  %1275 = vmatpush.msra.mxu2 %v340_v19  ;;  %v292_v19 = vld [vmem:[#allocation2 + $0x400] sm:$0xff] }
 0x130   : > { %1170 = vmatpush.msra.mxu1 %v292_v19  ;;  %v332_v19 = vld [vmem:[#allocation2 + $0x680] sm:$0xff] }
 0x131   : > { %v4512_v23 = vpop.f32.mrf.mxu2  ;;  %v4514_v28 = vpop.f32.mrf.mxu3  ;;  %1276 = vmatpush.msra.mxu2 %v338_v27 }
 0x132   : > { %v4516_v38 = vpop.f32.mrf.mxu1 }
 0x134   : > { %v4518_v29 = vpop.f32.mrf.mxu0 }
 0x135   : > { %7599 = vst [vmem:[#allocation31_spill] sm:$0xff] %v4518_v29  ;;  %661 = vmatmul.f32.gmra.mxu1 %v4131_v32 }
 0x136   : > { %774 = vmatmul.f32.gmra.mxu2 %v4131_v32  ;;  %887 = vmatmul.f32.gmra.mxu3 %v4131_v32  ;;  %v7369_v32 = vmax.f32 %v4528_v35, 0.0  ;;  %v366_v35 = vld [vmem:[#allocation2 + $0x8a0] sm:$0xff] }
 0x137   : > { %1109 = vmatmul.f32.gmra.mxu0 %v7363_v21  ;;  %v336_v21 = vld [vmem:[#allocation2 + $0x6c0] sm:$0xff]  ;;  %1391 = vmatpush.msra.mxu3 %v366_v35 }
 0x138   : > { %1277 = vmatpush.msra.mxu2 %v336_v21  ;;  %v362_v21 = vld [vmem:[#allocation2 + $0x860] sm:$0xff] }
 0x139   : > { %v4530_v40 = vpop.f32.mrf.mxu2  ;;  %v4532_v26 = vpop.f32.mrf.mxu3 }
 0x13a   : > { %v4534_v29 = vpop.f32.mrf.mxu1  ;;  %1278 = vmatpush.msra.mxu2 %v334_v25  ;;  %v4564_v25 = vadd.f32 %v4342_v4, %v4260_v3  ;;  %v291_v4 = vld [vmem:[#allocation2 + $0x3e8] sm:$0xff] }
 0x13b   : > { %7601 = vst [vmem:[#allocation33_spill] sm:$0xff] %v4534_v29  ;;  %1494 = vmatpush.msra.mxu0 %v291_v4 }
 0x13c   : > { %v4536_v0 = vpop.f32.mrf.mxu0  ;;  %1279 = vmatpush.msra.mxu2 %v332_v19  ;;  %7606 = vst [vmem:[#allocation38_spill] sm:$0xff] %v4564_v25  ;;  %v358_v19 = vld [vmem:[#allocation2 + $0x820] sm:$0xff] }
 0x13d   : > { %7602 = vst [vmem:[#allocation34_spill] sm:$0xff] %v4536_v0  ;;  %664 = vmatmul.f32.gmra.mxu1 %v4147_v45  ;;  %v4546_v0 = vadd.f32 %v4325_v60, %v4260_v3  ;;  %v364_v60 = vld [vmem:[#allocation2 + $0x880] sm:$0xff] }
 0x13e   : > { %777 = vmatmul.f32.gmra.mxu2 %v4147_v45  ;;  %890 = vmatmul.f32.gmra.mxu3 %v4147_v45 }
 0x13f   : > { %1112 = vmatmul.f32.gmra.mxu0 %v7369_v32  ;;  %7603 = vst [vmem:[#allocation35_spill] sm:$0xff] %v4546_v0  ;;  %v7370_v27 = vmax.f32 %v4546_v0, 0.0  ;;  %1392 = vmatpush.msra.mxu3 %v364_v60  ;;  %v7374_v60 = vmax.f32 %v4564_v25, 0.0  ;;  %v324_v0 = vld [vmem:[#allocation2 + $0x600] sm:$0xff] }
 0x140   : > { %1280 = vmatpush.msra.mxu2 %v330_v49  ;;  %v356_v49 = vld [vmem:[#allocation2 + $0x800] sm:$0xff] }
 0x141   : > { %v4548_v53 = vpop.f32.mrf.mxu2  ;;  %v4550_v46 = vpop.f32.mrf.mxu3  ;;  %1393 = vmatpush.msra.mxu3 %v362_v21 }
 0x142   : > { %v4552_v45 = vpop.f32.mrf.mxu1  ;;  %1281 = vmatpush.msra.mxu2 %v328_v13 }
 0x143   : > { %7604 = vst [vmem:[#allocation36_spill] sm:$0xff] %v4552_v45  ;;  %v360_v45 = vld [vmem:[#allocation2 + $0x840] sm:$0xff] }
 0x144   : > { %v4554_v32 = vpop.f32.mrf.mxu0  ;;  %1394 = vmatpush.msra.mxu3 %v360_v45  ;;  %v4582_v45 = vadd.f32 %v4359_v48, %v4260_v3 }
 0x145   : > { %7605 = vst [vmem:[#allocation37_spill] sm:$0xff] %v4554_v32  ;;  %667 = vmatmul.f32.gmra.mxu1 %v4163_v58 }
 0x146   : > { %780 = vmatmul.f32.gmra.mxu2 %v4163_v58  ;;  %893 = vmatmul.f32.gmra.mxu3 %v4163_v58  ;;  %v326_v58 = vld [vmem:[#allocation2 + $0x620] sm:$0xff]  ;;  %7609 = vst [vmem:[#allocation41_spill] sm:$0xff] %v4582_v45  ;;  %v7373_v25 = vmax.f32 %v4582_v45, 0.0 }
 0x147   : > { %1115 = vmatmul.f32.gmra.mxu0 %v7370_v27  ;;  %1282 = vmatpush.msra.mxu2 %v326_v58 }
 0x148   : > { %1395 = vmatpush.msra.mxu3 %v358_v19 }
 0x149   : > { %v4566_v35 = vpop.f32.mrf.mxu2  ;;  %v4568_v32 = vpop.f32.mrf.mxu3  ;;  %1283 = vmatpush.msra.mxu2 %v324_v0  ;;  %v4600_v0 = vadd.f32 %v4376_v63, %v4260_v3  ;;  %v4618_v63 = vadd.f32 %v4393_v59, %v4260_v3 }
 0x14a   : > { %v4570_v29 = vpop.f32.mrf.mxu1  ;;  %1396 = vmatpush.msra.mxu3 %v356_v49 }
 0x14b   : > { %7607 = vst [vmem:[#allocation39_spill] sm:$0xff] %v4570_v29  ;;  %v323_v29 = vld [vmem:[#allocation2 + $0x5e8] sm:$0xff]  ;;  %v7376_v49 = vmax.f32 %v4600_v0, 0.0  ;;  %v7378_v3 = vmax.f32 %v4618_v63, 0.0 }
 0x14c   : > { %v4572_v27 = vpop.f32.mrf.mxu0  ;;  %1607 = vmatpush.msrb.mxu1 %v323_v29  ;;  %7611 = vst [vmem:[#allocation43_spill] sm:$0xff] %v4600_v0 }
 0x14d   : > { %7608 = vst [vmem:[#allocation40_spill] sm:$0xff] %v4572_v27  ;;  %670 = vmatmul.f32.gmra.mxu1 %v4179_v7 }
 0x14e   : > { %783 = vmatmul.f32.gmra.mxu2 %v4179_v7  ;;  %896 = vmatmul.f32.gmra.mxu3 %v4179_v7  ;;  %7613 = vst [vmem:[#allocation45_spill] sm:$0xff] %v4618_v63 }
 0x14f   : > { %1118 = vmatmul.f32.gmra.mxu0 %v7374_v60 }
 0x151   : > { %v4584_v21 = vpop.f32.mrf.mxu2  ;;  %v4586_v13 = vpop.f32.mrf.mxu3 }
 0x152   : > { %v4588_v58 = vpop.f32.mrf.mxu1 }
 0x154   : > { %v4590_v7 = vpop.f32.mrf.mxu0 }
 0x155   : > { %7610 = vst [vmem:[#allocation42_spill] sm:$0xff] %v4590_v7  ;;  %673 = vmatmul.f32.gmra.mxu1 %v4195_v24  ;;  %v4628_v7 = vperm.slane %v4254_v2, 3 }
 0x156   : > { %786 = vmatmul.f32.gmra.mxu2 %v4195_v24  ;;  %899 = vmatmul.f32.gmra.mxu3 %v4195_v24  ;;  %v289_v24 = vld [vmem:[#allocation2 + $0x3c8] sm:$0xff] }
 0x157   : > { %1121 = vmatmul.f32.gmra.mxu0 %v7373_v25  ;;  %v321_v25 = vld [vmem:[#allocation2 + $0x5c8] sm:$0xff] }
 0x158   : > { %1608 = vmatpush.msrb.mxu1 %v321_v25  ;;  %1495 = vmatpush.msra.mxu0 %v289_v24  ;;  %v4645_v24 = vadd.f32 %v4408_v16, %v4628_v7 }
 0x159   : > { %v4602_v48 = vpop.f32.mrf.mxu2  ;;  %v4604_v29 = vpop.f32.mrf.mxu3 }
 0x15a   : > { %v4606_v19 = vpop.f32.mrf.mxu1  ;;  %7617 = vst [vmem:[#allocation49_spill] sm:$0xff] %v4645_v24 }
 0x15c   : > { %v4608_v4 = vpop.f32.mrf.mxu0 }
 0x15d   : > { %7612 = vst [vmem:[#allocation44_spill] sm:$0xff] %v4608_v4  ;;  %676 = vmatmul.f32.gmra.mxu1 %v4211_v36  ;;  %v4625_v4 = vperm.slane %v4254_v2, 2 }
 0x15e   : > { %789 = vmatmul.f32.gmra.mxu2 %v4211_v36  ;;  %902 = vmatmul.f32.gmra.mxu3 %v4211_v36 }
 0x15f   : > { %1124 = vmatmul.f32.gmra.mxu0 %v7376_v49  ;;  %v4633_v49 = vperm.slane %v4254_v2, 1  ;;  %v4641_v59 = vadd.f32 %v4406_v50, %v4625_v4  ;;  %v4671_v63 = vadd.f32 %v4418_v20, %v4625_v4  ;;  %v4675_v50 = vadd.f32 %v4420_v61, %v4628_v7 }
 0x161   : > { %v4620_v60 = vpop.f32.mrf.mxu2  ;;  %v4622_v45 = vpop.f32.mrf.mxu3  ;;  %7616 = vst [vmem:[#allocation48_spill] sm:$0xff] %v4641_v59  ;;  %v4651_v2 = vadd.f32 %v4398_v14, %v4633_v49  ;;  %v7623_v16 = vmax.f32 %v4641_v59, 0.0  ;;  %v4683_v14 = vadd.f32 %v4410_v42, %v4633_v49  ;;  %v7387_v59 = vmax.f32 %v4671_v63, 0.0 }
 0x162   : > { %v4630_v36 = vpop.f32.mrf.mxu1  ;;  %7621 = vst [vmem:[#allocation53_spill] sm:$0xff] %v4671_v63  ;;  %v4715_v42 = vadd.f32 %v4422_v5, %v4633_v49  ;;  %v4735_v63 = vadd.f32 %v4442_v1, %v4625_v4  ;;  %v277_v1 = vld [vmem:[#allocation2 + $0x308] sm:$0xff] }
 0x163   : > { %7614 = vst [vmem:[#allocation46_spill] sm:$0xff] %v4630_v36  ;;  %v7380_v36 = vmax.f32 %v4651_v2, 0.0 }
 0x164   : > { %v4635_v25 = vpop.f32.mrf.mxu0  ;;  %7618 = vst [vmem:[#allocation50_spill] sm:$0xff] %v4651_v2  ;;  %v7392_v5 = vmax.f32 %v4715_v42, 0.0 }
 0x165   : > { %7615 = vst [vmem:[#allocation47_spill] sm:$0xff] %v4635_v25  ;;  %679 = vmatmul.f32.gmra.mxu1 %v4227_v41 }
 0x166   : > { %792 = vmatmul.f32.gmra.mxu2 %v4227_v41  ;;  %905 = vmatmul.f32.gmra.mxu3 %v4227_v41  ;;  %7622 = vst [vmem:[#allocation54_spill] sm:$0xff] %v4675_v50 }
 0x167   : > { %1127 = vmatmul.f32.gmra.mxu0 %v7378_v3  ;;  %v287_v3 = vld [vmem:[#allocation2 + $0x3a8] sm:$0xff]  ;;  %7625 = vst [vmem:[#allocation55_spill] sm:$0xff] %v4683_v14 }
 0x168   : > { %1496 = vmatpush.msra.mxu0 %v287_v3  ;;  %v4707_v3 = vadd.f32 %v4432_v39, %v4628_v7  ;;  %7629 = vst [vmem:[#allocation58_spill] sm:$0xff] %v4715_v42 }
 0x169   : > { %v4655_v0 = vpop.f32.mrf.mxu2  ;;  %v4657_v25 = vpop.f32.mrf.mxu3  ;;  %7632 = vst [vmem:[#allocation60_spill] sm:$0xff] %v4735_v63 }
 0x16a   : > { %v4661_v27 = vpop.f32.mrf.mxu1  ;;  %7628 = vst [vmem:[#allocation57_spill] sm:$0xff] %v4707_v3 }
 0x16b   : > { %7619 = vst [vmem:[#allocation51_spill] sm:$0xff] %v4661_v27  ;;  %v7624_v27 = vmax.f32 %v4645_v24, 0.0 }
 0x16c   : > { %v4664_v41 = vpop.f32.mrf.mxu0 }
 0x16d   : > { %7620 = vst [vmem:[#allocation52_spill] sm:$0xff] %v4664_v41  ;;  %1171 = vmatmul.f32.vlgmr.msra.gmra.mxu1 %v7380_v36  ;;  %v319_v41 = vld [vmem:[#allocation2 + $0x5a8] sm:$0xff]  ;;  %v7626_v36 = vmax.f32 %v4277_v15, 0.0 }
 0x16e   : > { %1284 = vmatmul.f32.vlgmr.msra.gmra.mxu2 %v7623_v16  ;;  %1397 = vmatmul.f32.vlgmr.msra.gmra.mxu3 %v7624_v27  ;;  %v7389_v16 = vmax.f32 %v4675_v50, 0.0  ;;  %v7384_v27 = vmax.f32 %v4683_v14, 0.0 }
 0x16f   : > { %1130 = vmatmul.f32.gmra.mxu0 %v7626_v36  ;;  %1609 = vmatpush.msrb.mxu1 %v319_v41  ;;  %v4703_v36 = vadd.f32 %v4430_v18, %v4625_v4  ;;  %v285_v41 = vld [vmem:[#allocation2 + $0x388] sm:$0xff] }
 0x170   : > { %1497 = vmatpush.msra.mxu0 %v285_v41  ;;  %v283_v18 = vld [vmem:[#allocation2 + $0x368] sm:$0xff] }
 0x171   : > { %v4687_v20 = vpop.f32.mrf.mxu2  ;;  %v4689_v61 = vpop.f32.mrf.mxu3  ;;  %7627 = vst [vmem:[#allocation56_spill] sm:$0xff] %v4703_v36  ;;  %v279_v41 = vld [vmem:[#allocation2 + $0x328] sm:$0xff] }
 0x172   : > { %v4693_v24 = vpop.f32.mrf.mxu1  ;;  %1498 = vmatpush.msra.mxu0 %v283_v18  ;;  %v7634_v18 = vmax.f32 %v4703_v36, 0.0  ;;  %v275_v36 = vld [vmem:[#allocation2 + $0x2e8] sm:$0xff] }
 0x174   : > { %v4696_v2 = vpop.f32.mrf.mxu0 }
 0x175   : > { %1174 = vmatmul.f32.gmra.mxu1 %v7384_v27  ;;  %v7630_v27 = vmax.f32 %v4294_v33, 0.0  ;;  %v7635_v33 = vmax.f32 %v4707_v3, 0.0 }
 0x176   : > { %1287 = vmatmul.f32.gmra.mxu2 %v7387_v59  ;;  %1400 = vmatmul.f32.gmra.mxu3 %v7389_v16  ;;  %v281_v16 = vld [vmem:[#allocation2 + $0x348] sm:$0xff]  ;;  %v4739_v59 = vadd.f32 %v4444_v30, %v4628_v7 }
 0x177   : > { %1133 = vmatmul.f32.gmra.mxu0 %v7630_v27  ;;  %v4747_v27 = vadd.f32 %v4434_v34, %v4633_v49 }
 0x178   : > { %1499 = vmatpush.msra.mxu0 %v281_v16  ;;  %7633 = vst [vmem:[#allocation61_spill] sm:$0xff] %v4739_v59  ;;  %v317_v16 = vld [vmem:[#allocation2 + $0x588] sm:$0xff] }
 0x179   : > { %v4719_v14 = vpop.f32.mrf.mxu2  ;;  %v4721_v39 = vpop.f32.mrf.mxu3  ;;  %7636 = vst [vmem:[#allocation62_spill] sm:$0xff] %v4747_v27  ;;  %1610 = vmatpush.msrb.mxu1 %v317_v16  ;;  %v7396_v34 = vmax.f32 %v4747_v27, 0.0  ;;  %v4767_v16 = vadd.f32 %v4454_v44, %v4625_v4 }
 0x17a   : > { %v4725_v50 = vpop.f32.mrf.mxu1  ;;  %1500 = vmatpush.msra.mxu0 %v279_v41  ;;  %v273_v41 = vld [vmem:[#allocation2 + $0x2c8] sm:$0xff] }
 0x17b   : > { %7638 = vst [vmem:[#allocation63_spill] sm:$0xff] %v4767_v16 }
 0x17c   : > { %v4728_v15 = vpop.f32.mrf.mxu0  ;;  %1501 = vmatpush.msra.mxu0 %v277_v1  ;;  %v7640_v1 = vmax.f32 %v4739_v59, 0.0 }
 0x17d   : > { %7631 = vst [vmem:[#allocation59_spill] sm:$0xff] %v4728_v15  ;;  %1177 = vmatmul.f32.gmra.mxu1 %v7392_v5  ;;  %v7637_v5 = vmax.f32 %v4311_v51, 0.0 }
 0x17e   : > { %1290 = vmatmul.f32.gmra.mxu2 %v7634_v18  ;;  %1403 = vmatmul.f32.gmra.mxu3 %v7635_v33  ;;  %v7399_v18 = vmax.f32 %v4735_v63, 0.0  ;;  %v4771_v33 = vadd.f32 %v4456_v31, %v4628_v7  ;;  %v269_v31 = vld [vmem:[#allocation2 + $0x288] sm:$0xff]  ;;  %v7406_v63 = vmax.f32 %v4767_v16, 0.0 }
 0x17f   : > { %1136 = vmatmul.f32.gmra.mxu0 %v7637_v5  ;;  %v7401_v5 = vmax.f32 %v4328_v62, 0.0  ;;  %v4799_v62 = vadd.f32 %v4466_v11, %v4625_v4  ;;  %v265_v11 = vld [vmem:[#allocation2 + $0x248] sm:$0xff] }
 0x180   : > { %1502 = vmatpush.msra.mxu0 %v275_v36  ;;  %7639 = vst [vmem:[#allocation64_spill] sm:$0xff] %v4771_v33  ;;  %v4779_v36 = vadd.f32 %v4446_v17, %v4633_v49  ;;  %v263_v16 = vld [vmem:[#allocation2 + $0x228] sm:$0xff] }
 0x181   : > { %v4751_v42 = vpop.f32.mrf.mxu2  ;;  %v4753_v30 = vpop.f32.mrf.mxu3  ;;  %7642 = vst [vmem:[#allocation66_spill] sm:$0xff] %v4799_v62 }
 0x182   : > { %v4757_v3 = vpop.f32.mrf.mxu1  ;;  %7641 = vst [vmem:[#allocation65_spill] sm:$0xff] %v4779_v36  ;;  %1503 = vmatpush.msra.mxu0 %v273_v41  ;;  %v7403_v17 = vmax.f32 %v4779_v36, 0.0  ;;  %v267_v41 = vld [vmem:[#allocation2 + $0x268] sm:$0xff] }
 0x184   : > { %v4760_v15 = vpop.f32.mrf.mxu0 }
 0x185   : > { %1180 = vmatmul.f32.gmra.mxu1 %v7396_v34  ;;  %v271_v34 = vld [vmem:[#allocation2 + $0x2a8] sm:$0xff] }
 0x186   : > { %1293 = vmatmul.f32.gmra.mxu2 %v7399_v18  ;;  %1406 = vmatmul.f32.gmra.mxu3 %v7640_v1  ;;  %v4803_v18 = vadd.f32 %v4468_v56, %v4628_v7 }
 0x187   : > { %1139 = vmatmul.f32.gmra.mxu0 %v7401_v5  ;;  %v4811_v5 = vadd.f32 %v4458_v43, %v4633_v49 }
 0x188   : > { %1504 = vmatpush.msra.mxu0 %v271_v34  ;;  %7643 = vst [vmem:[#allocation67_spill] sm:$0xff] %v4803_v18  ;;  %v7644_v34 = vmax.f32 %v4771_v33, 0.0 }
 0x189   : > { %v4783_v44 = vpop.f32.mrf.mxu2  ;;  %v4785_v27 = vpop.f32.mrf.mxu3  ;;  %7645 = vst [vmem:[#allocation68_spill] sm:$0xff] %v4811_v5  ;;  %v7409_v43 = vmax.f32 %v4811_v5, 0.0 }
 0x18a   : > { %v4789_v59 = vpop.f32.mrf.mxu1  ;;  %1505 = vmatpush.msra.mxu0 %v269_v31  ;;  %v315_v31 = vld [vmem:[#allocation2 + $0x568] sm:$0xff] }
 0x18b   : > { %1611 = vmatpush.msrb.mxu1 %v315_v31  ;;  %v4831_v31 = vadd.f32 %v4478_v6, %v4625_v4 }
 0x18c   : > { %v4792_v1 = vpop.f32.mrf.mxu0  ;;  %1506 = vmatpush.msra.mxu0 %v267_v41  ;;  %v261_v41 = vld [vmem:[#allocation2 + $0x208] sm:$0xff] }
 0x18d   : > { %1183 = vmatmul.f32.gmra.mxu1 %v7403_v17  ;;  %v7646_v17 = vmax.f32 %v4345_v12, 0.0  ;;  %7647 = vst [vmem:[#allocation69_spill] sm:$0xff] %v4831_v31 }
 0x18e   : > { %1296 = vmatmul.f32.gmra.mxu2 %v7406_v63  ;;  %1409 = vmatmul.f32.gmra.mxu3 %v7644_v34  ;;  %v7411_v63 = vmax.f32 %v4799_v62, 0.0  ;;  %v4835_v34 = vadd.f32 %v4480_v57, %v4628_v7  ;;  %v7417_v57 = vmax.f32 %v4831_v31, 0.0 }
 0x18f   : > { %1142 = vmatmul.f32.gmra.mxu0 %v7646_v17  ;;  %v7413_v17 = vmax.f32 %v4362_v52, 0.0  ;;  %v313_v52 = vld [vmem:[#allocation2 + $0x548] sm:$0xff] }
 0x190   : > { %1507 = vmatpush.msra.mxu0 %v265_v11  ;;  %7648 = vst [vmem:[#allocation70_spill] sm:$0xff] %v4835_v34  ;;  %v7649_v11 = vmax.f32 %v4803_v18, 0.0  ;;  %v7419_v62 = vmax.f32 %v4835_v34, 0.0  ;;  %1612 = vmatpush.msrb.mxu1 %v313_v52  ;;  %v4895_v52 = vadd.f32 %v4512_v23, %v4625_v4 }
 0x191   : > { %v4815_v36 = vpop.f32.mrf.mxu2  ;;  %v4817_v56 = vpop.f32.mrf.mxu3 }
 0x192   : > { %v4821_v33 = vpop.f32.mrf.mxu1  ;;  %1508 = vmatpush.msra.mxu0 %v263_v16  ;;  %v4843_v16 = vadd.f32 %v4470_v47, %v4633_v49  ;;  %v4875_v47 = vadd.f32 %v4482_v54, %v4633_v49  ;;  %7657 = vst [vmem:[#allocation77_spill] sm:$0xff] %v4895_v52  ;;  %v4907_v54 = vadd.f32 %v4498_v37, %v4633_v49 }
 0x193   : > { %v4930_v37 = vadd.f32 %v4532_v26, %v4628_v7 }
 0x194   : > { %v4824_v51 = vpop.f32.mrf.mxu0  ;;  %7650 = vst [vmem:[#allocation71_spill] sm:$0xff] %v4843_v16  ;;  %1509 = vmatpush.msra.mxu0 %v261_v41  ;;  %v4863_v41 = vadd.f32 %v4494_v22, %v4625_v4 }
 0x195   : > { %1186 = vmatmul.f32.gmra.mxu1 %v7409_v43  ;;  %7654 = vst [vmem:[#allocation75_spill] sm:$0xff] %v4875_v47 }
 0x196   : > { %1299 = vmatmul.f32.gmra.mxu2 %v7411_v63  ;;  %1412 = vmatmul.f32.gmra.mxu3 %v7649_v11  ;;  %v7415_v11 = vmax.f32 %v4843_v16, 0.0  ;;  %7652 = vst [vmem:[#allocation73_spill] sm:$0xff] %v4863_v41 }
 0x197   : > { %1145 = vmatmul.f32.gmra.mxu0 %v7413_v17  ;;  %v4867_v17 = vadd.f32 %v4496_v10, %v4628_v7  ;;  %v7425_v10 = vmax.f32 %v4863_v41, 0.0  ;;  %7659 = vst [vmem:[#allocation79_spill] sm:$0xff] %v4907_v54 }
 0x198   : > { %7663 = vst [vmem:[#allocation82_spill] sm:$0xff] %v4930_v37 }
 0x199   : > { %v4847_v6 = vpop.f32.mrf.mxu2  ;;  %v4849_v43 = vpop.f32.mrf.mxu3  ;;  %7653 = vst [vmem:[#allocation74_spill] sm:$0xff] %v4867_v17 }
 0x19a   : > { %v4853_v63 = vpop.f32.mrf.mxu1 }
 0x19c   : > { %v4856_v18 = vpop.f32.mrf.mxu0 }
 0x19d   : > { %7651 = vst [vmem:[#allocation72_spill] sm:$0xff] %v4856_v18  ;;  %1189 = vmatmul.f32.gmra.mxu1 %v7415_v11  ;;  %v7655_v11 = vmax.f32 %v4379_v8, 0.0 }
 0x19e   : > { %1302 = vmatmul.f32.gmra.mxu2 %v7417_v57  ;;  %1415 = vmatmul.f32.gmra.mxu3 %v7419_v62  ;;  %v7426_v57 = vmax.f32 %v4867_v17, 0.0  ;;  %v7421_v62 = vmax.f32 %v4875_v47, 0.0  ;;  %v4938_v17 = vadd.f32 %v4516_v38, %v4633_v49  ;;  %v4961_v38 = vadd.f32 %v4550_v46, %v4628_v7 }
 0x19f   : > { %1148 = vmatmul.f32.gmra.mxu0 %v7655_v11  ;;  %v4899_v11 = vadd.f32 %v4514_v28, %v4628_v7  ;;  %v7431_v28 = vmax.f32 %v4895_v52, 0.0 }
 0x1a0   : > { %7664 = vst [vmem:[#allocation83_spill] sm:$0xff] %v4938_v17  ;;  %v7447_v12 = vmax.f32 %v4961_v38, 0.0 }
 0x1a1   : > { %v4879_v22 = vpop.f32.mrf.mxu2  ;;  %v4881_v16 = vpop.f32.mrf.mxu3  ;;  %7658 = vst [vmem:[#allocation78_spill] sm:$0xff] %v4899_v11  ;;  %v7433_v8 = vmax.f32 %v4899_v11, 0.0 }
 0x1a2   : > { %v4885_v31 = vpop.f32.mrf.mxu1  ;;  %7668 = vst [vmem:[#allocation86_spill] sm:$0xff] %v4961_v38 }
 0x1a4   : > { %v4888_v34 = vpop.f32.mrf.mxu0 }
 0x1a5   : > { %7656 = vst [vmem:[#allocation76_spill] sm:$0xff] %v4888_v34  ;;  %1192 = vmatmul.f32.gmra.mxu1 %v7421_v62  ;;  %v7660_v62 = vmax.f32 %v4396_v55, 0.0  ;;  %v311_v55 = vld [vmem:[#allocation2 + $0x528] sm:$0xff] }
 0x1a6   : > { %1305 = vmatmul.f32.gmra.mxu2 %v7425_v10  ;;  %1418 = vmatmul.f32.gmra.mxu3 %v7426_v57  ;;  %v7429_v10 = vmax.f32 %v4907_v54, 0.0 }
 0x1a7   : > { %1151 = vmatmul.f32.gmra.mxu0 %v7660_v62  ;;  %v4926_v62 = vadd.f32 %v4530_v40, %v4625_v4  ;;  %1613 = vmatpush.msrb.mxu1 %v311_v55  ;;  %v7669_v55 = vld [vmem:[#allocation33_spill] sm:$0xff] }
 0x1a9   : > { %v4911_v47 = vpop.f32.mrf.mxu2  ;;  %v4913_v23 = vpop.f32.mrf.mxu3  ;;  %7662 = vst [vmem:[#allocation81_spill] sm:$0xff] %v4926_v62  ;;  %v7440_v26 = vmax.f32 %v4926_v62, 0.0 }
 0x1aa   : > { %v4917_v41 = vpop.f32.mrf.mxu1 }
 0x1ac   : > { %v4920_v57 = vpop.f32.mrf.mxu0 }
 0x1ad   : > { %7661 = vst [vmem:[#allocation80_spill] sm:$0xff] %v4920_v57  ;;  %1195 = vmatmul.f32.gmra.mxu1 %v7429_v10  ;;  %v7665_v10 = vmax.f32 %v4263_v9, 0.0  ;;  %v4957_v9 = vadd.f32 %v4548_v53, %v4625_v4 }
 0x1ae   : > { %1308 = vmatmul.f32.gmra.mxu2 %v7431_v28  ;;  %1421 = vmatmul.f32.gmra.mxu3 %v7433_v8  ;;  %v7441_v28 = vmax.f32 %v4930_v37, 0.0  ;;  %v7436_v8 = vmax.f32 %v4938_v17, 0.0  ;;  %v7671_v17 = vld [vmem:[#allocation7_spill] sm:$0xff]  ;;  %v7676_v37 = vld [vmem:[#allocation36_spill] sm:$0xff] }
 0x1af   : > { %1510 = vmatmul.f32.vlgmr.msra.gmra.mxu0 %v7665_v10  ;;  %7667 = vst [vmem:[#allocation85_spill] sm:$0xff] %v4957_v9  ;;  %v4969_v10 = vadd.f32 %v7669_v55, %v4633_v49  ;;  %v7445_v46 = vmax.f32 %v4957_v9, 0.0  ;;  %v309_v55 = vld [vmem:[#allocation2 + $0x508] sm:$0xff] }
 0x1b0   : > { %1614 = vmatpush.msrb.mxu1 %v309_v55  ;;  %v7683_v55 = vld [vmem:[#allocation39_spill] sm:$0xff] }
 0x1b1   : > { %v4942_v40 = vpop.f32.mrf.mxu2  ;;  %v4944_v54 = vpop.f32.mrf.mxu3  ;;  %7670 = vst [vmem:[#allocation33_spill] sm:$0xff] %v4969_v10 }
 0x1b2   : > { %v4948_v52 = vpop.f32.mrf.mxu1 }
 0x1b4   : > { %v4951_v11 = vpop.f32.mrf.mxu0 }
 0x1b5   : > { %7666 = vst [vmem:[#allocation84_spill] sm:$0xff] %v4951_v11  ;;  %1198 = vmatmul.f32.gmra.mxu1 %v7436_v8  ;;  %v7672_v8 = vmax.f32 %v7671_v17, 0.0  ;;  %v4992_v17 = vadd.f32 %v4568_v32, %v4628_v7 }
 0x1b6   : > { %1311 = vmatmul.f32.gmra.mxu2 %v7440_v26  ;;  %1424 = vmatmul.f32.gmra.mxu3 %v7441_v28  ;;  %v7443_v26 = vmax.f32 %v4969_v10, 0.0 }
 0x1b7   : > { %1513 = vmatmul.f32.gmra.mxu0 %v7672_v8  ;;  %v4988_v8 = vadd.f32 %v4566_v35, %v4625_v4  ;;  %7675 = vst [vmem:[#allocation88_spill] sm:$0xff] %v4992_v17 }
 0x1b9   : > { %v4973_v5 = vpop.f32.mrf.mxu2  ;;  %v4975_v53 = vpop.f32.mrf.mxu3  ;;  %7674 = vst [vmem:[#allocation87_spill] sm:$0xff] %v4988_v8  ;;  %v7451_v32 = vmax.f32 %v4988_v8, 0.0 }
 0x1ba   : > { %v4979_v62 = vpop.f32.mrf.mxu1 }
 0x1bc   : > { %v4982_v28 = vpop.f32.mrf.mxu0 }
 0x1bd   : > { %7673 = vst [vmem:[#allocation7_spill] sm:$0xff] %v4982_v28  ;;  %1201 = vmatmul.f32.gmra.mxu1 %v7443_v26  ;;  %v5000_v28 = vadd.f32 %v7676_v37, %v4633_v49  ;;  %v7678_v26 = vld [vmem:[#allocation10_spill] sm:$0xff]  ;;  %v5019_v37 = vadd.f32 %v4584_v21, %v4625_v4 }
 0x1be   : > { %1314 = vmatmul.f32.gmra.mxu2 %v7445_v46  ;;  %1427 = vmatmul.f32.gmra.mxu3 %v7447_v12  ;;  %v7679_v10 = vmax.f32 %v7678_v26, 0.0  ;;  %v7453_v46 = vmax.f32 %v4992_v17, 0.0  ;;  %v5023_v26 = vadd.f32 %v4586_v13, %v4628_v7  ;;  %v387_v21 = vld [vmem:[#allocation2 + $0x9e8] sm:$0xff] }
 0x1bf   : > { %7677 = vst [vmem:[#allocation36_spill] sm:$0xff] %v5000_v28  ;;  %v7449_v12 = vmax.f32 %v5000_v28, 0.0  ;;  %1833 = vmatpush.msrb.mxu3 %v387_v21  ;;  %v5062_v21 = vadd.f32 %v4588_v58, %v4633_v49  ;;  %v5081_v58 = vadd.f32 %v4620_v60, %v4625_v4  ;;  %v385_v60 = vld [vmem:[#allocation2 + $0x9c8] sm:$0xff] }
 0x1c0   : > { %1516 = vmatmul.f32.gmra.mxu0 %v7679_v10  ;;  %7681 = vst [vmem:[#allocation89_spill] sm:$0xff] %v5019_v37  ;;  %v355_v10 = vld [vmem:[#allocation2 + $0x7e8] sm:$0xff]  ;;  %v7459_v17 = vmax.f32 %v5023_v26, 0.0 }
 0x1c1   : > { %v5004_v35 = vpop.f32.mrf.mxu2  ;;  %v5006_v11 = vpop.f32.mrf.mxu3  ;;  %7682 = vst [vmem:[#allocation90_spill] sm:$0xff] %v5023_v26  ;;  %1720 = vmatpush.msrb.mxu2 %v355_v10  ;;  %v307_v10 = vld [vmem:[#allocation2 + $0x4e8] sm:$0xff]  ;;  %1834 = vmatpush.msrb.mxu3 %v385_v60 }
 0x1c2   : > { %v5010_v9 = vpop.f32.mrf.mxu1  ;;  %7690 = vst [vmem:[#allocation93_spill] sm:$0xff] %v5062_v21  ;;  %1615 = vmatpush.msrb.mxu1 %v307_v10  ;;  %v5093_v10 = vadd.f32 %v4606_v19, %v4633_v49  ;;  %v7703_v60 = vld [vmem:[#allocation46_spill] sm:$0xff] }
 0x1c3   : > { %7694 = vst [vmem:[#allocation94_spill] sm:$0xff] %v5081_v58 }
 0x1c4   : > { %v5013_v38 = vpop.f32.mrf.mxu0  ;;  %7696 = vst [vmem:[#allocation96_spill] sm:$0xff] %v5093_v10 }
 0x1c5   : > { %7680 = vst [vmem:[#allocation10_spill] sm:$0xff] %v5013_v38  ;;  %1204 = vmatmul.f32.gmra.mxu1 %v7449_v12  ;;  %v5031_v38 = vadd.f32 %v7683_v55, %v4633_v49  ;;  %v7685_v12 = vld [vmem:[#allocation13_spill] sm:$0xff] }
 0x1c6   : > { %1317 = vmatmul.f32.gmra.mxu2 %v7451_v32  ;;  %1430 = vmatmul.f32.gmra.mxu3 %v7453_v46  ;;  %v7686_v28 = vmax.f32 %v7685_v12, 0.0  ;;  %v7457_v32 = vmax.f32 %v5019_v37, 0.0  ;;  %v5050_v12 = vadd.f32 %v4602_v48, %v4625_v4 }
 0x1c7   : > { %7684 = vst [vmem:[#allocation39_spill] sm:$0xff] %v5031_v38  ;;  %v7455_v8 = vmax.f32 %v5031_v38, 0.0 }
 0x1c8   : > { %1519 = vmatmul.f32.gmra.mxu0 %v7686_v28  ;;  %7688 = vst [vmem:[#allocation91_spill] sm:$0xff] %v5050_v12  ;;  %v5054_v28 = vadd.f32 %v4604_v29, %v4628_v7  ;;  %v7463_v29 = vmax.f32 %v5050_v12, 0.0  ;;  %v7467_v12 = vmax.f32 %v5093_v10, 0.0 }
 0x1c9   : > { %v5035_v57 = vpop.f32.mrf.mxu2  ;;  %v5037_v13 = vpop.f32.mrf.mxu3 }
 0x1ca   : > { %v5041_v46 = vpop.f32.mrf.mxu1  ;;  %7689 = vst [vmem:[#allocation92_spill] sm:$0xff] %v5054_v28 }
 0x1cc   : > { %v5044_v55 = vpop.f32.mrf.mxu0 }
 0x1cd   : > { %7687 = vst [vmem:[#allocation13_spill] sm:$0xff] %v5044_v55  ;;  %1207 = vmatmul.f32.gmra.mxu1 %v7455_v8  ;;  %v7691_v8 = vld [vmem:[#allocation16_spill] sm:$0xff] }
 0x1ce   : > { %1320 = vmatmul.f32.gmra.mxu2 %v7457_v32  ;;  %1433 = vmatmul.f32.gmra.mxu3 %v7459_v17  ;;  %v7692_v38 = vmax.f32 %v7691_v8, 0.0  ;;  %v7465_v32 = vmax.f32 %v5054_v28, 0.0  ;;  %v7461_v17 = vmax.f32 %v5062_v21, 0.0  ;;  %v353_v8 = vld [vmem:[#allocation2 + $0x7c8] sm:$0xff] }
 0x1cf   : > { %1721 = vmatpush.msrb.mxu2 %v353_v8  ;;  %v305_v8 = vld [vmem:[#allocation2 + $0x4c8] sm:$0xff] }
 0x1d0   : > { %1522 = vmatmul.f32.gmra.mxu0 %v7692_v38  ;;  %v5085_v38 = vadd.f32 %v4622_v45, %v4628_v7  ;;  %1616 = vmatpush.msrb.mxu1 %v305_v8  ;;  %v351_v8 = vld [vmem:[#allocation2 + $0x7a8] sm:$0xff] }
 0x1d1   : > { %v5066_v48 = vpop.f32.mrf.mxu2  ;;  %v5068_v55 = vpop.f32.mrf.mxu3  ;;  %1722 = vmatpush.msrb.mxu2 %v351_v8  ;;  %v5176_v8 = vadd.f32 %v4719_v14, %v4625_v4 }
 0x1d2   : > { %v5072_v37 = vpop.f32.mrf.mxu1  ;;  %7695 = vst [vmem:[#allocation95_spill] sm:$0xff] %v5085_v38  ;;  %v7471_v28 = vmax.f32 %v5085_v38, 0.0 }
 0x1d3   : > { %7721 = vst [vmem:[#allocation106_spill] sm:$0xff] %v5176_v8 }
 0x1d4   : > { %v5075_v26 = vpop.f32.mrf.mxu0 }
 0x1d5   : > { %7693 = vst [vmem:[#allocation16_spill] sm:$0xff] %v5075_v26  ;;  %1210 = vmatmul.f32.gmra.mxu1 %v7461_v17  ;;  %v7697_v17 = vld [vmem:[#allocation19_spill] sm:$0xff] }
 0x1d6   : > { %1323 = vmatmul.f32.gmra.mxu2 %v7463_v29  ;;  %1436 = vmatmul.f32.gmra.mxu3 %v7465_v32  ;;  %v7698_v21 = vmax.f32 %v7697_v17, 0.0  ;;  %v7469_v29 = vmax.f32 %v5081_v58, 0.0  ;;  %v5112_v17 = vadd.f32 %v4655_v0, %v4625_v4 }
 0x1d8   : > { %1525 = vmatmul.f32.gmra.mxu0 %v7698_v21  ;;  %7701 = vst [vmem:[#allocation98_spill] sm:$0xff] %v5112_v17  ;;  %v5116_v21 = vadd.f32 %v4657_v25, %v4628_v7  ;;  %v7475_v25 = vmax.f32 %v5112_v17, 0.0 }
 0x1d9   : > { %v5097_v26 = vpop.f32.mrf.mxu2  ;;  %v5099_v45 = vpop.f32.mrf.mxu3 }
 0x1da   : > { %v5103_v32 = vpop.f32.mrf.mxu1  ;;  %7702 = vst [vmem:[#allocation99_spill] sm:$0xff] %v5116_v21 }
 0x1db   : > { %7699 = vst [vmem:[#allocation19_spill] sm:$0xff] %v5103_v32  ;;  %v7719_v32 = vld [vmem:[#allocation29_spill] sm:$0xff] }
 0x1dc   : > { %v5106_v19 = vpop.f32.mrf.mxu0 }
 0x1dd   : > { %7700 = vst [vmem:[#allocation97_spill] sm:$0xff] %v5106_v19  ;;  %1213 = vmatmul.f32.gmra.mxu1 %v7467_v12  ;;  %v5124_v19 = vadd.f32 %v7703_v60, %v4633_v49  ;;  %v7705_v12 = vld [vmem:[#allocation22_spill] sm:$0xff] }
 0x1de   : > { %1326 = vmatmul.f32.gmra.mxu2 %v7469_v29  ;;  %1439 = vmatmul.f32.gmra.mxu3 %v7471_v28  ;;  %v7706_v10 = vmax.f32 %v7705_v12, 0.0  ;;  %v7476_v29 = vmax.f32 %v5116_v21, 0.0  ;;  %v5143_v12 = vadd.f32 %v4687_v20, %v4625_v4  ;;  %v445_v60 = vld [vmem:[#allocation2 + $0xa01] ss:$8 sm:$0x3] }
 0x1df   : > { %7704 = vst [vmem:[#allocation46_spill] sm:$0xff] %v5124_v19  ;;  %v7474_v28 = vmax.f32 %v5124_v19, 0.0  ;;  %v383_v20 = vld [vmem:[#allocation2 + $0x9a8] sm:$0xff] }
 0x1e0   : > { %1528 = vmatmul.f32.gmra.mxu0 %v7706_v10  ;;  %7711 = vst [vmem:[#allocation103_spill] sm:$0xff] %v5143_v12  ;;  %v5147_v10 = vadd.f32 %v4689_v61, %v4628_v7  ;;  %1835 = vmatpush.msrb.mxu3 %v383_v20  ;;  %v5188_v20 = vadd.f32 %v4693_v24, %v4633_v49 }
 0x1e1   : > { %v5128_v0 = vpop.f32.mrf.mxu2  ;;  %v5130_v34 = vpop.f32.mrf.mxu3 }
 0x1e2   : > { %7707 = vst [vmem:[#allocation22_spill] sm:$0xff] %v5128_v0  ;;  %v5134_v58 = vpop.f32.mrf.mxu1  ;;  %v7483_v21 = vmax.f32 %v5147_v10, 0.0 }
 0x1e3   : > { %7708 = vst [vmem:[#allocation100_spill] sm:$0xff] %v5130_v34 }
 0x1e4   : > { %7709 = vst [vmem:[#allocation101_spill] sm:$0xff] %v5134_v58  ;;  %v5137_v38 = vpop.f32.mrf.mxu0 }
 0x1e5   : > { %7710 = vst [vmem:[#allocation102_spill] sm:$0xff] %v5137_v38  ;;  %1216 = vmatmul.f32.gmra.mxu1 %v7474_v28  ;;  %v7713_v38 = vld [vmem:[#allocation51_spill] sm:$0xff]  ;;  %v7715_v28 = vld [vmem:[#allocation25_spill] sm:$0xff] }
 0x1e6   : > { %7712 = vst [vmem:[#allocation104_spill] sm:$0xff] %v5147_v10  ;;  %1329 = vmatmul.f32.gmra.mxu2 %v7475_v25  ;;  %1442 = vmatmul.f32.gmra.mxu3 %v7476_v29  ;;  %v5155_v19 = vadd.f32 %v7713_v38, %v4633_v49  ;;  %v7716_v58 = vmax.f32 %v7715_v28, 0.0  ;;  %v5163_v25 = vperm.slane %v445_v60, 0  ;;  %v7482_v29 = vmax.f32 %v5143_v12, 0.0  ;;  %v7725_v10 = vld [vmem:[#allocation31_spill] sm:$0xff] }
 0x1e7   : > { %v5180_v60 = vadd.f32 %v4721_v39, %v4628_v7  ;;  %v7485_v39 = vmax.f32 %v5176_v8, 0.0 }
 0x1e8   : > { %7714 = vst [vmem:[#allocation51_spill] sm:$0xff] %v5155_v19  ;;  %1531 = vmatmul.f32.gmra.mxu0 %v7716_v58  ;;  %v7479_v38 = vmax.f32 %v5155_v19, 0.0  ;;  %v1060_v28 = vadd.f32 %v7719_v32, %v5163_v25  ;;  %v303_v32 = vld [vmem:[#allocation2 + $0x4a8] sm:$0xff]  ;;  %v1063_v34 = vadd.f32 %v7725_v10, %v5163_v25  ;;  %v7728_v10 = vld [vmem:[#allocation8_spill] sm:$0xff] }
 0x1e9   : > { %v5159_v61 = vpop.f32.mrf.mxu2  ;;  %v5161_v18 = vpop.f32.mrf.mxu3  ;;  %7722 = vst [vmem:[#allocation107_spill] sm:$0xff] %v5180_v60  ;;  %1617 = vmatpush.msrb.mxu1 %v303_v32  ;;  %v7486_v12 = vmax.f32 %v5180_v60, 0.0 }
 0x1ea   : > { %7717 = vst [vmem:[#allocation25_spill] sm:$0xff] %v5159_v61  ;;  %v1172_v17 = vpop.f32.mrf.mxu1 }
 0x1eb   : > { %7718 = vst [vmem:[#allocation105_spill] sm:$0xff] %v5161_v18  ;;  %v1173_v14 = vadd.f32 %v1172_v17, %v1060_v28  ;;  %v5209_v17 = vadd.f32 %v4753_v30, %v4628_v7 }
 0x1ec   : > { %v5170_v58 = vpop.f32.mrf.mxu0 }
 0x1ed   : > { %7720 = vst [vmem:[#allocation29_spill] sm:$0xff] %v5170_v58  ;;  %1219 = vmatmul.f32.gmra.mxu1 %v7479_v38  ;;  %v7723_v38 = vld [vmem:[#allocation5_spill] sm:$0xff] }
 0x1ee   : > { %1332 = vmatmul.f32.gmra.mxu2 %v7482_v29  ;;  %1445 = vmatmul.f32.gmra.mxu3 %v7483_v21  ;;  %v7724_v19 = vmax.f32 %v7723_v38, 0.0  ;;  %v7487_v21 = vmax.f32 %v5188_v20, 0.0  ;;  %7727 = vst [vmem:[#allocation31_spill] sm:$0xff] %v5209_v17  ;;  %v7729_v38 = vmax.f32 %v7728_v10, 0.0 }
 0x1f0   : > { %1534 = vmatmul.f32.gmra.mxu0 %v7724_v19  ;;  %v5205_v19 = vadd.f32 %v4751_v42, %v4625_v4  ;;  %v381_v42 = vld [vmem:[#allocation2 + $0x988] sm:$0xff] }
 0x1f1   : > { %v1285_v58 = vpop.f32.mrf.mxu2  ;;  %v1398_v18 = vpop.f32.mrf.mxu3  ;;  %1836 = vmatpush.msrb.mxu3 %v381_v42 }
 0x1f2   : > { %v1286_v29 = vadd.f32 %v1285_v58, %v1173_v14  ;;  %v1175_v61 = vpop.f32.mrf.mxu1  ;;  %7726 = vst [vmem:[#allocation5_spill] sm:$0xff] %v5205_v19  ;;  %v7490_v32 = vmax.f32 %v5205_v19, 0.0  ;;  %v7491_v14 = vmax.f32 %v5209_v17, 0.0 }
 0x1f3   : > { %v1176_v28 = vadd.f32 %v1175_v61, %v1063_v34  ;;  %v5234_v34 = vadd.f32 %v4783_v44, %v4625_v4  ;;  %v5238_v61 = vadd.f32 %v4785_v27, %v4628_v7 }
 0x1f4   : > { %v5197_v24 = vadd.f32 %v1398_v18, %v1286_v29  ;;  %v5199_v0 = vpop.f32.mrf.mxu0  ;;  %v349_v18 = vld [vmem:[#allocation2 + $0x788] sm:$0xff]  ;;  %v5217_v29 = vadd.f32 %v4725_v50, %v4633_v49 }
 0x1f5   : > { %1222 = vmatmul.f32.gmra.mxu1 %v7487_v21  ;;  %1723 = vmatpush.msrb.mxu2 %v349_v18  ;;  %v7730_v50 = vld [vmem:[#allocation34_spill] sm:$0xff]  ;;  %7731 = vst [vmem:[#allocation8_spill] sm:$0xff] %v5234_v34  ;;  %v5246_v18 = vadd.f32 %v4757_v3, %v4633_v49  ;;  %v7495_v27 = vmax.f32 %v5234_v34, 0.0 }
 0x1f6   : > { %1335 = vmatmul.f32.gmra.mxu2 %v7485_v39  ;;  %1448 = vmatmul.f32.gmra.mxu3 %v7486_v12  ;;  %v7492_v21 = vmax.f32 %v5217_v29, 0.0  ;;  %v1066_v60 = vadd.f32 %v7730_v50, %v5163_v25  ;;  %7732 = vst [vmem:[#allocation34_spill] sm:$0xff] %v5238_v61 }
 0x1f8   : > { %1537 = vmatmul.f32.gmra.mxu0 %v7729_v38  ;;  %v7733_v38 = vld [vmem:[#allocation11_spill] sm:$0xff] }
 0x1f9   : > { %v1288_v30 = vpop.f32.mrf.mxu2  ;;  %v1401_v58 = vpop.f32.mrf.mxu3  ;;  %v7734_v42 = vmax.f32 %v7733_v38, 0.0  ;;  %v7738_v38 = vld [vmem:[#allocation14_spill] sm:$0xff] }
 0x1fa   : > { %v1289_v39 = vadd.f32 %v1288_v30, %v1176_v28  ;;  %v1178_v12 = vpop.f32.mrf.mxu1 }
 0x1fb   : > { %v1179_v44 = vadd.f32 %v1178_v12, %v1066_v60  ;;  %v5263_v12 = vadd.f32 %v4815_v36, %v4625_v4  ;;  %v5267_v60 = vadd.f32 %v4817_v56, %v4628_v7  ;;  %v379_v36 = vld [vmem:[#allocation2 + $0x968] sm:$0xff] }
 0x1fc   : > { %v5226_v8 = vadd.f32 %v1401_v58, %v1289_v39  ;;  %v5228_v10 = vpop.f32.mrf.mxu0  ;;  %v301_v39 = vld [vmem:[#allocation2 + $0x488] sm:$0xff]  ;;  %v7496_v58 = vmax.f32 %v5238_v61, 0.0  ;;  %1837 = vmatpush.msrb.mxu3 %v379_v36 }
 0x1fd   : > { %1225 = vmatmul.f32.gmra.mxu1 %v7492_v21  ;;  %v7735_v21 = vld [vmem:[#allocation37_spill] sm:$0xff]  ;;  %7736 = vst [vmem:[#allocation11_spill] sm:$0xff] %v5263_v12 }
 0x1fe   : > { %1338 = vmatmul.f32.gmra.mxu2 %v7490_v32  ;;  %1451 = vmatmul.f32.gmra.mxu3 %v7491_v14  ;;  %v7497_v14 = vmax.f32 %v5246_v18, 0.0  ;;  %v1069_v17 = vadd.f32 %v7735_v21, %v5163_v25  ;;  %7737 = vst [vmem:[#allocation37_spill] sm:$0xff] %v5267_v60  ;;  %v347_v21 = vld [vmem:[#allocation2 + $0x768] sm:$0xff] }
 0x1ff   : > { %1618 = vmatpush.msrb.mxu1 %v301_v39  ;;  %v5275_v39 = vadd.f32 %v4789_v59, %v4633_v49  ;;  %1724 = vmatpush.msrb.mxu2 %v347_v21  ;;  %v7740_v59 = vld [vmem:[#allocation40_spill] sm:$0xff]  ;;  %v5304_v21 = vadd.f32 %v4821_v33, %v4633_v49 }
 0x200   : > { %1540 = vmatmul.f32.gmra.mxu0 %v7734_v42  ;;  %v7739_v42 = vmax.f32 %v7738_v38, 0.0  ;;  %v1072_v61 = vadd.f32 %v7740_v59, %v5163_v25 }
 0x201   : > { %v1291_v28 = vpop.f32.mrf.mxu2  ;;  %v1404_v30 = vpop.f32.mrf.mxu3 }
 0x202   : > { %v1292_v50 = vadd.f32 %v1291_v28, %v1179_v44  ;;  %v1181_v32 = vpop.f32.mrf.mxu1 }
 0x203   : > { %v1182_v44 = vadd.f32 %v1181_v32, %v1069_v17  ;;  %v5292_v17 = vadd.f32 %v4847_v6, %v4625_v4  ;;  %v5296_v32 = vadd.f32 %v4849_v43, %v4628_v7 }
 0x204   : > { %v5255_v3 = vadd.f32 %v1404_v30, %v1292_v50  ;;  %v5257_v19 = vpop.f32.mrf.mxu0  ;;  %v7500_v30 = vmax.f32 %v5263_v12, 0.0  ;;  %v7501_v50 = vmax.f32 %v5267_v60, 0.0 }
 0x205   : > { %1228 = vmatmul.f32.gmra.mxu1 %v7497_v14  ;;  %v7502_v14 = vmax.f32 %v5275_v39, 0.0  ;;  %7741 = vst [vmem:[#allocation14_spill] sm:$0xff] %v5292_v17  ;;  %v7505_v43 = vmax.f32 %v5292_v17, 0.0 }
 0x206   : > { %1341 = vmatmul.f32.gmra.mxu2 %v7495_v27  ;;  %1454 = vmatmul.f32.gmra.mxu3 %v7496_v58  ;;  %7742 = vst [vmem:[#allocation40_spill] sm:$0xff] %v5296_v32 }
 0x208   : > { %1543 = vmatmul.f32.gmra.mxu0 %v7739_v42  ;;  %v7743_v42 = vld [vmem:[#allocation17_spill] sm:$0xff] }
 0x209   : > { %v1294_v56 = vpop.f32.mrf.mxu2  ;;  %v1407_v28 = vpop.f32.mrf.mxu3  ;;  %v7744_v36 = vmax.f32 %v7743_v42, 0.0  ;;  %v7748_v42 = vld [vmem:[#allocation20_spill] sm:$0xff] }
 0x20a   : > { %v1295_v27 = vadd.f32 %v1294_v56, %v1182_v44  ;;  %v1184_v58 = vpop.f32.mrf.mxu1 }
 0x20b   : > { %v1185_v6 = vadd.f32 %v1184_v58, %v1072_v61  ;;  %v5321_v61 = vadd.f32 %v4879_v22, %v4625_v4  ;;  %v5325_v58 = vadd.f32 %v4881_v16, %v4628_v7  ;;  %v377_v22 = vld [vmem:[#allocation2 + $0x948] sm:$0xff] }
 0x20c   : > { %v5284_v34 = vadd.f32 %v1407_v28, %v1295_v27  ;;  %v5286_v38 = vpop.f32.mrf.mxu0  ;;  %v299_v27 = vld [vmem:[#allocation2 + $0x468] sm:$0xff]  ;;  %v7506_v28 = vmax.f32 %v5296_v32, 0.0  ;;  %1838 = vmatpush.msrb.mxu3 %v377_v22 }
 0x20d   : > { %1231 = vmatmul.f32.gmra.mxu1 %v7502_v14  ;;  %v7745_v14 = vld [vmem:[#allocation42_spill] sm:$0xff]  ;;  %7746 = vst [vmem:[#allocation17_spill] sm:$0xff] %v5321_v61 }
 0x20e   : > { %1344 = vmatmul.f32.gmra.mxu2 %v7500_v30  ;;  %1457 = vmatmul.f32.gmra.mxu3 %v7501_v50  ;;  %v7507_v50 = vmax.f32 %v5304_v21, 0.0  ;;  %v1075_v60 = vadd.f32 %v7745_v14, %v5163_v25  ;;  %7747 = vst [vmem:[#allocation42_spill] sm:$0xff] %v5325_v58  ;;  %v345_v14 = vld [vmem:[#allocation2 + $0x748] sm:$0xff] }
 0x20f   : > { %1619 = vmatpush.msrb.mxu1 %v299_v27  ;;  %v5333_v27 = vadd.f32 %v4853_v63, %v4633_v49  ;;  %1725 = vmatpush.msrb.mxu2 %v345_v14  ;;  %v7750_v63 = vld [vmem:[#allocation44_spill] sm:$0xff]  ;;  %v5362_v14 = vadd.f32 %v4885_v31, %v4633_v49 }
 0x210   : > { %1546 = vmatmul.f32.gmra.mxu0 %v7744_v36  ;;  %v7749_v36 = vmax.f32 %v7748_v42, 0.0  ;;  %v1078_v32 = vadd.f32 %v7750_v63, %v5163_v25 }
 0x211   : > { %v1297_v44 = vpop.f32.mrf.mxu2  ;;  %v1410_v56 = vpop.f32.mrf.mxu3 }
 0x212   : > { %v1298_v59 = vadd.f32 %v1297_v44, %v1185_v6  ;;  %v1187_v30 = vpop.f32.mrf.mxu1 }
 0x213   : > { %v1188_v6 = vadd.f32 %v1187_v30, %v1075_v60  ;;  %v5350_v60 = vadd.f32 %v4911_v47, %v4625_v4  ;;  %v5354_v30 = vadd.f32 %v4913_v23, %v4628_v7 }
 0x214   : > { %v5313_v33 = vadd.f32 %v1410_v56, %v1298_v59  ;;  %v5315_v12 = vpop.f32.mrf.mxu0  ;;  %v7510_v56 = vmax.f32 %v5321_v61, 0.0  ;;  %v7511_v59 = vmax.f32 %v5325_v58, 0.0 }
 0x215   : > { %1234 = vmatmul.f32.gmra.mxu1 %v7507_v50  ;;  %v7512_v50 = vmax.f32 %v5333_v27, 0.0  ;;  %7751 = vst [vmem:[#allocation20_spill] sm:$0xff] %v5354_v30  ;;  %v7515_v23 = vmax.f32 %v5350_v60, 0.0 }
 0x216   : > { %1347 = vmatmul.f32.gmra.mxu2 %v7505_v43  ;;  %1460 = vmatmul.f32.gmra.mxu3 %v7506_v28 }
 0x218   : > { %1549 = vmatmul.f32.gmra.mxu0 %v7749_v36  ;;  %v7752_v36 = vld [vmem:[#allocation23_spill] sm:$0xff] }
 0x219   : > { %v1300_v16 = vpop.f32.mrf.mxu2  ;;  %v1413_v44 = vpop.f32.mrf.mxu3  ;;  %v7753_v22 = vmax.f32 %v7752_v36, 0.0  ;;  %v7756_v36 = vld [vmem:[#allocation26_spill] sm:$0xff] }
 0x21a   : > { %v1301_v43 = vadd.f32 %v1300_v16, %v1188_v6  ;;  %v1190_v28 = vpop.f32.mrf.mxu1 }
 0x21b   : > { %v1191_v47 = vadd.f32 %v1190_v28, %v1078_v32  ;;  %v5379_v32 = vadd.f32 %v4942_v40, %v4625_v4  ;;  %v5383_v28 = vadd.f32 %v4944_v54, %v4628_v7  ;;  %v375_v40 = vld [vmem:[#allocation2 + $0x928] sm:$0xff] }
 0x21c   : > { %v5342_v17 = vadd.f32 %v1413_v44, %v1301_v43  ;;  %v5344_v42 = vpop.f32.mrf.mxu0  ;;  %v297_v43 = vld [vmem:[#allocation2 + $0x448] sm:$0xff]  ;;  %v7516_v44 = vmax.f32 %v5354_v30, 0.0  ;;  %1839 = vmatpush.msrb.mxu3 %v375_v40  ;;  %v7760_v40 = vld [vmem:[#allocation28_spill] sm:$0xff] }
 0x21d   : > { %1237 = vmatmul.f32.gmra.mxu1 %v7512_v50  ;;  %v7754_v50 = vld [vmem:[#allocation47_spill] sm:$0xff]  ;;  %7755 = vst [vmem:[#allocation44_spill] sm:$0xff] %v5383_v28 }
 0x21e   : > { %1350 = vmatmul.f32.gmra.mxu2 %v7510_v56  ;;  %1463 = vmatmul.f32.gmra.mxu3 %v7511_v59  ;;  %v7517_v59 = vmax.f32 %v5362_v14, 0.0  ;;  %v1081_v58 = vadd.f32 %v7754_v50, %v5163_v25  ;;  %v343_v50 = vld [vmem:[#allocation2 + $0x728] sm:$0xff] }
 0x21f   : > { %1620 = vmatpush.msrb.mxu1 %v297_v43  ;;  %v5391_v43 = vadd.f32 %v4917_v41, %v4633_v49  ;;  %1726 = vmatpush.msrb.mxu2 %v343_v50  ;;  %v5408_v50 = vadd.f32 %v4973_v5, %v4625_v4 }
 0x220   : > { %1552 = vmatmul.f32.gmra.mxu0 %v7753_v22  ;;  %v7757_v22 = vmax.f32 %v7756_v36, 0.0  ;;  %v5412_v36 = vadd.f32 %v4975_v53, %v4628_v7 }
 0x221   : > { %v1303_v6 = vpop.f32.mrf.mxu2  ;;  %v1416_v16 = vpop.f32.mrf.mxu3  ;;  %v7523_v53 = vmax.f32 %v5408_v50, 0.0 }
 0x222   : > { %v1304_v63 = vadd.f32 %v1303_v6, %v1191_v47  ;;  %v1193_v56 = vpop.f32.mrf.mxu1 }
 0x223   : > { %v1194_v47 = vadd.f32 %v1193_v56, %v1081_v58  ;;  %v7759_v58 = vld [vmem:[#allocation52_spill] sm:$0xff] }
 0x224   : > { %v5371_v31 = vadd.f32 %v1416_v16, %v1304_v63  ;;  %v5373_v61 = vpop.f32.mrf.mxu0  ;;  %v7519_v16 = vmax.f32 %v5379_v32, 0.0  ;;  %v7521_v63 = vmax.f32 %v5383_v28, 0.0  ;;  %v1084_v56 = vadd.f32 %v7759_v58, %v5163_v25 }
 0x225   : > { %1240 = vmatmul.f32.gmra.mxu1 %v7517_v59  ;;  %v7520_v59 = vmax.f32 %v5391_v43, 0.0  ;;  %v7524_v58 = vmax.f32 %v5412_v36, 0.0 }
 0x226   : > { %1353 = vmatmul.f32.gmra.mxu2 %v7515_v23  ;;  %1466 = vmatmul.f32.gmra.mxu3 %v7516_v44 }
 0x228   : > { %1555 = vmatmul.f32.gmra.mxu0 %v7757_v22  ;;  %v5420_v22 = vadd.f32 %v4948_v52, %v4633_v49  ;;  %v1087_v52 = vadd.f32 %v4696_v2, %v5163_v25  ;;  %v7766_v2 = vld [vmem:[#allocation30_spill] sm:$0xff] }
 0x229   : > { %v1306_v54 = vpop.f32.mrf.mxu2  ;;  %v1419_v6 = vpop.f32.mrf.mxu3 }
 0x22a   : > { %v1307_v23 = vadd.f32 %v1306_v54, %v1194_v47  ;;  %v1196_v44 = vpop.f32.mrf.mxu1  ;;  %v7761_v47 = vmax.f32 %v7760_v40, 0.0  ;;  %v7767_v40 = vmax.f32 %v7766_v2, 0.0  ;;  %v5470_v2 = vadd.f32 %v5037_v13, %v4628_v7  ;;  %v337_v13 = vld [vmem:[#allocation2 + $0x6c8] sm:$0xff] }
 0x22b   : > { %v1197_v5 = vadd.f32 %v1196_v44, %v1084_v56  ;;  %v5437_v44 = vadd.f32 %v5004_v35, %v4625_v4  ;;  %v5441_v56 = vadd.f32 %v5006_v11, %v4628_v7  ;;  %v373_v35 = vld [vmem:[#allocation2 + $0x908] sm:$0xff] }
 0x22c   : > { %v5398_v30 = vadd.f32 %v1419_v6, %v1307_v23  ;;  %v5400_v41 = vpop.f32.mrf.mxu0  ;;  %v295_v23 = vld [vmem:[#allocation2 + $0x428] sm:$0xff]  ;;  %1840 = vmatpush.msrb.mxu3 %v373_v35 }
 0x22d   : > { %7758 = vst [vmem:[#allocation23_spill] sm:$0xff] %v5400_v41  ;;  %1243 = vmatmul.f32.gmra.mxu1 %v7520_v59  ;;  %v371_v35 = vld [vmem:[#allocation2 + $0x8e8] sm:$0xff] }
 0x22e   : > { %1356 = vmatmul.f32.gmra.mxu2 %v7519_v16  ;;  %1469 = vmatmul.f32.gmra.mxu3 %v7521_v63  ;;  %v7525_v63 = vmax.f32 %v5420_v22, 0.0  ;;  %7763 = vst [vmem:[#allocation26_spill] sm:$0xff] %v5437_v44 }
 0x22f   : > { %1621 = vmatpush.msrb.mxu1 %v295_v23  ;;  %7764 = vst [vmem:[#allocation52_spill] sm:$0xff] %v5441_v56  ;;  %v5449_v23 = vadd.f32 %v4979_v62, %v4633_v49  ;;  %1841 = vmatpush.msrb.mxu3 %v371_v35  ;;  %v5495_v35 = vadd.f32 %v5066_v48, %v4625_v4  ;;  %v363_v48 = vld [vmem:[#allocation2 + $0x868] sm:$0xff] }
 0x230   : > { %1558 = vmatmul.f32.gmra.mxu0 %v7761_v47 }
 0x231   : > { %v1309_v54 = vpop.f32.mrf.mxu2  ;;  %v1422_v6 = vpop.f32.mrf.mxu3  ;;  %7765 = vst [vmem:[#allocation28_spill] sm:$0xff] %v5449_v23 }
 0x232   : > { %v1310_v16 = vadd.f32 %v1309_v54, %v1197_v5  ;;  %v1199_v59 = vpop.f32.mrf.mxu1  ;;  %v7526_v54 = vmax.f32 %v5437_v44, 0.0 }
 0x233   : > { %v1200_v47 = vadd.f32 %v1199_v59, %v1087_v52  ;;  %v7769_v59 = vld [vmem:[#allocation59_spill] sm:$0xff] }
 0x234   : > { %v5427_v41 = vadd.f32 %v1422_v6, %v1310_v16  ;;  %v5429_v28 = vpop.f32.mrf.mxu0  ;;  %v341_v16 = vld [vmem:[#allocation2 + $0x708] sm:$0xff]  ;;  %v7528_v6 = vmax.f32 %v5441_v56, 0.0  ;;  %v1090_v52 = vadd.f32 %v7769_v59, %v5163_v25 }
 0x235   : > { %7762 = vst [vmem:[#allocation47_spill] sm:$0xff] %v5429_v28  ;;  %1246 = vmatmul.f32.gmra.mxu1 %v7525_v63  ;;  %1727 = vmatpush.msrb.mxu2 %v341_v16  ;;  %v7527_v63 = vmax.f32 %v5449_v23, 0.0  ;;  %v5466_v16 = vadd.f32 %v5035_v57, %v4625_v4  ;;  %v369_v59 = vld [vmem:[#allocation2 + $0x8c8] sm:$0xff] }
 0x236   : > { %1359 = vmatmul.f32.gmra.mxu2 %v7523_v53  ;;  %1472 = vmatmul.f32.gmra.mxu3 %v7524_v58  ;;  %v367_v23 = vld [vmem:[#allocation2 + $0x8a8] sm:$0xff] }
 0x237   : > { %1842 = vmatpush.msrb.mxu3 %v369_v59 }
 0x238   : > { %1561 = vmatmul.f32.gmra.mxu0 %v7767_v40  ;;  %v339_v40 = vld [vmem:[#allocation2 + $0x6e8] sm:$0xff] }
 0x239   : > { %v1312_v11 = vpop.f32.mrf.mxu2  ;;  %v1425_v5 = vpop.f32.mrf.mxu3  ;;  %1728 = vmatpush.msrb.mxu2 %v339_v40  ;;  %1843 = vmatpush.msrb.mxu3 %v367_v23  ;;  %v365_v40 = vld [vmem:[#allocation2 + $0x888] sm:$0xff]  ;;  %v5507_v23 = vadd.f32 %v5041_v46, %v4633_v49 }
 0x23a   : > { %v1313_v53 = vadd.f32 %v1312_v11, %v1200_v47  ;;  %v1202_v58 = vpop.f32.mrf.mxu1  ;;  %v5478_v47 = vadd.f32 %v5010_v9, %v4633_v49  ;;  %v7770_v11 = vld [vmem:[#allocation32_spill] sm:$0xff]  ;;  %v335_v9 = vld [vmem:[#allocation2 + $0x6a8] sm:$0xff] }
 0x23b   : > { %v7771_v57 = vmax.f32 %v7770_v11, 0.0  ;;  %1729 = vmatpush.msrb.mxu2 %v337_v13  ;;  %1844 = vmatpush.msrb.mxu3 %v365_v40  ;;  %v327_v46 = vld [vmem:[#allocation2 + $0x628] sm:$0xff] }
 0x23c   : > { %v5456_v28 = vadd.f32 %v1425_v5, %v1313_v53  ;;  %v293_v53 = vld [vmem:[#allocation2 + $0x408] sm:$0xff]  ;;  %v1203_v5 = vadd.f32 %v1202_v58, %v1090_v52  ;;  %v7534_v11 = vmax.f32 %v5478_v47, 0.0 }
 0x23d   : > { %v5458_v62 = vpop.f32.mrf.mxu0  ;;  %1249 = vmatmul.f32.gmra.mxu1 %v7527_v63  ;;  %1730 = vmatpush.msrb.mxu2 %v335_v9  ;;  %v333_v52 = vld [vmem:[#allocation2 + $0x688] sm:$0xff] }
 0x23e   : > { %7768 = vst [vmem:[#allocation30_spill] sm:$0xff] %v5458_v62  ;;  %1362 = vmatmul.f32.gmra.mxu2 %v7526_v54  ;;  %1475 = vmatmul.f32.gmra.mxu3 %v7528_v6  ;;  %v7532_v6 = vmax.f32 %v5466_v16, 0.0  ;;  %v7533_v62 = vmax.f32 %v5470_v2, 0.0  ;;  %v361_v9 = vld [vmem:[#allocation2 + $0x848] sm:$0xff] }
 0x23f   : > { %1622 = vmatpush.msrb.mxu1 %v293_v53  ;;  %1731 = vmatpush.msrb.mxu2 %v333_v52  ;;  %v359_v40 = vld [vmem:[#allocation2 + $0x828] sm:$0xff] }
 0x240   : > { %1564 = vmatmul.f32.gmra.mxu0 %v7771_v57  ;;  %1845 = vmatpush.msrb.mxu3 %v363_v48  ;;  %v5524_v48 = vadd.f32 %v5097_v26, %v4625_v4 }
 0x241   : > { %v1315_v54 = vpop.f32.mrf.mxu2  ;;  %v1428_v63 = vpop.f32.mrf.mxu3 }
 0x242   : > { %v1316_v56 = vadd.f32 %v1315_v54, %v1203_v5  ;;  %v1205_v44 = vpop.f32.mrf.mxu1  ;;  %v1093_v54 = vadd.f32 %v4760_v15, %v5163_v25  ;;  %v7774_v15 = vld [vmem:[#allocation35_spill] sm:$0xff]  ;;  %1846 = vmatpush.msrb.mxu3 %v361_v9  ;;  %7777 = vst [vmem:[#allocation108_spill] sm:$0xff] %v5524_v48 }
 0x243   : > { %v7775_v57 = vmax.f32 %v7774_v15, 0.0  ;;  %v7537_v15 = vmax.f32 %v5507_v23, 0.0 }
 0x244   : > { %v5485_v53 = vadd.f32 %v1428_v63, %v1316_v56  ;;  %v5499_v63 = vadd.f32 %v5068_v55, %v4628_v7  ;;  %v331_v56 = vld [vmem:[#allocation2 + $0x668] sm:$0xff]  ;;  %v1206_v5 = vadd.f32 %v1205_v44, %v1093_v54  ;;  %v403_v54 = vld [vmem:[#allocation2 + $0x3f0] sm:$0xff]  ;;  %1847 = vmatpush.msrb.mxu3 %v359_v40 }
 0x245   : > { %v5487_v58 = vpop.f32.mrf.mxu0  ;;  %1252 = vmatmul.f32.gmra.mxu1 %v7534_v11  ;;  %v329_v55 = vld [vmem:[#allocation2 + $0x648] sm:$0xff]  ;;  %1732 = vmatpush.msrb.mxu2 %v331_v56 }
 0x246   : > { %7772 = vst [vmem:[#allocation59_spill] sm:$0xff] %v5487_v58  ;;  %1365 = vmatmul.f32.gmra.mxu2 %v7532_v6  ;;  %1478 = vmatmul.f32.gmra.mxu3 %v7533_v62  ;;  %v7536_v6 = vmax.f32 %v5495_v35, 0.0  ;;  %v7535_v62 = vmax.f32 %v5499_v63, 0.0  ;;  %v325_v56 = vld [vmem:[#allocation2 + $0x608] sm:$0xff] }
 0x247   : > { %7773 = vst [vmem:[#allocation32_spill] sm:$0xff] %v5499_v63  ;;  %1733 = vmatpush.msrb.mxu2 %v329_v55  ;;  %v419_v55 = vld [vmem:[#allocation2 + $0x5f0] sm:$0xff]  ;;  %1946 = vmatpush.msrb.mxu0 %v403_v54  ;;  %v7783_v40 = vld [vmem:[#allocation22_spill] sm:$0xff] }
 0x248   : > { %1567 = vmatmul.f32.gmra.mxu0 %v7775_v57  ;;  %v1096_v57 = vadd.f32 %v4792_v1, %v5163_v25  ;;  %v7780_v1 = vld [vmem:[#allocation38_spill] sm:$0xff]  ;;  %2059 = vmatpush.msra.mxu1 %v419_v55  ;;  %v5553_v54 = vadd.f32 %v7783_v40, %v4625_v4  ;;  %v7789_v55 = vld [vmem:[#allocation41_spill] sm:$0xff] }
 0x249   : > { %v1318_v13 = vpop.f32.mrf.mxu2  ;;  %v1431_v59 = vpop.f32.mrf.mxu3  ;;  %1734 = vmatpush.msrb.mxu2 %v327_v46  ;;  %v7539_v46 = vmax.f32 %v5524_v48, 0.0 }
 0x24a   : > { %v1319_v11 = vadd.f32 %v1318_v13, %v1206_v5  ;;  %v1208_v58 = vpop.f32.mrf.mxu1  ;;  %v357_v5 = vld [vmem:[#allocation2 + $0x808] sm:$0xff]  ;;  %v5536_v13 = vadd.f32 %v5072_v37, %v4633_v49  ;;  %7784 = vst [vmem:[#allocation22_spill] sm:$0xff] %v5553_v54 }
 0x24b   : > { %v1209_v26 = vadd.f32 %v1208_v58, %v1096_v57  ;;  %1735 = vmatpush.msrb.mxu2 %v325_v56  ;;  %1848 = vmatpush.msrb.mxu3 %v357_v5  ;;  %v1099_v58 = vadd.f32 %v4824_v51, %v5163_v25  ;;  %v7785_v56 = vld [vmem:[#allocation100_spill] sm:$0xff]  ;;  %v7790_v51 = vmax.f32 %v7789_v55, 0.0  ;;  %v7793_v55 = vld [vmem:[#allocation25_spill] sm:$0xff] }
 0x24c   : > { %v5514_v52 = vadd.f32 %v1431_v59, %v1319_v11  ;;  %v5528_v11 = vadd.f32 %v5099_v45, %v4628_v7  ;;  %7779 = vst [vmem:[#allocation110_spill] sm:$0xff] %v5536_v13  ;;  %v7781_v59 = vmax.f32 %v7780_v1, 0.0  ;;  %v7538_v37 = vmax.f32 %v5536_v13, 0.0 }
 0x24d   : > { %v5516_v44 = vpop.f32.mrf.mxu0  ;;  %1255 = vmatmul.f32.gmra.mxu1 %v7537_v15  ;;  %v5557_v57 = vadd.f32 %v7785_v56, %v4628_v7 }
 0x24e   : > { %7776 = vst [vmem:[#allocation35_spill] sm:$0xff] %v5516_v44  ;;  %1368 = vmatmul.f32.gmra.mxu2 %v7536_v6  ;;  %1481 = vmatmul.f32.gmra.mxu3 %v7535_v62  ;;  %v7540_v62 = vmax.f32 %v5528_v11, 0.0 }
 0x24f   : > { %7778 = vst [vmem:[#allocation109_spill] sm:$0xff] %v5528_v11  ;;  %v7544_v40 = vmax.f32 %v5557_v57, 0.0 }
 0x250   : > { %1570 = vmatmul.f32.gmra.mxu0 %v7781_v59  ;;  %7786 = vst [vmem:[#allocation100_spill] sm:$0xff] %v5557_v57 }
 0x251   : > { %v1321_v45 = vpop.f32.mrf.mxu2  ;;  %v1434_v9 = vpop.f32.mrf.mxu3 }
 0x252   : > { %v1322_v6 = vadd.f32 %v1321_v45, %v1209_v26  ;;  %v1211_v15 = vpop.f32.mrf.mxu1 }
 0x253   : > { %v1212_v59 = vadd.f32 %v1211_v15, %v1099_v58  ;;  %v7792_v15 = vld [vmem:[#allocation72_spill] sm:$0xff] }
 0x254   : > { %v5543_v44 = vadd.f32 %v1434_v9, %v1322_v6  ;;  %v7787_v6 = vld [vmem:[#allocation19_spill] sm:$0xff]  ;;  %v7542_v9 = vmax.f32 %v5553_v54, 0.0  ;;  %v1102_v58 = vadd.f32 %v7792_v15, %v5163_v25 }
 0x255   : > { %v5545_v1 = vpop.f32.mrf.mxu0  ;;  %1258 = vmatmul.f32.gmra.mxu1 %v7538_v37  ;;  %v5565_v5 = vadd.f32 %v7787_v6, %v4633_v49  ;;  %v402_v6 = vld [vmem:[#allocation2 + $0x3d0] sm:$0xff] }
 0x256   : > { %7782 = vst [vmem:[#allocation38_spill] sm:$0xff] %v5545_v1  ;;  %1371 = vmatmul.f32.gmra.mxu2 %v7539_v46  ;;  %1484 = vmatmul.f32.gmra.mxu3 %v7540_v62  ;;  %v7799_v15 = vld [vmem:[#allocation43_spill] sm:$0xff] }
 0x257   : > { %7788 = vst [vmem:[#allocation19_spill] sm:$0xff] %v5565_v5  ;;  %v7541_v46 = vmax.f32 %v5565_v5, 0.0  ;;  %1947 = vmatpush.msrb.mxu0 %v402_v6 }
 0x258   : > { %1573 = vmatmul.f32.gmra.mxu0 %v7790_v51  ;;  %v5582_v51 = vadd.f32 %v7793_v55, %v4625_v4 }
 0x259   : > { %v1324_v26 = vpop.f32.mrf.mxu2  ;;  %v1437_v45 = vpop.f32.mrf.mxu3 }
 0x25a   : > { %v1325_v56 = vadd.f32 %v1324_v26, %v1212_v59  ;;  %v1214_v37 = vpop.f32.mrf.mxu1  ;;  %7794 = vst [vmem:[#allocation72_spill] sm:$0xff] %v5582_v51  ;;  %v7795_v59 = vld [vmem:[#allocation105_spill] sm:$0xff] }
 0x25b   : > { %v5586_v26 = vadd.f32 %v7795_v59, %v4628_v7  ;;  %v1215_v4 = vadd.f32 %v1214_v37, %v1102_v58  ;;  %v7548_v7 = vmax.f32 %v5582_v51, 0.0  ;;  %v7803_v37 = vld [vmem:[#allocation45_spill] sm:$0xff] }
 0x25c   : > { %v5572_v1 = vadd.f32 %v1437_v45, %v1325_v56  ;;  %v418_v45 = vld [vmem:[#allocation2 + $0x5d0] sm:$0xff]  ;;  %v7797_v56 = vld [vmem:[#allocation101_spill] sm:$0xff]  ;;  %v7804_v58 = vmax.f32 %v7803_v37, 0.0 }
 0x25d   : > { %v5574_v62 = vpop.f32.mrf.mxu0  ;;  %1261 = vmatmul.f32.gmra.mxu1 %v7541_v46  ;;  %7796 = vst [vmem:[#allocation25_spill] sm:$0xff] %v5586_v26  ;;  %v5594_v6 = vadd.f32 %v7797_v56, %v4633_v49  ;;  %v7800_v46 = vmax.f32 %v7799_v15, 0.0  ;;  %v7550_v59 = vmax.f32 %v5586_v26, 0.0  ;;  %v7801_v49 = vld [vmem:[#allocation76_spill] sm:$0xff]  ;;  %v7810_v37 = vld [vmem:[#allocation49_spill] sm:$0xff] }
 0x25e   : > { %7791 = vst [vmem:[#allocation41_spill] sm:$0xff] %v5574_v62  ;;  %1374 = vmatmul.f32.gmra.mxu2 %v7542_v9  ;;  %1487 = vmatmul.f32.gmra.mxu3 %v7544_v40  ;;  %v7808_v26 = vld [vmem:[#allocation48_spill] sm:$0xff] }
 0x25f   : > { %7798 = vst [vmem:[#allocation105_spill] sm:$0xff] %v5594_v6  ;;  %2060 = vmatpush.msra.mxu1 %v418_v45  ;;  %v7546_v40 = vmax.f32 %v5594_v6, 0.0 }
 0x260   : > { %1576 = vmatmul.f32.gmra.mxu0 %v7800_v46  ;;  %v1105_v46 = vadd.f32 %v7801_v49, %v5163_v25  ;;  %v7805_v49 = vld [vmem:[#allocation50_spill] sm:$0xff] }
 0x261   : > { %v1327_v55 = vpop.f32.mrf.mxu2  ;;  %v1440_v62 = vpop.f32.mrf.mxu3  ;;  %v7806_v6 = vmax.f32 %v7805_v49, 0.0 }
 0x262   : > { %v1328_v9 = vadd.f32 %v1327_v55, %v1215_v4  ;;  %v1217_v54 = vpop.f32.mrf.mxu1 }
 0x263   : > { %v1218_v56 = vadd.f32 %v1217_v54, %v1105_v46  ;;  %v417_v54 = vld [vmem:[#allocation2 + $0x5b0] sm:$0xff]  ;;  %v7812_v46 = vld [vmem:[#allocation6_spill] sm:$0xff] }
 0x264   : > { %v5601_v57 = vadd.f32 %v1440_v62, %v1328_v9  ;;  %2061 = vmatpush.msra.mxu1 %v417_v54 }
 0x265   : > { %1264 = vmatmul.f32.gmra.mxu1 %v7546_v40  ;;  %v5607_v45 = vpop.f32.mrf.mxu0  ;;  %v401_v40 = vld [vmem:[#allocation2 + $0x3b0] sm:$0xff] }
 0x266   : > { %7802 = vst [vmem:[#allocation101_spill] sm:$0xff] %v5607_v45  ;;  %1377 = vmatmul.f32.gmra.mxu2 %v7548_v7  ;;  %1490 = vmatmul.f32.gmra.mxu3 %v7550_v59  ;;  %v7807_v7 = vld [vmem:[#allocation80_spill] sm:$0xff]  ;;  %v7809_v59 = vmax.f32 %v7808_v26, 0.0 }
 0x267   : > { %1948 = vmatpush.msrb.mxu0 %v401_v40  ;;  %v1108_v45 = vadd.f32 %v7807_v7, %v5163_v25  ;;  %v7815_v7 = vld [vmem:[#allocation55_spill] sm:$0xff] }
 0x268   : > { %1579 = vmatmul.f32.gmra.mxu0 %v7804_v58  ;;  %v7811_v58 = vmax.f32 %v7810_v37, 0.0  ;;  %v7816_v26 = vmax.f32 %v7815_v7, 0.0 }
 0x269   : > { %v1330_v62 = vpop.f32.mrf.mxu2  ;;  %v1443_v9 = vpop.f32.mrf.mxu3 }
 0x26a   : > { %v1331_v15 = vadd.f32 %v1330_v62, %v1218_v56  ;;  %v1220_v4 = vpop.f32.mrf.mxu1  ;;  %v7813_v56 = vmax.f32 %v7812_v46, 0.0  ;;  %v7820_v46 = vld [vmem:[#allocation54_spill] sm:$0xff] }
 0x26b   : > { %v1221_v62 = vadd.f32 %v1220_v4, %v1108_v45  ;;  %v7821_v54 = vmax.f32 %v7820_v46, 0.0  ;;  %v400_v45 = vld [vmem:[#allocation2 + $0x390] sm:$0xff]  ;;  %v7822_v4 = vld [vmem:[#allocation9_spill] sm:$0xff] }
 0x26c   : > { %v5615_v55 = vadd.f32 %v1443_v9, %v1331_v15  ;;  %1949 = vmatpush.msrb.mxu0 %v400_v45 }
 0x26d   : > { %1623 = vmatmul.f32.vlgmr.msrb.gmra.mxu1 %v7806_v6  ;;  %v5627_v9 = vpop.f32.mrf.mxu0 }
 0x26e   : > { %1736 = vmatmul.f32.vlgmr.msrb.gmra.mxu2 %v7809_v59  ;;  %1849 = vmatmul.f32.vlgmr.msrb.gmra.mxu3 %v7811_v58  ;;  %7814 = vst [vmem:[#allocation43_spill] sm:$0xff] %v5627_v9  ;;  %v7817_v59 = vld [vmem:[#allocation84_spill] sm:$0xff]  ;;  %v7818_v58 = vld [vmem:[#allocation53_spill] sm:$0xff] }
 0x26f   : > { %v1111_v37 = vadd.f32 %v7817_v59, %v5163_v25  ;;  %v7819_v5 = vmax.f32 %v7818_v58, 0.0  ;;  %v398_v59 = vld [vmem:[#allocation2 + $0x350] sm:$0xff] }
 0x270   : > { %1582 = vmatmul.f32.gmra.mxu0 %v7813_v56  ;;  %v7823_v56 = vmax.f32 %v7822_v4, 0.0  ;;  %v7827_v4 = vld [vmem:[#allocation7_spill] sm:$0xff] }
 0x271   : > { %v1333_v15 = vpop.f32.mrf.mxu2  ;;  %v1446_v6 = vpop.f32.mrf.mxu3 }
 0x272   : > { %v1334_v40 = vadd.f32 %v1333_v15, %v1221_v62  ;;  %v1223_v49 = vpop.f32.mrf.mxu1  ;;  %v399_v15 = vld [vmem:[#allocation2 + $0x370] sm:$0xff] }
 0x273   : > { %v1224_v62 = vadd.f32 %v1223_v49, %v1111_v37  ;;  %1950 = vmatpush.msrb.mxu0 %v399_v15  ;;  %v1114_v49 = vadd.f32 %v7827_v4, %v5163_v25  ;;  %v7828_v37 = vld [vmem:[#allocation56_spill] sm:$0xff] }
 0x274   : > { %v5629_v51 = vadd.f32 %v1446_v6, %v1334_v40  ;;  %v7829_v45 = vmax.f32 %v7828_v37, 0.0 }
 0x275   : > { %1626 = vmatmul.f32.gmra.mxu1 %v7816_v26  ;;  %v5641_v7 = vpop.f32.mrf.mxu0  ;;  %1951 = vmatpush.msrb.mxu0 %v398_v59 }
 0x276   : > { %1739 = vmatmul.f32.gmra.mxu2 %v7819_v5  ;;  %1852 = vmatmul.f32.gmra.mxu3 %v7821_v54  ;;  %7824 = vst [vmem:[#allocation76_spill] sm:$0xff] %v5641_v7  ;;  %v7825_v5 = vld [vmem:[#allocation58_spill] sm:$0xff]  ;;  %v397_v54 = vld [vmem:[#allocation2 + $0x330] sm:$0xff] }
 0x277   : > { %v7826_v46 = vmax.f32 %v7825_v5, 0.0  ;;  %1952 = vmatpush.msrb.mxu0 %v397_v54 }
 0x278   : > { %1585 = vmatmul.f32.gmra.mxu0 %v7823_v56  ;;  %v7830_v56 = vld [vmem:[#allocation57_spill] sm:$0xff] }
 0x279   : > { %v1336_v6 = vpop.f32.mrf.mxu2  ;;  %v1449_v40 = vpop.f32.mrf.mxu3  ;;  %v7831_v11 = vmax.f32 %v7830_v56, 0.0  ;;  %v394_v56 = vld [vmem:[#allocation2 + $0x2d0] sm:$0xff] }
 0x27a   : > { %v1337_v26 = vadd.f32 %v1336_v6, %v1224_v62  ;;  %v1226_v9 = vpop.f32.mrf.mxu1  ;;  %v416_v62 = vld [vmem:[#allocation2 + $0x590] sm:$0xff]  ;;  %v7832_v6 = vld [vmem:[#allocation12_spill] sm:$0xff] }
 0x27b   : > { %v7833_v15 = vmax.f32 %v7832_v6, 0.0  ;;  %2062 = vmatpush.msra.mxu1 %v416_v62  ;;  %v7837_v62 = vld [vmem:[#allocation10_spill] sm:$0xff] }
 0x27c   : > { %v5643_v58 = vadd.f32 %v1449_v40, %v1337_v26  ;;  %v396_v40 = vld [vmem:[#allocation2 + $0x310] sm:$0xff]  ;;  %v1227_v26 = vadd.f32 %v1226_v9, %v1114_v49  ;;  %v1117_v6 = vadd.f32 %v7837_v62, %v5163_v25  ;;  %v7838_v9 = vld [vmem:[#allocation60_spill] sm:$0xff]  ;;  %v7840_v49 = vld [vmem:[#allocation61_spill] sm:$0xff] }
 0x27d   : > { %1629 = vmatmul.f32.gmra.mxu1 %v7826_v46  ;;  %v395_v46 = vld [vmem:[#allocation2 + $0x2f0] sm:$0xff]  ;;  %1953 = vmatpush.msrb.mxu0 %v396_v40  ;;  %v5655_v4 = vpop.f32.mrf.mxu0  ;;  %v7839_v54 = vmax.f32 %v7838_v9, 0.0  ;;  %v7844_v62 = vld [vmem:[#allocation65_spill] sm:$0xff] }
 0x27e   : > { %1742 = vmatmul.f32.gmra.mxu2 %v7829_v45  ;;  %1855 = vmatmul.f32.gmra.mxu3 %v7831_v11  ;;  %7834 = vst [vmem:[#allocation45_spill] sm:$0xff] %v5655_v4  ;;  %v7835_v11 = vld [vmem:[#allocation62_spill] sm:$0xff]  ;;  %v7845_v9 = vmax.f32 %v7844_v62, 0.0 }
 0x27f   : > { %1954 = vmatpush.msrb.mxu0 %v395_v46  ;;  %v7836_v45 = vmax.f32 %v7835_v11, 0.0  ;;  %v392_v11 = vld [vmem:[#allocation2 + $0x290] sm:$0xff] }
 0x280   : > { %1588 = vmatmul.f32.gmra.mxu0 %v7833_v15  ;;  %v7841_v15 = vmax.f32 %v7840_v49, 0.0  ;;  %v7846_v49 = vld [vmem:[#allocation13_spill] sm:$0xff] }
 0x281   : > { %v1339_v59 = vpop.f32.mrf.mxu2  ;;  %v1452_v5 = vpop.f32.mrf.mxu3  ;;  %1955 = vmatpush.msrb.mxu0 %v394_v56 }
 0x282   : > { %v1340_v7 = vadd.f32 %v1339_v59, %v1227_v26  ;;  %v1229_v48 = vpop.f32.mrf.mxu1  ;;  %v7842_v26 = vld [vmem:[#allocation15_spill] sm:$0xff] }
 0x283   : > { %v7843_v40 = vmax.f32 %v7842_v26, 0.0  ;;  %v393_v59 = vld [vmem:[#allocation2 + $0x2b0] sm:$0xff] }
 0x284   : > { %v5657_v37 = vadd.f32 %v1452_v5, %v1340_v7  ;;  %v1230_v7 = vadd.f32 %v1229_v48, %v1117_v6  ;;  %1956 = vmatpush.msrb.mxu0 %v393_v59  ;;  %v7848_v48 = vld [vmem:[#allocation63_spill] sm:$0xff]  ;;  %v7850_v6 = vld [vmem:[#allocation64_spill] sm:$0xff]  ;;  %v7852_v59 = vld [vmem:[#allocation18_spill] sm:$0xff] }
 0x285   : > { %1632 = vmatmul.f32.gmra.mxu1 %v7836_v45  ;;  %v5675_v26 = vpop.f32.mrf.mxu0  ;;  %v7849_v56 = vmax.f32 %v7848_v48, 0.0  ;;  %v7855_v48 = vld [vmem:[#allocation68_spill] sm:$0xff] }
 0x286   : > { %1745 = vmatmul.f32.gmra.mxu2 %v7839_v54  ;;  %1858 = vmatmul.f32.gmra.mxu3 %v7841_v15  ;;  %v391_v54 = vld [vmem:[#allocation2 + $0x270] sm:$0xff]  ;;  %v1120_v15 = vadd.f32 %v7846_v49, %v5163_v25  ;;  %7847 = vst [vmem:[#allocation50_spill] sm:$0xff] %v5675_v26 }
 0x287   : > { %1957 = vmatpush.msrb.mxu0 %v392_v11 }
 0x288   : > { %1591 = vmatmul.f32.gmra.mxu0 %v7843_v40  ;;  %v7851_v40 = vmax.f32 %v7850_v6, 0.0  ;;  %v388_v6 = vld [vmem:[#allocation2 + $0x210] sm:$0xff] }
 0x289   : > { %v1342_v5 = vpop.f32.mrf.mxu2  ;;  %v1455_v46 = vpop.f32.mrf.mxu3  ;;  %1958 = vmatpush.msrb.mxu0 %v391_v54 }
 0x28a   : > { %v1343_v45 = vadd.f32 %v1342_v5, %v1230_v7  ;;  %v1232_v4 = vpop.f32.mrf.mxu1  ;;  %v415_v7 = vld [vmem:[#allocation2 + $0x570] sm:$0xff]  ;;  %v7853_v5 = vmax.f32 %v7852_v59, 0.0 }
 0x28b   : > { %2063 = vmatpush.msra.mxu1 %v415_v7  ;;  %v1233_v11 = vadd.f32 %v1232_v4, %v1120_v15  ;;  %v7860_v4 = vld [vmem:[#allocation67_spill] sm:$0xff]  ;;  %v7862_v15 = vld [vmem:[#allocation21_spill] sm:$0xff] }
 0x28c   : > { %v5669_v13 = vadd.f32 %v1455_v46, %v1343_v45  ;;  %v390_v46 = vld [vmem:[#allocation2 + $0x250] sm:$0xff]  ;;  %v7861_v54 = vmax.f32 %v7860_v4, 0.0  ;;  %v7869_v4 = vld [vmem:[#allocation69_spill] sm:$0xff] }
 0x28d   : > { %1635 = vmatmul.f32.gmra.mxu1 %v7845_v9  ;;  %v389_v9 = vld [vmem:[#allocation2 + $0x230] sm:$0xff]  ;;  %1959 = vmatpush.msrb.mxu0 %v390_v46  ;;  %v5695_v46 = vpop.f32.mrf.mxu0 }
 0x28e   : > { %1748 = vmatmul.f32.gmra.mxu2 %v7849_v56  ;;  %1861 = vmatmul.f32.gmra.mxu3 %v7851_v40  ;;  %v7856_v56 = vmax.f32 %v7855_v48, 0.0  ;;  %v7857_v40 = vld [vmem:[#allocation16_spill] sm:$0xff]  ;;  %7864 = vst [vmem:[#allocation48_spill] sm:$0xff] %v5695_v46 }
 0x28f   : > { %1960 = vmatpush.msrb.mxu0 %v389_v9  ;;  %v1123_v59 = vadd.f32 %v7857_v40, %v5163_v25  ;;  %v7866_v40 = vld [vmem:[#allocation71_spill] sm:$0xff] }
 0x290   : > { %1594 = vmatmul.f32.gmra.mxu0 %v7853_v5  ;;  %v7858_v5 = vld [vmem:[#allocation66_spill] sm:$0xff] }
 0x291   : > { %v1345_v45 = vpop.f32.mrf.mxu2  ;;  %v1458_v62 = vpop.f32.mrf.mxu3  ;;  %v7859_v7 = vmax.f32 %v7858_v5, 0.0  ;;  %1961 = vmatpush.msrb.mxu0 %v388_v6  ;;  %v7868_v5 = vld [vmem:[#allocation97_spill] sm:$0xff]  ;;  %v7873_v6 = vld [vmem:[#allocation24_spill] sm:$0xff] }
 0x292   : > { %v1346_v49 = vadd.f32 %v1345_v45, %v1233_v11  ;;  %v1235_v63 = vpop.f32.mrf.mxu1  ;;  %v7863_v11 = vmax.f32 %v7862_v15, 0.0  ;;  %v7871_v15 = vld [vmem:[#allocation70_spill] sm:$0xff] }
 0x293   : > { %v1236_v45 = vadd.f32 %v1235_v63, %v1123_v59  ;;  %v414_v63 = vld [vmem:[#allocation2 + $0x550] sm:$0xff]  ;;  %v7874_v59 = vmax.f32 %v7873_v6, 0.0  ;;  %v7881_v6 = vld [vmem:[#allocation74_spill] sm:$0xff] }
 0x294   : > { %v5683_v26 = vadd.f32 %v1458_v62, %v1346_v49  ;;  %2064 = vmatpush.msra.mxu1 %v414_v63  ;;  %v7882_v63 = vmax.f32 %v7881_v6, 0.0  ;;  %v7889_v6 = vld [vmem:[#allocation77_spill] sm:$0xff] }
 0x295   : > { %1638 = vmatmul.f32.gmra.mxu1 %v7856_v56 }
 0x296   : > { %7854 = vst [vmem:[#allocation80_spill] sm:$0xff] %v5683_v26  ;;  %1751 = vmatmul.f32.gmra.mxu2 %v7859_v7  ;;  %1864 = vmatmul.f32.gmra.mxu3 %v7861_v54  ;;  %v7867_v26 = vmax.f32 %v7866_v40, 0.0  ;;  %v1126_v7 = vadd.f32 %v7868_v5, %v5163_v25  ;;  %v7870_v54 = vmax.f32 %v7869_v4, 0.0  ;;  %v7876_v5 = vld [vmem:[#allocation75_spill] sm:$0xff] }
 0x297   : > { %v7877_v4 = vmax.f32 %v7876_v5, 0.0 }
 0x298   : > { %1597 = vmatmul.f32.gmra.mxu0 %v7863_v11  ;;  %v7872_v11 = vmax.f32 %v7871_v15, 0.0 }
 0x299   : > { %v1348_v62 = vpop.f32.mrf.mxu2  ;;  %v1461_v9 = vpop.f32.mrf.mxu3 }
 0x29a   : > { %v1349_v49 = vadd.f32 %v1348_v62, %v1236_v45  ;;  %v1238_v48 = vpop.f32.mrf.mxu1 }
 0x29b   : > { %v1239_v45 = vadd.f32 %v1238_v48, %v1126_v7  ;;  %v7883_v48 = vld [vmem:[#allocation27_spill] sm:$0xff] }
 0x29c   : > { %v5697_v56 = vadd.f32 %v1461_v9, %v1349_v49  ;;  %v5709_v49 = vpop.f32.mrf.mxu0  ;;  %v7884_v7 = vmax.f32 %v7883_v48, 0.0  ;;  %v7891_v48 = vld [vmem:[#allocation78_spill] sm:$0xff] }
 0x29d   : > { %1641 = vmatmul.f32.gmra.mxu1 %v7867_v26  ;;  %7875 = vst [vmem:[#allocation6_spill] sm:$0xff] %v5709_v49 }
 0x29e   : > { %7865 = vst [vmem:[#allocation49_spill] sm:$0xff] %v5697_v56  ;;  %1754 = vmatmul.f32.gmra.mxu2 %v7870_v54  ;;  %1867 = vmatmul.f32.gmra.mxu3 %v7872_v11  ;;  %v7878_v54 = vld [vmem:[#allocation102_spill] sm:$0xff]  ;;  %v7879_v11 = vld [vmem:[#allocation73_spill] sm:$0xff] }
 0x29f   : > { %v1129_v15 = vadd.f32 %v7878_v54, %v5163_v25  ;;  %v7880_v56 = vmax.f32 %v7879_v11, 0.0 }
 0x2a0   : > { %1600 = vmatmul.f32.gmra.mxu0 %v7874_v59 }
 0x2a1   : > { %v1351_v62 = vpop.f32.mrf.mxu2  ;;  %v1464_v9 = vpop.f32.mrf.mxu3 }
 0x2a2   : > { %v1352_v26 = vadd.f32 %v1351_v62, %v1239_v45  ;;  %v1241_v40 = vpop.f32.mrf.mxu1 }
 0x2a3   : > { %v1242_v59 = vadd.f32 %v1241_v40, %v1129_v15  ;;  %v413_v40 = vld [vmem:[#allocation2 + $0x530] sm:$0xff] }
 0x2a4   : > { %v5711_v46 = vadd.f32 %v1464_v9, %v1352_v26  ;;  %v5723_v49 = vpop.f32.mrf.mxu0  ;;  %2065 = vmatpush.msra.mxu1 %v413_v40 }
 0x2a5   : > { %1644 = vmatmul.f32.gmra.mxu1 %v7877_v4  ;;  %7885 = vst [vmem:[#allocation55_spill] sm:$0xff] %v5723_v49  ;;  %v7886_v4 = vld [vmem:[#allocation79_spill] sm:$0xff] }
 0x2a6   : > { %1757 = vmatmul.f32.gmra.mxu2 %v7880_v56  ;;  %1870 = vmatmul.f32.gmra.mxu3 %v7882_v63  ;;  %v7887_v54 = vmax.f32 %v7886_v4, 0.0  ;;  %v7888_v56 = vld [vmem:[#allocation29_spill] sm:$0xff]  ;;  %v7890_v63 = vmax.f32 %v7889_v6, 0.0 }
 0x2a7   : > { %v1132_v11 = vadd.f32 %v7888_v56, %v5163_v25  ;;  %v1135_v56 = vadd.f32 %v5199_v0, %v5163_v25  ;;  %v1138_v0 = vadd.f32 %v5228_v10, %v5163_v25  ;;  %v7905_v10 = vld [vmem:[#allocation36_spill] sm:$0xff] }
 0x2a8   : > { %1603 = vmatmul.f32.gmra.mxu0 %v7884_v7  ;;  %v7892_v7 = vmax.f32 %v7891_v48, 0.0 }
 0x2a9   : > { %v1354_v45 = vpop.f32.mrf.mxu2  ;;  %v1467_v62 = vpop.f32.mrf.mxu3 }
 0x2aa   : > { %v1355_v9 = vadd.f32 %v1354_v45, %v1242_v59  ;;  %v1244_v26 = vpop.f32.mrf.mxu1 }
 0x2ab   : > { %v1245_v15 = vadd.f32 %v1244_v26, %v1132_v11 }
 0x2ac   : > { %v5725_v5 = vadd.f32 %v1467_v62, %v1355_v9  ;;  %v5742_v6 = vpop.f32.mrf.mxu0 }
 0x2ad   : > { %1647 = vmatmul.f32.gmra.mxu1 %v7887_v54  ;;  %v7893_v54 = vld [vmem:[#allocation83_spill] sm:$0xff] }
 0x2ae   : > { %1760 = vmatmul.f32.gmra.mxu2 %v7890_v63  ;;  %1873 = vmatmul.f32.gmra.mxu3 %v7892_v7  ;;  %v7894_v49 = vmax.f32 %v7893_v54, 0.0  ;;  %v7895_v63 = vld [vmem:[#allocation81_spill] sm:$0xff] }
 0x2af   : > { %v7896_v48 = vmax.f32 %v7895_v63, 0.0  ;;  %v7901_v54 = vld [vmem:[#allocation85_spill] sm:$0xff] }
 0x2b0   : > { %1962 = vmatmul.f32.vlgmr.msrb.gmra.mxu0 %v5197_v24  ;;  %v7897_v24 = vld [vmem:[#allocation82_spill] sm:$0xff]  ;;  %v7902_v63 = vmax.f32 %v7901_v54, 0.0  ;;  %v7907_v54 = vld [vmem:[#allocation87_spill] sm:$0xff] }
 0x2b1   : > { %v1357_v59 = vpop.f32.mrf.mxu2  ;;  %v1470_v45 = vpop.f32.mrf.mxu3  ;;  %v7898_v7 = vmax.f32 %v7897_v24, 0.0 }
 0x2b2   : > { %v1358_v62 = vadd.f32 %v1357_v59, %v1245_v15  ;;  %v1247_v9 = vpop.f32.mrf.mxu1 }
 0x2b3   : > { %v1248_v26 = vadd.f32 %v1247_v9, %v1135_v56 }
 0x2b4   : > { %v5736_v4 = vadd.f32 %v1470_v45, %v1358_v62  ;;  %v5760_v9 = vpop.f32.mrf.mxu0 }
 0x2b5   : > { %1650 = vmatmul.f32.gmra.mxu1 %v7894_v49  ;;  %v7899_v49 = vld [vmem:[#allocation33_spill] sm:$0xff] }
 0x2b6   : > { %1763 = vmatmul.f32.gmra.mxu2 %v7896_v48  ;;  %1876 = vmatmul.f32.gmra.mxu3 %v7898_v7  ;;  %v7900_v62 = vmax.f32 %v7899_v49, 0.0  ;;  %v7903_v48 = vld [vmem:[#allocation86_spill] sm:$0xff]  ;;  %v7906_v49 = vmax.f32 %v7905_v10, 0.0 }
 0x2b7   : > { %v7904_v24 = vmax.f32 %v7903_v48, 0.0 }
 0x2b8   : > { %1965 = vmatmul.f32.gmra.mxu0 %v5226_v8  ;;  %v412_v8 = vld [vmem:[#allocation2 + $0x510] sm:$0xff] }
 0x2b9   : > { %v1360_v11 = vpop.f32.mrf.mxu2  ;;  %v1473_v40 = vpop.f32.mrf.mxu3  ;;  %2066 = vmatpush.msra.mxu1 %v412_v8 }
 0x2ba   : > { %v1361_v15 = vadd.f32 %v1360_v11, %v1248_v26  ;;  %v1250_v59 = vpop.f32.mrf.mxu1 }
 0x2bb   : > { %v1251_v56 = vadd.f32 %v1250_v59, %v1138_v0 }
 0x2bc   : > { %v5749_v45 = vadd.f32 %v1473_v40, %v1361_v15 }
 0x2bd   : > { %1653 = vmatmul.f32.gmra.mxu1 %v7900_v62  ;;  %v1141_v62 = vadd.f32 %v5257_v19, %v5163_v25  ;;  %v1144_v19 = vadd.f32 %v5286_v38, %v5163_v25 }
 0x2be   : > { %1766 = vmatmul.f32.gmra.mxu2 %v7902_v63  ;;  %1879 = vmatmul.f32.gmra.mxu3 %v7904_v24  ;;  %v7908_v63 = vmax.f32 %v7907_v54, 0.0 }
 0x2c0   : > { %1968 = vmatmul.f32.gmra.mxu0 %v5255_v3  ;;  %v7909_v3 = vld [vmem:[#allocation88_spill] sm:$0xff] }
 0x2c1   : > { %v1363_v7 = vpop.f32.mrf.mxu2  ;;  %v1476_v26 = vpop.f32.mrf.mxu3  ;;  %v7910_v48 = vmax.f32 %v7909_v3, 0.0 }
 0x2c2   : > { %v1364_v11 = vadd.f32 %v1363_v7, %v1251_v56  ;;  %v1253_v40 = vpop.f32.mrf.mxu1  ;;  %v5773_v7 = vpop.f32.mrf.mxu0 }
 0x2c3   : > { %v1254_v59 = vadd.f32 %v1253_v40, %v1141_v62  ;;  %v411_v40 = vld [vmem:[#allocation2 + $0x4f0] sm:$0xff] }
 0x2c4   : > { %v5762_v15 = vadd.f32 %v1476_v26, %v1364_v11  ;;  %v7911_v11 = vld [vmem:[#allocation39_spill] sm:$0xff]  ;;  %2067 = vmatpush.msra.mxu1 %v411_v40 }
 0x2c5   : > { %1656 = vmatmul.f32.gmra.mxu1 %v7906_v49  ;;  %v7912_v10 = vmax.f32 %v7911_v11, 0.0  ;;  %v7913_v49 = vld [vmem:[#allocation89_spill] sm:$0xff]  ;;  %v427_v62 = vld [vmem:[#allocation2 + $0x6f0] sm:$0xff] }
 0x2c6   : > { %1769 = vmatmul.f32.gmra.mxu2 %v7908_v63  ;;  %1882 = vmatmul.f32.gmra.mxu3 %v7910_v48  ;;  %v7914_v54 = vmax.f32 %v7913_v49, 0.0  ;;  %v7915_v63 = vld [vmem:[#allocation90_spill] sm:$0xff]  ;;  %v7917_v11 = vld [vmem:[#allocation93_spill] sm:$0xff]  ;;  %v1147_v49 = vadd.f32 %v5315_v12, %v5163_v25  ;;  %v1150_v12 = vadd.f32 %v5344_v42, %v5163_v25 }
 0x2c7   : > { %2309 = vmatpush.msra.mxu2 %v427_v62  ;;  %v7929_v42 = vld [vmem:[#allocation46_spill] sm:$0xff] }
 0x2c8   : > { %1971 = vmatmul.f32.gmra.mxu0 %v5284_v34  ;;  %v7916_v34 = vmax.f32 %v7915_v63, 0.0  ;;  %v7921_v63 = vld [vmem:[#allocation92_spill] sm:$0xff] }
 0x2c9   : > { %v1366_v0 = vpop.f32.mrf.mxu2  ;;  %v1479_v24 = vpop.f32.mrf.mxu3 }
 0x2ca   : > { %v1367_v8 = vadd.f32 %v1366_v0, %v1254_v59  ;;  %v1256_v56 = vpop.f32.mrf.mxu1  ;;  %v5788_v38 = vpop.f32.mrf.mxu0 }
 0x2cb   : > { %v1257_v3 = vadd.f32 %v1256_v56, %v1144_v19  ;;  %v7922_v56 = vmax.f32 %v7921_v63, 0.0 }
 0x2cc   : > { %v5775_v26 = vadd.f32 %v1479_v24, %v1367_v8 }
 0x2cd   : > { %1659 = vmatmul.f32.gmra.mxu1 %v7912_v10  ;;  %v7918_v10 = vmax.f32 %v7917_v11, 0.0  ;;  %v7925_v11 = vld [vmem:[#allocation94_spill] sm:$0xff] }
 0x2ce   : > { %1772 = vmatmul.f32.gmra.mxu2 %v7914_v54  ;;  %1885 = vmatmul.f32.gmra.mxu3 %v7916_v34  ;;  %v7919_v54 = vld [vmem:[#allocation91_spill] sm:$0xff] }
 0x2d0   : > { %1974 = vmatmul.f32.gmra.mxu0 %v5313_v33  ;;  %v7920_v33 = vmax.f32 %v7919_v54, 0.0  ;;  %v7927_v54 = vld [vmem:[#allocation95_spill] sm:$0xff] }
 0x2d1   : > { %v1369_v48 = vpop.f32.mrf.mxu2  ;;  %v1482_v59 = vpop.f32.mrf.mxu3 }
 0x2d2   : > { %v1370_v0 = vadd.f32 %v1369_v48, %v1257_v3  ;;  %v1259_v24 = vpop.f32.mrf.mxu1 }
 0x2d3   : > { %v1260_v19 = vadd.f32 %v1259_v24, %v1147_v49  ;;  %v5809_v24 = vpop.f32.mrf.mxu0 }
 0x2d4   : > { %v5786_v8 = vadd.f32 %v1482_v59, %v1370_v0  ;;  %v7923_v59 = vld [vmem:[#allocation96_spill] sm:$0xff] }
 0x2d5   : > { %1662 = vmatmul.f32.gmra.mxu1 %v7918_v10  ;;  %v7924_v0 = vmax.f32 %v7923_v59, 0.0  ;;  %v7926_v10 = vmax.f32 %v7925_v11, 0.0  ;;  %v1153_v59 = vadd.f32 %v5373_v61, %v5163_v25  ;;  %v7937_v61 = vld [vmem:[#allocation103_spill] sm:$0xff] }
 0x2d6   : > { %1775 = vmatmul.f32.gmra.mxu2 %v7920_v33  ;;  %1888 = vmatmul.f32.gmra.mxu3 %v7922_v56  ;;  %v7928_v33 = vmax.f32 %v7927_v54, 0.0 }
 0x2d8   : > { %1977 = vmatmul.f32.gmra.mxu0 %v5342_v17  ;;  %v410_v17 = vld [vmem:[#allocation2 + $0x4d0] sm:$0xff] }
 0x2d9   : > { %v1372_v34 = vpop.f32.mrf.mxu2  ;;  %v1485_v40 = vpop.f32.mrf.mxu3  ;;  %2068 = vmatpush.msra.mxu1 %v410_v17 }
 0x2da   : > { %v1373_v62 = vadd.f32 %v1372_v34, %v1260_v19  ;;  %v1262_v3 = vpop.f32.mrf.mxu1 }
 0x2db   : > { %v1263_v49 = vadd.f32 %v1262_v3, %v1150_v12  ;;  %v5823_v3 = vpop.f32.mrf.mxu0 }
 0x2dc   : > { %v5799_v48 = vadd.f32 %v1485_v40, %v1373_v62  ;;  %v7930_v62 = vmax.f32 %v7929_v42, 0.0  ;;  %v7939_v42 = vld [vmem:[#allocation104_spill] sm:$0xff] }
 0x2dd   : > { %1665 = vmatmul.f32.gmra.mxu1 %v7924_v0  ;;  %v7931_v0 = vld [vmem:[#allocation98_spill] sm:$0xff] }
 0x2de   : > { %1778 = vmatmul.f32.gmra.mxu2 %v7926_v10  ;;  %1891 = vmatmul.f32.gmra.mxu3 %v7928_v33  ;;  %v7932_v11 = vmax.f32 %v7931_v0, 0.0  ;;  %v7933_v10 = vld [vmem:[#allocation99_spill] sm:$0xff] }
 0x2df   : > { %v7934_v54 = vmax.f32 %v7933_v10, 0.0  ;;  %v7942_v10 = vld [vmem:[#allocation106_spill] sm:$0xff] }
 0x2e0   : > { %1980 = vmatmul.f32.gmra.mxu0 %v5371_v31 }
 0x2e1   : > { %v1375_v63 = vpop.f32.mrf.mxu2  ;;  %v1488_v56 = vpop.f32.mrf.mxu3 }
 0x2e2   : > { %v1376_v19 = vadd.f32 %v1375_v63, %v1263_v49  ;;  %v1265_v34 = vpop.f32.mrf.mxu1 }
 0x2e3   : > { %v1266_v31 = vadd.f32 %v1265_v34, %v1153_v59  ;;  %v426_v34 = vld [vmem:[#allocation2 + $0x6d0] sm:$0xff]  ;;  %v5838_v0 = vpop.f32.mrf.mxu0 }
 0x2e4   : > { %v5812_v40 = vadd.f32 %v1488_v56, %v1376_v19  ;;  %v7935_v56 = vld [vmem:[#allocation51_spill] sm:$0xff]  ;;  %v7938_v19 = vmax.f32 %v7937_v61, 0.0  ;;  %2310 = vmatpush.msra.mxu2 %v426_v34 }
 0x2e5   : > { %1668 = vmatmul.f32.gmra.mxu1 %v7930_v62  ;;  %v7936_v25 = vmax.f32 %v7935_v56, 0.0  ;;  %v7940_v62 = vmax.f32 %v7939_v42, 0.0  ;;  %v7947_v56 = vld [vmem:[#allocation5_spill] sm:$0xff] }
 0x2e6   : > { %1781 = vmatmul.f32.gmra.mxu2 %v7932_v11  ;;  %1894 = vmatmul.f32.gmra.mxu3 %v7934_v54  ;;  %v7941_v11 = vmax.f32 %v5188_v20, 0.0  ;;  %v7943_v54 = vmax.f32 %v7942_v10, 0.0  ;;  %v7949_v20 = vld [vmem:[#allocation31_spill] sm:$0xff] }
 0x2e7   : > { %v7950_v61 = vmax.f32 %v7949_v20, 0.0  ;;  %v7961_v20 = vmax.f32 %v5304_v21, 0.0  ;;  %v7970_v21 = vld [vmem:[#allocation42_spill] sm:$0xff] }
 0x2e8   : > { %1983 = vmatmul.f32.gmra.mxu0 %v5398_v30  ;;  %v409_v30 = vld [vmem:[#allocation2 + $0x4b0] sm:$0xff] }
 0x2e9   : > { %v1378_v12 = vpop.f32.mrf.mxu2  ;;  %v1491_v49 = vpop.f32.mrf.mxu3  ;;  %2069 = vmatpush.msra.mxu1 %v409_v30 }
 0x2ea   : > { %v1379_v33 = vadd.f32 %v1378_v12, %v1266_v31  ;;  %v5825_v17 = vpop.f32.mrf.mxu1  ;;  %v7944_v31 = vld [vmem:[#allocation107_spill] sm:$0xff] }
 0x2eb   : > { %v7945_v12 = vmax.f32 %v7944_v31, 0.0 }
 0x2ec   : > { %v5827_v63 = vadd.f32 %v1491_v49, %v1379_v33  ;;  %v7946_v49 = vmax.f32 %v5217_v29, 0.0  ;;  %v7954_v29 = vld [vmem:[#allocation34_spill] sm:$0xff] }
 0x2ed   : > { %1671 = vmatmul.f32.gmra.mxu1 %v7936_v25  ;;  %v7948_v25 = vmax.f32 %v7947_v56, 0.0  ;;  %v7955_v34 = vmax.f32 %v7954_v29, 0.0  ;;  %v425_v56 = vld [vmem:[#allocation2 + $0x6b0] sm:$0xff]  ;;  %v7968_v29 = vld [vmem:[#allocation17_spill] sm:$0xff] }
 0x2ee   : > { %1784 = vmatmul.f32.gmra.mxu2 %v7938_v19  ;;  %1897 = vmatmul.f32.gmra.mxu3 %v7940_v62  ;;  %v408_v19 = vld [vmem:[#allocation2 + $0x490] sm:$0xff]  ;;  %v7952_v62 = vld [vmem:[#allocation8_spill] sm:$0xff] }
 0x2ef   : > { %2070 = vmatpush.msra.mxu1 %v408_v19  ;;  %v7953_v30 = vmax.f32 %v7952_v62, 0.0  ;;  %2311 = vmatpush.msra.mxu2 %v425_v56  ;;  %v7964_v19 = vld [vmem:[#allocation40_spill] sm:$0xff] }
 0x2f0   : > { %1986 = vmatmul.f32.gmra.mxu0 %v5427_v41  ;;  %v5849_v41 = vpop.f32.mrf.mxu0  ;;  %v7975_v56 = vld [vmem:[#allocation20_spill] sm:$0xff] }
 0x2f2   : > { %v5836_v59 = vpop.f32.mrf.mxu1 }
 0x2f5   : > { %1674 = vmatmul.f32.gmra.mxu1 %v7941_v11 }
 0x2f6   : > { %1787 = vmatmul.f32.gmra.mxu2 %v7943_v54  ;;  %1900 = vmatmul.f32.gmra.mxu3 %v7945_v12  ;;  %v7957_v54 = vld [vmem:[#allocation11_spill] sm:$0xff] }
 0x2f7   : > { %v7958_v31 = vmax.f32 %v7957_v54, 0.0  ;;  %v406_v54 = vld [vmem:[#allocation2 + $0x450] sm:$0xff] }
 0x2f8   : > { %1989 = vmatmul.f32.gmra.mxu0 %v5456_v28  ;;  %v7951_v28 = vmax.f32 %v5246_v18, 0.0  ;;  %v5866_v11 = vpop.f32.mrf.mxu0  ;;  %v7959_v18 = vld [vmem:[#allocation37_spill] sm:$0xff] }
 0x2f9   : > { %v7960_v12 = vmax.f32 %v7959_v18, 0.0 }
 0x2fa   : > { %v5847_v33 = vpop.f32.mrf.mxu1 }
 0x2fd   : > { %1677 = vmatmul.f32.gmra.mxu1 %v7946_v49  ;;  %v407_v49 = vld [vmem:[#allocation2 + $0x470] sm:$0xff] }
 0x2fe   : > { %1790 = vmatmul.f32.gmra.mxu2 %v7948_v25  ;;  %1903 = vmatmul.f32.gmra.mxu3 %v7950_v61 }
 0x2ff   : > { %2071 = vmatpush.msra.mxu1 %v407_v49  ;;  %v7974_v49 = vmax.f32 %v5350_v60, 0.0 }
 0x300   : > { %1992 = vmatmul.f32.gmra.mxu0 %v5485_v53  ;;  %v7956_v53 = vmax.f32 %v5275_v39, 0.0  ;;  %v5878_v25 = vpop.f32.mrf.mxu0  ;;  %v7962_v39 = vld [vmem:[#allocation14_spill] sm:$0xff] }
 0x301   : > { %v7963_v61 = vmax.f32 %v7962_v39, 0.0  ;;  %2072 = vmatpush.msra.mxu1 %v406_v54  ;;  %v7984_v54 = vmax.f32 %v5412_v36, 0.0  ;;  %v404_v36 = vld [vmem:[#allocation2 + $0x410] sm:$0xff] }
 0x302   : > { %v5858_v42 = vpop.f32.mrf.mxu1 }
 0x305   : > { %1680 = vmatmul.f32.gmra.mxu1 %v7951_v28  ;;  %v7965_v28 = vmax.f32 %v7964_v19, 0.0  ;;  %v7977_v19 = vmax.f32 %v5391_v43, 0.0 }
 0x306   : > { %1793 = vmatmul.f32.gmra.mxu2 %v7953_v30  ;;  %1906 = vmatmul.f32.gmra.mxu3 %v7955_v34  ;;  %v7967_v30 = vmax.f32 %v5333_v27, 0.0  ;;  %v7969_v34 = vmax.f32 %v7968_v29, 0.0  ;;  %v7973_v27 = vmax.f32 %v5362_v14, 0.0  ;;  %v7978_v14 = vmax.f32 %v5379_v32, 0.0 }
 0x307   : > { %v7982_v32 = vmax.f32 %v5420_v22, 0.0  ;;  %v7988_v22 = vld [vmem:[#allocation26_spill] sm:$0xff] }
 0x308   : > { %1995 = vmatmul.f32.gmra.mxu0 %v5514_v52 }
 0x30a   : > { %v5869_v10 = vpop.f32.mrf.mxu1 }
 0x30d   : > { %1683 = vmatmul.f32.gmra.mxu1 %v7956_v53  ;;  %v7971_v53 = vmax.f32 %v7970_v21, 0.0 }
 0x30e   : > { %1796 = vmatmul.f32.gmra.mxu2 %v7958_v31  ;;  %1909 = vmatmul.f32.gmra.mxu3 %v7960_v12  ;;  %v5899_v31 = vpop.f32.mrf.mxu2 }
 0x310   : > { %1998 = vmatmul.f32.gmra.mxu0 %v5543_v44  ;;  %v5891_v44 = vpop.f32.mrf.mxu0 }
 0x311   : > { %7966 = vst [vmem:[#allocation84_spill] sm:$0xff] %v5891_v44 }
 0x312   : > { %v5880_v52 = vpop.f32.mrf.mxu1 }
 0x315   : > { %1686 = vmatmul.f32.gmra.mxu1 %v7961_v20  ;;  %v7976_v20 = vmax.f32 %v7975_v56, 0.0  ;;  %v7986_v56 = vld [vmem:[#allocation28_spill] sm:$0xff] }
 0x316   : > { %1799 = vmatmul.f32.gmra.mxu2 %v7963_v61  ;;  %1912 = vmatmul.f32.gmra.mxu3 %v7965_v28  ;;  %v5915_v39 = vpop.f32.mrf.mxu2  ;;  %v7979_v28 = vld [vmem:[#allocation44_spill] sm:$0xff] }
 0x317   : > { %v7980_v60 = vmax.f32 %v7979_v28, 0.0 }
 0x318   : > { %2001 = vmatmul.f32.gmra.mxu0 %v5572_v1  ;;  %v5902_v1 = vpop.f32.mrf.mxu3  ;;  %v5906_v12 = vpop.f32.mrf.mxu0 }
 0x319   : > { %7972 = vst [vmem:[#allocation53_spill] sm:$0xff] %v5906_v12 }
 0x31a   : > { %v5889_v62 = vpop.f32.mrf.mxu1 }
 0x31d   : > { %1689 = vmatmul.f32.gmra.mxu1 %v7967_v30  ;;  %v405_v30 = vld [vmem:[#allocation2 + $0x430] sm:$0xff] }
 0x31e   : > { %1802 = vmatmul.f32.gmra.mxu2 %v7969_v34  ;;  %1915 = vmatmul.f32.gmra.mxu3 %v7971_v53  ;;  %v5932_v21 = vpop.f32.mrf.mxu2  ;;  %v7983_v53 = vmax.f32 %v5408_v50, 0.0  ;;  %v7990_v50 = vld [vmem:[#allocation52_spill] sm:$0xff] }
 0x31f   : > { %2073 = vmatpush.msra.mxu1 %v405_v30  ;;  %v7991_v28 = vmax.f32 %v7990_v50, 0.0  ;;  %v7993_v30 = vmax.f32 %v5478_v47, 0.0  ;;  %v7998_v47 = vmax.f32 %v5495_v35, 0.0 }
 0x320   : > { %2004 = vmatmul.f32.gmra.mxu0 %v5601_v57  ;;  %v5917_v57 = vpop.f32.mrf.mxu3  ;;  %v5927_v29 = vpop.f32.mrf.mxu0 }
 0x321   : > { %7981 = vst [vmem:[#allocation54_spill] sm:$0xff] %v5927_v29  ;;  %2074 = vmatpush.msra.mxu1 %v404_v36  ;;  %v8002_v36 = vld [vmem:[#allocation110_spill] sm:$0xff] }
 0x322   : > { %v5904_v18 = vpop.f32.mrf.mxu1 }
 0x325   : > { %1692 = vmatmul.f32.gmra.mxu1 %v7973_v27 }
 0x326   : > { %1805 = vmatmul.f32.gmra.mxu2 %v7974_v49  ;;  %1918 = vmatmul.f32.gmra.mxu3 %v7976_v20  ;;  %v5947_v49 = vpop.f32.mrf.mxu2  ;;  %v7987_v20 = vmax.f32 %v7986_v56, 0.0 }
 0x328   : > { %2007 = vmatmul.f32.gmra.mxu0 %v5615_v55  ;;  %v424_v55 = vld [vmem:[#allocation2 + $0x690] sm:$0xff]  ;;  %v5934_v43 = vpop.f32.mrf.mxu3 }
 0x329   : > { %2312 = vmatpush.msra.mxu2 %v424_v55  ;;  %v7994_v55 = vmax.f32 %v5466_v16, 0.0  ;;  %v7999_v16 = vld [vmem:[#allocation32_spill] sm:$0xff] }
 0x32a   : > { %v5919_v61 = vpop.f32.mrf.mxu1 }
 0x32d   : > { %1695 = vmatmul.f32.gmra.mxu1 %v7977_v19 }
 0x32e   : > { %1808 = vmatmul.f32.gmra.mxu2 %v7978_v14  ;;  %1921 = vmatmul.f32.gmra.mxu3 %v7980_v60  ;;  %v7989_v14 = vmax.f32 %v7988_v22, 0.0  ;;  %v8000_v22 = vmax.f32 %v7999_v16, 0.0  ;;  %v8009_v16 = vld [vmem:[#allocation49_spill] sm:$0xff] }
 0x330   : > { %2010 = vmatmul.f32.gmra.mxu0 %v5629_v51  ;;  %v5943_v51 = vpop.f32.mrf.mxu0  ;;  %v5951_v19 = vpop.f32.mrf.mxu3 }
 0x331   : > { %7985 = vst [vmem:[#allocation9_spill] sm:$0xff] %v5943_v51 }
 0x332   : > { %v5930_v34 = vpop.f32.mrf.mxu1 }
 0x335   : > { %1698 = vmatmul.f32.gmra.mxu1 %v7982_v32  ;;  %v7995_v32 = vmax.f32 %v5470_v2, 0.0  ;;  %v8001_v2 = vld [vmem:[#allocation80_spill] sm:$0xff] }
 0x336   : > { %1811 = vmatmul.f32.gmra.mxu2 %v7983_v53  ;;  %1924 = vmatmul.f32.gmra.mxu3 %v7984_v54  ;;  %v5968_v53 = vpop.f32.mrf.mxu2 }
 0x338   : > { %2013 = vmatmul.f32.gmra.mxu0 %v5643_v58  ;;  %v5960_v60 = vpop.f32.mrf.mxu0  ;;  %v5971_v54 = vpop.f32.mrf.mxu3 }
 0x339   : > { %7992 = vst [vmem:[#allocation58_spill] sm:$0xff] %v5960_v60  ;;  %v8016_v60 = vld [vmem:[#allocation23_spill] sm:$0xff] }
 0x33a   : > { %v5945_v27 = vpop.f32.mrf.mxu1 }
 0x33d   : > { %1701 = vmatmul.f32.gmra.mxu1 %v7987_v20  ;;  %v7997_v20 = vmax.f32 %v5507_v23, 0.0  ;;  %v433_v23 = vld [vmem:[#allocation2 + $0x7b0] sm:$0xff] }
 0x33e   : > { %1814 = vmatmul.f32.gmra.mxu2 %v7989_v14  ;;  %1927 = vmatmul.f32.gmra.mxu3 %v7991_v28  ;;  %v423_v14 = vld [vmem:[#allocation2 + $0x670] sm:$0xff] }
 0x33f   : > { %2313 = vmatpush.msra.mxu2 %v423_v14  ;;  %2521 = vmatpush.msra.mxu3 %v433_v23 }
 0x340   : > { %2016 = vmatmul.f32.gmra.mxu0 %v5657_v37  ;;  %v5975_v56 = vpop.f32.mrf.mxu0  ;;  %v5986_v50 = vpop.f32.mrf.mxu3 }
 0x341   : > { %7996 = vst [vmem:[#allocation7_spill] sm:$0xff] %v5975_v56  ;;  %v8012_v56 = vld [vmem:[#allocation22_spill] sm:$0xff] }
 0x342   : > { %v5958_v58 = vpop.f32.mrf.mxu1 }
 0x345   : > { %1704 = vmatmul.f32.gmra.mxu1 %v7993_v30  ;;  %v8003_v30 = vmax.f32 %v8002_v36, 0.0  ;;  %v8010_v36 = vld [vmem:[#allocation19_spill] sm:$0xff] }
 0x346   : > { %1817 = vmatmul.f32.gmra.mxu2 %v7994_v55  ;;  %1930 = vmatmul.f32.gmra.mxu3 %v7995_v32  ;;  %v8004_v55 = vld [vmem:[#allocation108_spill] sm:$0xff]  ;;  %v8006_v32 = vld [vmem:[#allocation109_spill] sm:$0xff] }
 0x347   : > { %v8005_v35 = vmax.f32 %v8004_v55, 0.0  ;;  %v8013_v55 = vmax.f32 %v8012_v56, 0.0 }
 0x348   : > { %2019 = vmatmul.f32.gmra.mxu0 %v5669_v13  ;;  %v5984_v13 = vpop.f32.mrf.mxu2  ;;  %v6003_v14 = vpop.f32.mrf.mxu3 }
 0x34a   : > { %v5973_v37 = vpop.f32.mrf.mxu1 }
 0x34d   : > { %1707 = vmatmul.f32.gmra.mxu1 %v7997_v20  ;;  %v8007_v20 = vmax.f32 %v8006_v32, 0.0 }
 0x34e   : > { %1820 = vmatmul.f32.gmra.mxu2 %v7998_v47  ;;  %1933 = vmatmul.f32.gmra.mxu3 %v8000_v22  ;;  %v5996_v47 = vpop.f32.mrf.mxu0 }
 0x34f   : > { %8008 = vst [vmem:[#allocation56_spill] sm:$0xff] %v5996_v47 }
 0x350   : > { %2022 = vmatmul.f32.gmra.mxu0 %v8001_v2  ;;  %v6001_v2 = vpop.f32.mrf.mxu2 }
 0x352   : > { %v5988_v28 = vpop.f32.mrf.mxu1 }
 0x355   : > { %1710 = vmatmul.f32.gmra.mxu1 %v8003_v30  ;;  %v8011_v30 = vmax.f32 %v8010_v36, 0.0 }
 0x356   : > { %1823 = vmatmul.f32.gmra.mxu2 %v8005_v35  ;;  %1936 = vmatmul.f32.gmra.mxu3 %v8007_v20  ;;  %v8014_v35 = vld [vmem:[#allocation100_spill] sm:$0xff]  ;;  %v4016_v20 = vld [vmem:[#allocation2 + $0xa01] ss:$8 sm:$0x3]  ;;  %v6014_v23 = vpop.f32.mrf.mxu0 }
 0x357   : > { %v8015_v32 = vmax.f32 %v8014_v35, 0.0  ;;  %v6011_v47 = vperm.slane %v4016_v20, 1  ;;  %v6025_v35 = vpop.f32.mrf.mxu3 }
 0x358   : > { %2025 = vmatmul.f32.gmra.mxu0 %v8009_v16 }
 0x359   : > { %v1512_v51 = vadd.f32 %v8016_v60, %v6011_v47 }
 0x35a   : > { %v5999_v22 = vpop.f32.mrf.mxu1 }
 0x35b   : > { %v1625_v36 = vadd.f32 %v5825_v17, %v1512_v51  ;;  %v8023_v17 = vld [vmem:[#allocation47_spill] sm:$0xff] }
 0x35c   : > { %v1515_v51 = vadd.f32 %v8023_v17, %v6011_v47 }
 0x35d   : > { %1713 = vmatmul.f32.gmra.mxu1 %v8011_v30  ;;  %v8017_v30 = vld [vmem:[#allocation105_spill] sm:$0xff]  ;;  %v1738_v12 = vadd.f32 %v5899_v31, %v1625_v36 }
 0x35e   : > { %1826 = vmatmul.f32.gmra.mxu2 %v8013_v55  ;;  %1939 = vmatmul.f32.gmra.mxu3 %v8015_v32  ;;  %v8018_v56 = vmax.f32 %v8017_v30, 0.0  ;;  %v6023_v55 = vpop.f32.mrf.mxu2  ;;  %v8019_v32 = vld [vmem:[#allocation72_spill] sm:$0xff]  ;;  %v1628_v44 = vadd.f32 %v5836_v59, %v1515_v51 }
 0x35f   : > { %v8020_v20 = vmax.f32 %v8019_v32, 0.0  ;;  %v1851_v30 = vadd.f32 %v5902_v1, %v1738_v12  ;;  %v1874_v51 = vpop.f32.mrf.mxu3 }
 0x360   : > { %2028 = vmatmul.f32.gmra.mxu0 %v5711_v46  ;;  %v8021_v46 = vld [vmem:[#allocation25_spill] sm:$0xff]  ;;  %v1741_v32 = vadd.f32 %v5915_v39, %v1628_v44  ;;  %v8025_v44 = vld [vmem:[#allocation59_spill] sm:$0xff] }
 0x361   : > { %v8022_v29 = vmax.f32 %v8021_v46, 0.0  ;;  %v1521_v39 = vadd.f32 %v8025_v44, %v6011_v47 }
 0x362   : > { %v6016_v16 = vpop.f32.mrf.mxu1 }
 0x365   : > { %1716 = vmatmul.f32.gmra.mxu1 %v8018_v56  ;;  %v6038_v56 = vpop.f32.mrf.mxu0 }
 0x366   : > { %1829 = vmatmul.f32.gmra.mxu2 %v8020_v20  ;;  %1942 = vmatmul.f32.gmra.mxu3 %v8022_v29  ;;  %v422_v29 = vld [vmem:[#allocation2 + $0x650] sm:$0xff]  ;;  %v1854_v20 = vadd.f32 %v5917_v57, %v1741_v32  ;;  %v1761_v59 = vpop.f32.mrf.mxu2  ;;  %v1634_v57 = vadd.f32 %v5858_v42, %v1521_v39 }
 0x367   : > { %2314 = vmatpush.msra.mxu2 %v422_v29  ;;  %v1877_v42 = vpop.f32.mrf.mxu3 }
 0x368   : > { %2031 = vmatmul.f32.gmra.mxu0 %v5725_v5  ;;  %v8024_v5 = vld [vmem:[#allocation30_spill] sm:$0xff] }
 0x369   : > { %v1518_v36 = vadd.f32 %v8024_v5, %v6011_v47 }
 0x36a   : > { %v6033_v60 = vpop.f32.mrf.mxu1 }
 0x36b   : > { %v1631_v1 = vadd.f32 %v5847_v33, %v1518_v36  ;;  %v1747_v33 = vadd.f32 %v5947_v49, %v1634_v57  ;;  %v432_v36 = vld [vmem:[#allocation2 + $0x790] sm:$0xff]  ;;  %v8028_v57 = vld [vmem:[#allocation41_spill] sm:$0xff] }
 0x36c   : > { %2522 = vmatpush.msra.mxu3 %v432_v36  ;;  %v8029_v36 = vld [vmem:[#allocation101_spill] sm:$0xff] }
 0x36d   : > { %2075 = vmatmul.f32.vlgmr.msra.gmra.mxu1 %v1851_v30  ;;  %v6049_v12 = vpop.f32.mrf.mxu0  ;;  %v1744_v46 = vadd.f32 %v5932_v21, %v1631_v1  ;;  %v1860_v5 = vadd.f32 %v5951_v19, %v1747_v33  ;;  %v1530_v33 = vadd.f32 %v8028_v57, %v6011_v47 }
 0x36e   : > { %v1764_v21 = vpop.f32.mrf.mxu2 }
 0x36f   : > { %v1857_v17 = vadd.f32 %v5934_v43, %v1744_v46  ;;  %v8027_v46 = vld [vmem:[#allocation38_spill] sm:$0xff] }
 0x370   : > { %2034 = vmatmul.f32.gmra.mxu0 %v5736_v4  ;;  %v1527_v44 = vadd.f32 %v8027_v46, %v6011_v47 }
 0x372   : > { %v6043_v31 = vpop.f32.mrf.mxu1  ;;  %v1640_v39 = vadd.f32 %v5880_v52, %v1527_v44  ;;  %v1643_v52 = vadd.f32 %v5889_v62, %v1530_v33 }
 0x375   : > { %2078 = vmatmul.f32.gmra.mxu1 %v1854_v20  ;;  %v6060_v30 = vpop.f32.mrf.mxu0 }
 0x378   : > { %2037 = vmatmul.f32.gmra.mxu0 %v5749_v45  ;;  %v8026_v45 = vld [vmem:[#allocation35_spill] sm:$0xff] }
 0x379   : > { %v1524_v29 = vadd.f32 %v8026_v45, %v6011_v47 }
 0x37a   : > { %v6053_v4 = vpop.f32.mrf.mxu1 }
 0x37b   : > { %v1637_v43 = vadd.f32 %v5869_v10, %v1524_v29  ;;  %v421_v10 = vld [vmem:[#allocation2 + $0x630] sm:$0xff] }
 0x37c   : > { %2315 = vmatpush.msra.mxu2 %v421_v10 }
 0x37d   : > { %2081 = vmatmul.f32.gmra.mxu1 %v1857_v17  ;;  %v1750_v49 = vadd.f32 %v5968_v53, %v1637_v43  ;;  %v6071_v20 = vpop.f32.mrf.mxu0  ;;  %v1753_v17 = vadd.f32 %v5984_v13, %v1640_v39  ;;  %v1533_v43 = vadd.f32 %v8029_v36, %v6011_v47 }
 0x37f   : > { %v1863_v19 = vadd.f32 %v5971_v54, %v1750_v49  ;;  %v1866_v45 = vadd.f32 %v5986_v50, %v1753_v17  ;;  %v1646_v50 = vadd.f32 %v5904_v18, %v1533_v43 }
 0x380   : > { %2040 = vmatmul.f32.gmra.mxu0 %v5762_v15  ;;  %v1767_v15 = vpop.f32.mrf.mxu2 }
 0x381   : > { %v1759_v62 = vadd.f32 %v6023_v55, %v1646_v50 }
 0x382   : > { %v6063_v32 = vpop.f32.mrf.mxu1 }
 0x383   : > { %v1872_v39 = vadd.f32 %v6025_v35, %v1759_v62  ;;  %v420_v35 = vld [vmem:[#allocation2 + $0x610] sm:$0xff] }
 0x384   : > { %2316 = vmatpush.msra.mxu2 %v420_v35 }
 0x385   : > { %2084 = vmatmul.f32.gmra.mxu1 %v1860_v5  ;;  %v6086_v29 = vpop.f32.mrf.mxu0  ;;  %v1756_v5 = vadd.f32 %v6001_v2, %v1643_v52  ;;  %v431_v52 = vld [vmem:[#allocation2 + $0x770] sm:$0xff] }
 0x386   : > { %2523 = vmatpush.msra.mxu3 %v431_v52 }
 0x387   : > { %v1869_v49 = vadd.f32 %v6003_v14, %v1756_v5 }
 0x388   : > { %2043 = vmatmul.f32.gmra.mxu0 %v5775_v26  ;;  %v1880_v26 = vpop.f32.mrf.mxu3  ;;  %v1770_v54 = vpop.f32.mrf.mxu2 }
 0x38a   : > { %v6073_v1 = vpop.f32.mrf.mxu1 }
 0x38d   : > { %2087 = vmatmul.f32.gmra.mxu1 %v1863_v19  ;;  %v6097_v46 = vpop.f32.mrf.mxu0 }
 0x390   : > { %2046 = vmatmul.f32.gmra.mxu0 %v5786_v8  ;;  %v1883_v13 = vpop.f32.mrf.mxu3  ;;  %v1773_v44 = vpop.f32.mrf.mxu2 }
 0x392   : > { %v6081_v53 = vpop.f32.mrf.mxu1 }
 0x395   : > { %2090 = vmatmul.f32.gmra.mxu1 %v1866_v45  ;;  %v6107_v17 = vpop.f32.mrf.mxu0 }
 0x398   : > { %2049 = vmatmul.f32.gmra.mxu0 %v5799_v48  ;;  %v8030_v48 = vld [vmem:[#allocation43_spill] sm:$0xff]  ;;  %v1886_v10 = vpop.f32.mrf.mxu3  ;;  %v1776_v57 = vpop.f32.mrf.mxu2 }
 0x399   : > { %v1536_v19 = vadd.f32 %v8030_v48, %v6011_v47 }
 0x39a   : > { %v6091_v8 = vpop.f32.mrf.mxu1 }
 0x39b   : > { %v1649_v14 = vadd.f32 %v5919_v61, %v1536_v19 }
 0x39d   : > { %2093 = vmatmul.f32.gmra.mxu1 %v1869_v49  ;;  %v1762_v18 = vadd.f32 %v1761_v59, %v1649_v14 }
 0x39f   : > { %v1875_v45 = vadd.f32 %v1874_v51, %v1762_v18 }
 0x3a0   : > { %2052 = vmatmul.f32.gmra.mxu0 %v5812_v40  ;;  %v8031_v40 = vld [vmem:[#allocation76_spill] sm:$0xff]  ;;  %v1889_v61 = vpop.f32.mrf.mxu3  ;;  %v1779_v36 = vpop.f32.mrf.mxu2 }
 0x3a1   : > { %v1539_v33 = vadd.f32 %v8031_v40, %v6011_v47 }
 0x3a2   : > { %v6101_v2 = vpop.f32.mrf.mxu1 }
 0x3a3   : > { %v1652_v5 = vadd.f32 %v5930_v34, %v1539_v33  ;;  %v8033_v34 = vld [vmem:[#allocation50_spill] sm:$0xff] }
 0x3a5   : > { %2096 = vmatmul.f32.gmra.mxu1 %v1872_v39  ;;  %v1765_v59 = vadd.f32 %v1764_v21, %v1652_v5  ;;  %v1545_v39 = vadd.f32 %v8033_v34, %v6011_v47 }
 0x3a7   : > { %v1878_v50 = vadd.f32 %v1877_v42, %v1765_v59  ;;  %v1658_v21 = vadd.f32 %v5958_v58, %v1545_v39  ;;  %v8034_v42 = vld [vmem:[#allocation48_spill] sm:$0xff]  ;;  %v430_v39 = vld [vmem:[#allocation2 + $0x750] sm:$0xff] }
 0x3a8   : > { %2055 = vmatmul.f32.gmra.mxu0 %v5827_v63  ;;  %v8032_v63 = vld [vmem:[#allocation45_spill] sm:$0xff]  ;;  %v1892_v48 = vpop.f32.mrf.mxu3  ;;  %v1782_v18 = vpop.f32.mrf.mxu2  ;;  %2524 = vmatpush.msra.mxu3 %v430_v39 }
 0x3a9   : > { %v1542_v49 = vadd.f32 %v8032_v63, %v6011_v47  ;;  %v1771_v40 = vadd.f32 %v1770_v54, %v1658_v21 }
 0x3aa   : > { %v6110_v55 = vpop.f32.mrf.mxu1 }
 0x3ab   : > { %v1655_v62 = vadd.f32 %v5945_v27, %v1542_v49  ;;  %v1548_v27 = vadd.f32 %v8034_v42, %v6011_v47  ;;  %v1884_v52 = vadd.f32 %v1883_v13, %v1771_v40  ;;  %v8036_v13 = vld [vmem:[#allocation55_spill] sm:$0xff] }
 0x3ad   : > { %2099 = vmatmul.f32.gmra.mxu1 %v1875_v45  ;;  %v1768_v51 = vadd.f32 %v1767_v15, %v1655_v62  ;;  %v1661_v15 = vadd.f32 %v5973_v37, %v1548_v27  ;;  %v1554_v37 = vadd.f32 %v8036_v13, %v6011_v47 }
 0x3af   : > { %v1881_v14 = vadd.f32 %v1880_v26, %v1768_v51  ;;  %v1774_v35 = vadd.f32 %v1773_v44, %v1661_v15  ;;  %v8035_v26 = vld [vmem:[#allocation6_spill] sm:$0xff]  ;;  %v1667_v44 = vadd.f32 %v5999_v22, %v1554_v37  ;;  %v1560_v22 = vadd.f32 %v5760_v9, %v6011_v47 }
 0x3b0   : > { %v1895_v33 = vpop.f32.mrf.mxu3  ;;  %v1785_v5 = vpop.f32.mrf.mxu2  ;;  %v1551_v63 = vadd.f32 %v8035_v26, %v6011_v47  ;;  %v6150_v26 = vld [vmem:[#allocation2 + $0xa02] ss:$0 sm:$0xff] }
 0x3b1   : > { %v1887_v58 = vadd.f32 %v1886_v10, %v1774_v35  ;;  %v1780_v21 = vadd.f32 %v1779_v36, %v1667_v44  ;;  %v1673_v36 = vadd.f32 %v6033_v60, %v1560_v22  ;;  %v6169_v44 = vpop.f32.mrf.mxu0 }
 0x3b2   : > { %v6115_v43 = vpop.f32.mrf.mxu1  ;;  %v1664_v54 = vadd.f32 %v5988_v28, %v1551_v63  ;;  %v1557_v28 = vadd.f32 %v5742_v6, %v6011_v47  ;;  %v1964_v6 = vadd.f32 %v6014_v23, %v6150_v26  ;;  %v1967_v23 = vadd.f32 %v6038_v56, %v6150_v26 }
 0x3b3   : > { %v1786_v63 = vadd.f32 %v1785_v5, %v1673_v36  ;;  %v1970_v56 = vadd.f32 %v6049_v12, %v6150_v26  ;;  %v1973_v12 = vadd.f32 %v6060_v30, %v6150_v26  ;;  %v1976_v30 = vadd.f32 %v6071_v20, %v6150_v26 }
 0x3b4   : > { %v1670_v42 = vadd.f32 %v6016_v16, %v1557_v28  ;;  %v1979_v20 = vadd.f32 %v6086_v29, %v6150_v26  ;;  %v1982_v29 = vadd.f32 %v6097_v46, %v6150_v26  ;;  %v1985_v46 = vadd.f32 %v6107_v17, %v6150_v26 }
 0x3b5   : > { %2102 = vmatmul.f32.gmra.mxu1 %v1878_v50  ;;  %v1777_v50 = vadd.f32 %v1776_v57, %v1664_v54  ;;  %v1893_v57 = vadd.f32 %v1892_v48, %v1780_v21 }
 0x3b6   : > { %v1783_v27 = vadd.f32 %v1782_v18, %v1670_v42  ;;  %v1563_v18 = vadd.f32 %v5773_v7, %v6011_v47  ;;  %v1566_v7 = vadd.f32 %v5788_v38, %v6011_v47  ;;  %v1569_v38 = vadd.f32 %v5809_v24, %v6011_v47 }
 0x3b7   : > { %v1890_v34 = vadd.f32 %v1889_v61, %v1777_v50 }
 0x3b8   : > { %v1898_v49 = vpop.f32.mrf.mxu3  ;;  %v1788_v62 = vpop.f32.mrf.mxu2  ;;  %v1896_v15 = vadd.f32 %v1895_v33, %v1783_v27  ;;  %v1676_v9 = vadd.f32 %v6043_v31, %v1563_v18  ;;  %v1679_v31 = vadd.f32 %v6053_v4, %v1566_v7  ;;  %v1682_v4 = vadd.f32 %v6063_v32, %v1569_v38  ;;  %v429_v27 = vld [vmem:[#allocation2 + $0x730] sm:$0xff] }
 0x3b9   : > { %2525 = vmatpush.msra.mxu3 %v429_v27  ;;  %v6183_v22 = vpop.f32.mrf.mxu0 }
 0x3ba   : > { %v6120_v19 = vpop.f32.mrf.mxu1  ;;  %v1789_v50 = vadd.f32 %v1788_v62, %v1676_v9 }
 0x3bd   : > { %2105 = vmatmul.f32.gmra.mxu1 %v1881_v14 }
 0x3c0   : > { %v1901_v14 = vpop.f32.mrf.mxu3  ;;  %v1791_v10 = vpop.f32.mrf.mxu2 }
 0x3c1   : > { %v1792_v62 = vadd.f32 %v1791_v10, %v1679_v31 }
 0x3c2   : > { %v6125_v45 = vpop.f32.mrf.mxu1 }
 0x3c5   : > { %2108 = vmatmul.f32.gmra.mxu1 %v1884_v52 }
 0x3c8   : > { %v1904_v52 = vpop.f32.mrf.mxu3  ;;  %v1794_v35 = vpop.f32.mrf.mxu2 }
 0x3c9   : > { %v1795_v10 = vadd.f32 %v1794_v35, %v1682_v4 }
 0x3ca   : > { %v6130_v59 = vpop.f32.mrf.mxu1 }
 0x3cd   : > { %2111 = vmatmul.f32.gmra.mxu1 %v1887_v58  ;;  %v1899_v58 = vadd.f32 %v1898_v49, %v1786_v63  ;;  %v1902_v49 = vadd.f32 %v1901_v14, %v1789_v50  ;;  %v1905_v14 = vadd.f32 %v1904_v52, %v1792_v62 }
 0x3d0   : > { %v1907_v16 = vpop.f32.mrf.mxu3  ;;  %v1797_v33 = vpop.f32.mrf.mxu2 }
 0x3d1   : > { %v1908_v32 = vadd.f32 %v1907_v16, %v1795_v10 }
 0x3d2   : > { %v6135_v51 = vpop.f32.mrf.mxu1 }
 0x3d5   : > { %2114 = vmatmul.f32.gmra.mxu1 %v1890_v34 }
 0x3d8   : > { %v1910_v37 = vpop.f32.mrf.mxu3  ;;  %v1800_v39 = vpop.f32.mrf.mxu2 }
 0x3da   : > { %v6140_v40 = vpop.f32.mrf.mxu1 }
 0x3dd   : > { %2117 = vmatmul.f32.gmra.mxu1 %v1893_v57 }
 0x3e0   : > { %v1913_v42 = vpop.f32.mrf.mxu3  ;;  %v1803_v24 = vpop.f32.mrf.mxu2 }
 0x3e2   : > { %v6145_v61 = vpop.f32.mrf.mxu1 }
 0x3e5   : > { %2120 = vmatmul.f32.gmra.mxu1 %v1896_v15  ;;  %v1572_v15 = vadd.f32 %v5823_v3, %v6011_v47  ;;  %v6196_v3 = vpop.f32.mrf.mxu0 }
 0x3e7   : > { %v1685_v63 = vadd.f32 %v6073_v1, %v1572_v15 }
 0x3e8   : > { %v1806_v1 = vpop.f32.mrf.mxu2 }
 0x3ea   : > { %v2076_v48 = vpop.f32.mrf.mxu1 }
 0x3eb   : > { %v6156_v54 = vadd.f32 %v2076_v48, %v1964_v6  ;;  %v1798_v6 = vadd.f32 %v1797_v33, %v1685_v63  ;;  %v1916_v48 = vpop.f32.mrf.mxu3 }
 0x3ed   : > { %v2172_v60 = vmax.f32 %v6156_v54, 0.0  ;;  %2123 = vmatmul.f32.gmra.mxu1 %v1899_v58  ;;  %v1575_v58 = vadd.f32 %v5838_v0, %v6011_v47  ;;  %v1911_v16 = vadd.f32 %v1910_v37, %v1798_v6  ;;  %v1578_v0 = vadd.f32 %v5849_v41, %v6011_v47  ;;  %v6209_v37 = vpop.f32.mrf.mxu0 }
 0x3ee   : > { %v1581_v41 = vadd.f32 %v5866_v11, %v6011_v47  ;;  %v1584_v11 = vadd.f32 %v5878_v25, %v6011_v47  ;;  %v8037_v25 = vld [vmem:[#allocation84_spill] sm:$0xff] }
 0x3ef   : > { %3718 = vmatmul.msk.f32.vlgmr.msra.gmra.mxu2 %vm2204_vm0, %v2172_v60  ;;  %v1688_v60 = vadd.f32 %v6081_v53, %v1575_v58  ;;  %v1691_v53 = vadd.f32 %v6091_v8, %v1578_v0  ;;  %v1587_v6 = vadd.f32 %v8037_v25, %v6011_v47  ;;  %v428_v58 = vld [vmem:[#allocation2 + $0x710] sm:$0xff] }
 0x3f0   : > { %v1694_v8 = vadd.f32 %v6101_v2, %v1581_v41  ;;  %v1697_v2 = vadd.f32 %v6110_v55, %v1584_v11  ;;  %2526 = vmatpush.msra.mxu3 %v428_v58 }
 0x3f1   : > { %v1801_v50 = vadd.f32 %v1800_v39, %v1688_v60  ;;  %v1804_v62 = vadd.f32 %v1803_v24, %v1691_v53  ;;  %v1700_v55 = vadd.f32 %v6115_v43, %v1587_v6 }
 0x3f2   : > { %v2079_v5 = vpop.f32.mrf.mxu1 }
 0x3f3   : > { %v6165_v13 = vadd.f32 %v2079_v5, %v1967_v23  ;;  %v1919_v23 = vpop.f32.mrf.mxu3  ;;  %v1914_v7 = vadd.f32 %v1913_v42, %v1801_v50 }
 0x3f5   : > { %v2173_v34 = vmax.f32 %v6165_v13, 0.0  ;;  %2126 = vmatmul.f32.gmra.mxu1 %v1902_v49  ;;  %v6222_v4 = vpop.f32.mrf.mxu0 }
 0x3f7   : > { %3719 = vmatmul.msk.f32.gmra.mxu2 %vm2204_vm0, %v2173_v34  ;;  %v1809_v34 = vpop.f32.mrf.mxu2 }
 0x3f8   : > { %v1810_v15 = vadd.f32 %v1809_v34, %v1697_v2 }
 0x3fa   : > { %v2082_v21 = vpop.f32.mrf.mxu1 }
 0x3fb   : > { %v6176_v28 = vadd.f32 %v2082_v21, %v1970_v56  ;;  %v1917_v56 = vadd.f32 %v1916_v48, %v1804_v62  ;;  %v1922_v38 = vpop.f32.mrf.mxu3  ;;  %v8039_v62 = vld [vmem:[#allocation54_spill] sm:$0xff] }
 0x3fc   : > { %v1923_v48 = vadd.f32 %v1922_v38, %v1810_v15 }
 0x3fd   : > { %v2174_v57 = vmax.f32 %v6176_v28, 0.0  ;;  %2129 = vmatmul.f32.gmra.mxu1 %v1905_v14  ;;  %v6236_v17 = vpop.f32.mrf.mxu0 }
 0x3fe   : > { %v2003_v58 = vadd.f32 %v6236_v17, %v6150_v26 }
 0x3ff   : > { %3720 = vmatmul.msk.f32.gmra.mxu2 %vm2204_vm0, %v2174_v57  ;;  %v1807_v57 = vadd.f32 %v1806_v1, %v1694_v8  ;;  %v1812_v42 = vpop.f32.mrf.mxu2  ;;  %v1991_v1 = vadd.f32 %v6183_v22, %v6150_v26  ;;  %v1994_v22 = vadd.f32 %v6196_v3, %v6150_v26  ;;  %v1997_v3 = vadd.f32 %v6209_v37, %v6150_v26 }
 0x400   : > { %v2000_v37 = vadd.f32 %v6222_v4, %v6150_v26 }
 0x401   : > { %v1920_v27 = vadd.f32 %v1919_v23, %v1807_v57 }
 0x402   : > { %v2085_v52 = vpop.f32.mrf.mxu1 }
 0x403   : > { %v6187_v36 = vadd.f32 %v2085_v52, %v1973_v12  ;;  %v1925_v52 = vpop.f32.mrf.mxu3 }
 0x405   : > { %v2175_v35 = vmax.f32 %v6187_v36, 0.0  ;;  %2132 = vmatmul.f32.gmra.mxu1 %v1908_v32  ;;  %v1988_v32 = vadd.f32 %v6169_v44, %v6150_v26 }
 0x407   : > { %3721 = vmatmul.msk.f32.gmra.mxu2 %vm2204_vm0, %v2175_v35  ;;  %v1815_v63 = vpop.f32.mrf.mxu2 }
 0x40a   : > { %v2088_v18 = vpop.f32.mrf.mxu1 }
 0x40b   : > { %v6198_v9 = vadd.f32 %v2088_v18, %v1976_v30  ;;  %v1928_v44 = vpop.f32.mrf.mxu3 }
 0x40d   : > { %v2176_v33 = vmax.f32 %v6198_v9, 0.0  ;;  %2135 = vmatmul.f32.gmra.mxu1 %v1911_v16  ;;  %v1813_v16 = vadd.f32 %v1812_v42, %v1700_v55  ;;  %v8040_v42 = vld [vmem:[#allocation9_spill] sm:$0xff] }
 0x40f   : > { %3722 = vmatmul.msk.f32.gmra.mxu2 %vm2204_vm0, %v2176_v33  ;;  %v8038_v33 = vld [vmem:[#allocation53_spill] sm:$0xff]  ;;  %v1926_v23 = vadd.f32 %v1925_v52, %v1813_v16  ;;  %v1818_v43 = vpop.f32.mrf.mxu2 }
 0x410   : > { %v1590_v50 = vadd.f32 %v8038_v33, %v6011_v47 }
 0x412   : > { %v2091_v5 = vpop.f32.mrf.mxu1  ;;  %v1703_v0 = vadd.f32 %v6120_v19, %v1590_v50 }
 0x413   : > { %v6207_v49 = vadd.f32 %v2091_v5, %v1979_v20  ;;  %v2005_v20 = vpop.f32.mrf.mxu0 }
 0x414   : > { %v1816_v53 = vadd.f32 %v1815_v63, %v1703_v0  ;;  %v8041_v63 = vld [vmem:[#allocation58_spill] sm:$0xff]  ;;  %v2006_v17 = vadd.f32 %v2005_v20, %v6150_v26 }
 0x415   : > { %v2177_v31 = vmax.f32 %v6207_v49, 0.0  ;;  %2138 = vmatmul.f32.gmra.mxu1 %v1914_v7 }
 0x417   : > { %3723 = vmatmul.msk.f32.gmra.mxu2 %vm2204_vm0, %v2177_v31  ;;  %v1931_v31 = vpop.f32.mrf.mxu3  ;;  %v1821_v8 = vpop.f32.mrf.mxu2 }
 0x41a   : > { %v2094_v39 = vpop.f32.mrf.mxu1 }
 0x41b   : > { %v6218_v21 = vadd.f32 %v2094_v39, %v1982_v29  ;;  %v1593_v29 = vadd.f32 %v8039_v62, %v6011_v47  ;;  %v1929_v39 = vadd.f32 %v1928_v44, %v1816_v53  ;;  %v8043_v53 = vld [vmem:[#allocation56_spill] sm:$0xff] }
 0x41d   : > { %v2178_v14 = vmax.f32 %v6218_v21, 0.0  ;;  %2141 = vmatmul.f32.gmra.mxu1 %v1917_v56  ;;  %v2008_v56 = vpop.f32.mrf.mxu0  ;;  %v1706_v19 = vadd.f32 %v6125_v45, %v1593_v29 }
 0x41f   : > { %3724 = vmatmul.msk.f32.gmra.mxu2 %vm2204_vm0, %v2178_v14  ;;  %v1819_v14 = vadd.f32 %v1818_v43, %v1706_v19  ;;  %v1824_v15 = vpop.f32.mrf.mxu2 }
 0x422   : > { %v2097_v10 = vpop.f32.mrf.mxu1 }
 0x423   : > { %v6229_v12 = vadd.f32 %v2097_v10, %v1985_v46  ;;  %v1596_v46 = vadd.f32 %v8040_v42, %v6011_v47  ;;  %v1932_v10 = vadd.f32 %v1931_v31, %v1819_v14 }
 0x425   : > { %v2179_v24 = vmax.f32 %v6229_v12, 0.0  ;;  %2144 = vmatmul.f32.gmra.mxu1 %v1920_v27  ;;  %v1934_v27 = vpop.f32.mrf.mxu3  ;;  %v1709_v45 = vadd.f32 %v6130_v59, %v1596_v46 }
 0x427   : > { %3725 = vmatmul.msk.f32.gmra.mxu2 %vm2204_vm0, %v2179_v24  ;;  %v2011_v24 = vpop.f32.mrf.mxu0  ;;  %v1822_v52 = vadd.f32 %v1821_v8, %v1709_v45  ;;  %v1827_v16 = vpop.f32.mrf.mxu2 }
 0x429   : > { %v1935_v25 = vadd.f32 %v1934_v27, %v1822_v52 }
 0x42a   : > { %v2100_v35 = vpop.f32.mrf.mxu1 }
 0x42b   : > { %v6240_v30 = vadd.f32 %v2100_v35, %v1988_v32  ;;  %v1599_v35 = vadd.f32 %v8041_v63, %v6011_v47 }
 0x42d   : > { %v2180_v18 = vmax.f32 %v6240_v30, 0.0  ;;  %2147 = vmatmul.f32.gmra.mxu1 %v1923_v48  ;;  %v1712_v59 = vadd.f32 %v6135_v51, %v1599_v35  ;;  %v1937_v55 = vpop.f32.mrf.mxu3 }
 0x42f   : > { %3726 = vmatmul.msk.f32.gmra.mxu2 %vm2204_vm0, %v2180_v18  ;;  %v1825_v18 = vadd.f32 %v1824_v15, %v1712_v59  ;;  %v2014_v4 = vpop.f32.mrf.mxu0  ;;  %v1830_v29 = vpop.f32.mrf.mxu2 }
 0x430   : > { %v2015_v45 = vadd.f32 %v2014_v4, %v6150_v26 }
 0x431   : > { %v1938_v33 = vadd.f32 %v1937_v55, %v1825_v18 }
 0x432   : > { %v2103_v60 = vpop.f32.mrf.mxu1 }
 0x433   : > { %v6249_v5 = vadd.f32 %v2103_v60, %v1991_v1  ;;  %v8042_v1 = vld [vmem:[#allocation7_spill] sm:$0xff] }
 0x434   : > { %v1602_v60 = vadd.f32 %v8042_v1, %v6011_v47 }
 0x435   : > { %v2181_v7 = vmax.f32 %v6249_v5, 0.0  ;;  %2150 = vmatmul.f32.gmra.mxu1 %v1926_v23  ;;  %v1940_v0 = vpop.f32.mrf.mxu3 }
 0x436   : > { %v1715_v51 = vadd.f32 %v6140_v40, %v1602_v60 }
 0x437   : > { %3727 = vmatmul.msk.f32.gmra.mxu2 %vm2204_vm0, %v2181_v7  ;;  %v2017_v31 = vpop.f32.mrf.mxu0 }
 0x438   : > { %v1828_v43 = vadd.f32 %v1827_v16, %v1715_v51 }
 0x43a   : > { %v2106_v34 = vpop.f32.mrf.mxu1 }
 0x43b   : > { %v6258_v41 = vadd.f32 %v2106_v34, %v1994_v22  ;;  %v1605_v22 = vadd.f32 %v8043_v53, %v6011_v47  ;;  %v1941_v34 = vadd.f32 %v1940_v0, %v1828_v43 }
 0x43d   : > { %v2182_v38 = vmax.f32 %v6258_v41, 0.0  ;;  %2153 = vmatmul.f32.gmra.mxu1 %v1929_v39  ;;  %v1718_v40 = vadd.f32 %v6145_v61, %v1605_v22  ;;  %v1943_v20 = vpop.f32.mrf.mxu3  ;;  %v2012_v61 = vadd.f32 %v2011_v24, %v6150_v26 }
 0x43f   : > { %3728 = vmatmul.msk.f32.gmra.mxu2 %vm2204_vm0, %v2182_v38  ;;  %v1831_v19 = vadd.f32 %v1830_v29, %v1718_v40  ;;  %v2009_v38 = vadd.f32 %v2008_v56, %v6150_v26  ;;  %v2020_v47 = vpop.f32.mrf.mxu0  ;;  %v6308_v56 = vld [vmem:[#allocation2 + $0xa03] ss:$0 sm:$0xff] }
 0x440   : > { %v2021_v18 = vadd.f32 %v2020_v47, %v6150_v26 }
 0x441   : > { %v1944_v14 = vadd.f32 %v1943_v20, %v1831_v19 }
 0x442   : > { %v2109_v57 = vpop.f32.mrf.mxu1 }
 0x443   : > { %v6267_v11 = vadd.f32 %v2109_v57, %v1997_v3 }
 0x445   : > { %v2183_v2 = vmax.f32 %v6267_v11, 0.0  ;;  %2156 = vmatmul.f32.gmra.mxu1 %v1932_v10 }
 0x447   : > { %3729 = vmatmul.msk.f32.gmra.mxu2 %vm2204_vm0, %v2183_v2  ;;  %v2023_v27 = vpop.f32.mrf.mxu0 }
 0x44a   : > { %v2112_v32 = vpop.f32.mrf.mxu1 }
 0x44b   : > { %v6276_v6 = vadd.f32 %v2112_v32, %v2000_v37  ;;  %v2018_v32 = vadd.f32 %v2017_v31, %v6150_v26 }
 0x44d   : > { %v2184_v48 = vmax.f32 %v6276_v6, 0.0  ;;  %2159 = vmatmul.f32.gmra.mxu1 %v1935_v25 }
 0x44f   : > { %3730 = vmatmul.msk.f32.gmra.mxu2 %vm2204_vm0, %v2184_v48  ;;  %v2026_v63 = vpop.f32.mrf.mxu0 }
 0x450   : > { %v2027_v53 = vadd.f32 %v2026_v63, %v6150_v26 }
 0x452   : > { %v2115_v44 = vpop.f32.mrf.mxu1 }
 0x453   : > { %v6285_v50 = vadd.f32 %v2115_v44, %v2003_v58 }
 0x455   : > { %v2185_v23 = vmax.f32 %v6285_v50, 0.0  ;;  %2162 = vmatmul.f32.gmra.mxu1 %v1938_v33  ;;  %v2024_v33 = vadd.f32 %v2023_v27, %v6150_v26 }
 0x457   : > { %3731 = vmatmul.msk.f32.gmra.mxu2 %vm2204_vm0, %v2185_v23  ;;  %v2029_v16 = vpop.f32.mrf.mxu0 }
 0x458   : > { %v2030_v19 = vadd.f32 %v2029_v16, %v6150_v26 }
 0x45a   : > { %v2118_v7 = vpop.f32.mrf.mxu1 }
 0x45b   : > { %v6293_v62 = vadd.f32 %v2118_v7, %v2006_v17 }
 0x45d   : > { %v2186_v39 = vmax.f32 %v6293_v62, 0.0  ;;  %2165 = vmatmul.f32.gmra.mxu1 %v1941_v34 }
 0x45f   : > { %3732 = vmatmul.msk.f32.gmra.mxu2 %vm2204_vm0, %v2186_v39  ;;  %v2032_v17 = vpop.f32.mrf.mxu0 }
 0x462   : > { %v2121_v8 = vpop.f32.mrf.mxu1 }
 0x463   : > { %v6299_v3 = vadd.f32 %v2121_v8, %v2009_v38 }
 0x465   : > { %v2187_v57 = vmax.f32 %v6299_v3, 0.0  ;;  %2168 = vmatmul.f32.gmra.mxu1 %v1944_v14 }
 0x467   : > { %3733 = vmatmul.msk.f32.gmra.mxu2 %vm2204_vm0, %v2187_v57  ;;  %v2035_v39 = vpop.f32.mrf.mxu0  ;;  %v2033_v57 = vadd.f32 %v2032_v17, %v6150_v26 }
 0x46a   : > { %v2124_v42 = vpop.f32.mrf.mxu1 }
 0x46b   : > { %v6304_v46 = vadd.f32 %v2124_v42, %v2012_v61 }
 0x46d   : > { %v2188_v10 = vmax.f32 %v6304_v46, 0.0 }
 0x46f   : > { %3734 = vmatmul.msk.f32.gmra.mxu2 %vm2204_vm0, %v2188_v10  ;;  %v2038_v61 = vpop.f32.mrf.mxu0 }
 0x472   : > { %v2127_v2 = vpop.f32.mrf.mxu1  ;;  %v2318_v52 = vpop.f32.mrf.mxu2 }
 0x473   : > { %v6311_v15 = vadd.f32 %v2127_v2, %v2015_v45  ;;  %v6314_v37 = vadd.f32 %v2318_v52, %v6308_v56  ;;  %v2036_v52 = vadd.f32 %v2035_v39, %v6150_v26 }
 0x475   : > { %v2189_v24 = vmax.f32 %v6311_v15, 0.0  ;;  %3750 = vmatmul.msk.f32.vlgmr.msra.gmra.mxu3 %vm2414_vm1, %v6314_v37 }
 0x477   : > { %3735 = vmatmul.msk.f32.gmra.mxu2 %vm2204_vm0, %v2189_v24  ;;  %v2041_v63 = vpop.f32.mrf.mxu0 }
 0x47a   : > { %v2130_v35 = vpop.f32.mrf.mxu1  ;;  %v2321_v25 = vpop.f32.mrf.mxu2 }
 0x47b   : > { %v6321_v59 = vadd.f32 %v2130_v35, %v2018_v32  ;;  %v6324_v48 = vadd.f32 %v2321_v25, %v6308_v56 }
 0x47d   : > { %v2190_v55 = vmax.f32 %v6321_v59, 0.0  ;;  %3751 = vmatmul.msk.f32.gmra.mxu3 %vm2414_vm1, %v6324_v48 }
 0x47f   : > { %3736 = vmatmul.msk.f32.gmra.mxu2 %vm2204_vm0, %v2190_v55 }
 0x482   : > { %v2133_v58 = vpop.f32.mrf.mxu1  ;;  %v2324_v4 = vpop.f32.mrf.mxu2 }
 0x483   : > { %v6331_v44 = vadd.f32 %v2133_v58, %v2021_v18  ;;  %v6334_v1 = vadd.f32 %v2324_v4, %v6308_v56  ;;  %v2039_v18 = vadd.f32 %v2038_v61, %v6150_v26 }
 0x485   : > { %v2191_v60 = vmax.f32 %v6331_v44, 0.0  ;;  %3752 = vmatmul.msk.f32.gmra.mxu3 %vm2414_vm1, %v6334_v1 }
 0x487   : > { %3737 = vmatmul.msk.f32.gmra.mxu2 %vm2204_vm0, %v2191_v60 }
 0x48a   : > { %v2136_v51 = vpop.f32.mrf.mxu1  ;;  %v2327_v23 = vpop.f32.mrf.mxu2 }
 0x48b   : > { %v6341_v43 = vadd.f32 %v2136_v51, %v2024_v33  ;;  %v6344_v0 = vadd.f32 %v2327_v23, %v6308_v56  ;;  %v2044_v33 = vpop.f32.mrf.mxu0  ;;  %v2042_v23 = vadd.f32 %v2041_v63, %v6150_v26 }
 0x48c   : > { %v2045_v39 = vadd.f32 %v2044_v33, %v6150_v26 }
 0x48d   : > { %v2192_v7 = vmax.f32 %v6341_v43, 0.0  ;;  %3753 = vmatmul.msk.f32.gmra.mxu3 %vm2414_vm1, %v6344_v0 }
 0x48f   : > { %3738 = vmatmul.msk.f32.gmra.mxu2 %vm2204_vm0, %v2192_v7 }
 0x492   : > { %v2139_v22 = vpop.f32.mrf.mxu1  ;;  %v2330_v31 = vpop.f32.mrf.mxu2 }
 0x493   : > { %v6351_v34 = vadd.f32 %v2139_v22, %v2027_v53  ;;  %v6354_v29 = vadd.f32 %v2330_v31, %v6308_v56 }
 0x495   : > { %v2193_v40 = vmax.f32 %v6351_v34, 0.0  ;;  %3754 = vmatmul.msk.f32.gmra.mxu3 %vm2414_vm1, %v6354_v29 }
 0x497   : > { %3739 = vmatmul.msk.f32.gmra.mxu2 %vm2204_vm0, %v2193_v40  ;;  %v2047_v40 = vpop.f32.mrf.mxu0 }
 0x498   : > { %v2048_v61 = vadd.f32 %v2047_v40, %v6150_v26 }
 0x49a   : > { %v2142_v38 = vpop.f32.mrf.mxu1  ;;  %v2333_v20 = vpop.f32.mrf.mxu2 }
 0x49b   : > { %v6361_v8 = vadd.f32 %v2142_v38, %v2030_v19  ;;  %v6364_v14 = vadd.f32 %v2333_v20, %v6308_v56 }
 0x49d   : > { %v2194_v47 = vmax.f32 %v6361_v8, 0.0  ;;  %3755 = vmatmul.msk.f32.gmra.mxu3 %vm2414_vm1, %v6364_v14 }
 0x49f   : > { %3740 = vmatmul.msk.f32.gmra.mxu2 %vm2204_vm0, %v2194_v47 }
 0x4a2   : > { %v2145_v42 = vpop.f32.mrf.mxu1  ;;  %v2336_v10 = vpop.f32.mrf.mxu2 }
 0x4a3   : > { %v6371_v27 = vadd.f32 %v2145_v42, %v2033_v57  ;;  %v6374_v45 = vadd.f32 %v2336_v10, %v6308_v56  ;;  %v2050_v42 = vpop.f32.mrf.mxu0 }
 0x4a4   : > { %v2051_v63 = vadd.f32 %v2050_v42, %v6150_v26 }
 0x4a5   : > { %v2195_v2 = vmax.f32 %v6371_v27, 0.0  ;;  %3756 = vmatmul.msk.f32.gmra.mxu3 %vm2414_vm1, %v6374_v45 }
 0x4a7   : > { %3741 = vmatmul.msk.f32.gmra.mxu2 %vm2204_vm0, %v2195_v2 }
 0x4aa   : > { %v2148_v24 = vpop.f32.mrf.mxu1  ;;  %v2339_v32 = vpop.f32.mrf.mxu2 }
 0x4ab   : > { %v6381_v35 = vadd.f32 %v2148_v24, %v2036_v52  ;;  %v6384_v25 = vadd.f32 %v2339_v32, %v6308_v56  ;;  %v2053_v33 = vpop.f32.mrf.mxu0 }
 0x4ad   : > { %v2196_v55 = vmax.f32 %v6381_v35, 0.0  ;;  %3757 = vmatmul.msk.f32.gmra.mxu3 %vm2414_vm1, %v6384_v25 }
 0x4af   : > { %3742 = vmatmul.msk.f32.gmra.mxu2 %vm2204_vm0, %v2196_v55 }
 0x4b2   : > { %v2151_v58 = vpop.f32.mrf.mxu1  ;;  %v2342_v4 = vpop.f32.mrf.mxu2 }
 0x4b3   : > { %v6391_v16 = vadd.f32 %v2151_v58, %v2039_v18  ;;  %v6394_v60 = vadd.f32 %v2342_v4, %v6308_v56 }
 0x4b5   : > { %v2197_v51 = vmax.f32 %v6391_v16, 0.0  ;;  %3758 = vmatmul.msk.f32.gmra.mxu3 %vm2414_vm1, %v6394_v60 }
 0x4b7   : > { %3743 = vmatmul.msk.f32.gmra.mxu2 %vm2204_vm0, %v2197_v51 }
 0x4ba   : > { %v2154_v17 = vpop.f32.mrf.mxu1  ;;  %v2345_v7 = vpop.f32.mrf.mxu2 }
 0x4bb   : > { %v6401_v53 = vadd.f32 %v2154_v17, %v2042_v23  ;;  %v6404_v22 = vadd.f32 %v2345_v7, %v6308_v56  ;;  %v2054_v23 = vadd.f32 %v2053_v33, %v6150_v26 }
 0x4bd   : > { %v2198_v31 = vmax.f32 %v6401_v53, 0.0  ;;  %3759 = vmatmul.msk.f32.gmra.mxu3 %vm2414_vm1, %v6404_v22 }
 0x4bf   : > { %3744 = vmatmul.msk.f32.gmra.mxu2 %vm2204_vm0, %v2198_v31 }
 0x4c2   : > { %v2157_v19 = vpop.f32.mrf.mxu1  ;;  %v2348_v38 = vpop.f32.mrf.mxu2 }
 0x4c3   : > { %v6411_v20 = vadd.f32 %v2157_v19, %v2045_v39  ;;  %v6414_v47 = vadd.f32 %v2348_v38, %v6308_v56  ;;  %v2056_v19 = vpop.f32.mrf.mxu0 }
 0x4c4   : > { %v2057_v38 = vadd.f32 %v2056_v19, %v6150_v26 }
 0x4c5   : > { %8044 = vst [vmem:[#allocation57_spill] sm:$0xff] %v6411_v20  ;;  %v2199_v57 = vmax.f32 %v6411_v20, 0.0  ;;  %3760 = vmatmul.msk.f32.gmra.mxu3 %vm2414_vm1, %v6414_v47 }
 0x4c7   : > { %3745 = vmatmul.msk.f32.gmra.mxu2 %vm2204_vm0, %v2199_v57 }
 0x4ca   : > { %v2160_v10 = vpop.f32.mrf.mxu1  ;;  %v2351_v2 = vpop.f32.mrf.mxu2 }
 0x4cb   : > { %v6421_v52 = vadd.f32 %v2160_v10, %v2048_v61  ;;  %v6424_v24 = vadd.f32 %v2351_v2, %v6308_v56 }
 0x4cd   : > { %v2200_v32 = vmax.f32 %v6421_v52, 0.0  ;;  %3761 = vmatmul.msk.f32.gmra.mxu3 %vm2414_vm1, %v6424_v24 }
 0x4cf   : > { %3746 = vmatmul.msk.f32.gmra.mxu2 %vm2204_vm0, %v2200_v32 }
 0x4d2   : > { %v2163_v55 = vpop.f32.mrf.mxu1  ;;  %v2354_v18 = vpop.f32.mrf.mxu2 }
 0x4d3   : > { %v6431_v58 = vadd.f32 %v2163_v55, %v2051_v63  ;;  %v6434_v4 = vadd.f32 %v2354_v18, %v6308_v56 }
 0x4d5   : > { %8045 = vst [vmem:[#allocation12_spill] sm:$0xff] %v6431_v58  ;;  %v2201_v51 = vmax.f32 %v6431_v58, 0.0  ;;  %3762 = vmatmul.msk.f32.gmra.mxu3 %vm2414_vm1, %v6434_v4 }
 0x4d7   : > { %3747 = vmatmul.msk.f32.gmra.mxu2 %vm2204_vm0, %v2201_v51 }
 0x4da   : > { %v2166_v17 = vpop.f32.mrf.mxu1  ;;  %v2357_v7 = vpop.f32.mrf.mxu2 }
 0x4db   : > { %v6441_v31 = vadd.f32 %v2166_v17, %v2054_v23  ;;  %v6444_v40 = vadd.f32 %v2357_v7, %v6308_v56 }
 0x4dd   : > { %8046 = vst [vmem:[#allocation62_spill] sm:$0xff] %v6441_v31  ;;  %v2202_v39 = vmax.f32 %v6441_v31, 0.0  ;;  %3763 = vmatmul.msk.f32.gmra.mxu3 %vm2414_vm1, %v6444_v40 }
 0x4df   : > { %3748 = vmatmul.msk.f32.gmra.mxu2 %vm2204_vm0, %v2202_v39 }
 0x4e2   : > { %v2169_v57 = vpop.f32.mrf.mxu1  ;;  %v2360_v61 = vpop.f32.mrf.mxu2 }
 0x4e3   : > { %v6451_v42 = vadd.f32 %v2169_v57, %v2057_v38  ;;  %v6454_v10 = vadd.f32 %v2360_v61, %v6308_v56 }
 0x4e5   : > { %8047 = vst [vmem:[#allocation10_spill] sm:$0xff] %v6451_v42  ;;  %v2203_v2 = vmax.f32 %v6451_v42, 0.0  ;;  %3764 = vmatmul.msk.f32.gmra.mxu3 %vm2414_vm1, %v6454_v10 }
 0x4e7   : > { %3749 = vmatmul.msk.f32.gmra.mxu2 %vm2204_vm0, %v2203_v2 }
 0x4ea   : > { %v2363_v32 = vpop.f32.mrf.mxu2 }
 0x4eb   : > { %v6461_v63 = vadd.f32 %v2363_v32, %v6308_v56 }
 0x4ed   : > { %3765 = vmatmul.msk.f32.gmra.mxu3 %vm2414_vm1, %v6461_v63 }
 0x4f2   : > { %v2366_v26 = vpop.f32.mrf.mxu2 }
 0x4f3   : > { %v6466_v55 = vadd.f32 %v2366_v26, %v6308_v56 }
 0x4f5   : > { %3766 = vmatmul.msk.f32.gmra.mxu3 %vm2414_vm1, %v6466_v55 }
 0x4f8   : > { %v2528_v18 = vpop.f32.mrf.mxu3 }
 0x4f9   : > { %2656 = vrot.lane.b32.xlu0 %v2528_v18, %s4062_s23 }
 0x4fa   : > { %v2369_v33 = vpop.f32.mrf.mxu2 }
 0x4fb   : > { %v6472_v51 = vadd.f32 %v2369_v33, %v6308_v56 }
 0x4fd   : > { %8048 = vst [vmem:[#allocation60_spill] sm:$0xff] %v6472_v51  ;;  %3767 = vmatmul.msk.f32.gmra.mxu3 %vm2414_vm1, %v6472_v51 }
 0x500   : > { %v2531_v23 = vpop.f32.mrf.mxu3 }
 0x501   : > { %2658 = vrot.lane.b32.xlu0 %v2531_v23, %s4062_s23 }
 0x502   : > { %v2372_v17 = vpop.f32.mrf.mxu2 }
 0x503   : > { %v6478_v7 = vadd.f32 %v2372_v17, %v6308_v56 }
 0x505   : > { %3768 = vmatmul.msk.f32.gmra.mxu3 %vm2414_vm1, %v6478_v7 }
 0x508   : > { %v2534_v39 = vpop.f32.mrf.mxu3 }
 0x509   : > { %2660 = vrot.lane.b32.xlu1 %v2534_v39, %s4062_s23 }
 0x50a   : > { %v2375_v19 = vpop.f32.mrf.mxu2 }
 0x50b   : > { %v6484_v38 = vadd.f32 %v2375_v19, %v6308_v56 }
 0x50d   : > { %8049 = vst [vmem:[#allocation61_spill] sm:$0xff] %v6484_v38  ;;  %3769 = vmatmul.msk.f32.gmra.mxu3 %vm2414_vm1, %v6484_v38 }
 0x510   : > { %v2537_v57 = vpop.f32.mrf.mxu3 }
 0x511   : > { %2662 = vrot.lane.b32.xlu1 %v2537_v57, %s4062_s23 }
 0x512   : > { %v2378_v61 = vpop.f32.mrf.mxu2 }
 0x513   : > { %v6490_v2 = vadd.f32 %v2378_v61, %v6308_v56 }
 0x515   : > { %8050 = vst [vmem:[#allocation15_spill] sm:$0xff] %v6490_v2  ;;  %3770 = vmatmul.msk.f32.gmra.mxu3 %vm2414_vm1, %v6490_v2 }
 0x518   : > { %v2540_v32 = vpop.f32.mrf.mxu3 }
 0x519   : > { %2664 = vrot.lane.b32.xlu2 %v2540_v32, %s4062_s23 }
 0x51a   : > { %v2381_v26 = vpop.f32.mrf.mxu2 }
 0x51b   : > { %v6496_v18 = vadd.f32 %v2381_v26, %v6308_v56 }
 0x51d   : > { %3771 = vmatmul.msk.f32.gmra.mxu3 %vm2414_vm1, %v6496_v18 }
 0x520   : > { %v2543_v33 = vpop.f32.mrf.mxu3 }
 0x521   : > { %2666 = vrot.lane.b32.xlu2 %v2543_v33, %s4062_s23 }
 0x522   : > { %v2384_v23 = vpop.f32.mrf.mxu2 }
 0x523   : > { %v6502_v17 = vadd.f32 %v2384_v23, %v6308_v56 }
 0x525   : > { %8051 = vst [vmem:[#allocation65_spill] sm:$0xff] %v6502_v17  ;;  %3772 = vmatmul.msk.f32.gmra.mxu3 %vm2414_vm1, %v6502_v17 }
 0x528   : > { %v2546_v39 = vpop.f32.mrf.mxu3 }
 0x529   : > { %2668 = vrot.lane.b32.xlu1 %v2546_v39, %s4062_s23 }
 0x52a   : > { %v2387_v19 = vpop.f32.mrf.mxu2 }
 0x52b   : > { %v6508_v57 = vadd.f32 %v2387_v19, %v6308_v56 }
 0x52d   : > { %8052 = vst [vmem:[#allocation13_spill] sm:$0xff] %v6508_v57  ;;  %3773 = vmatmul.msk.f32.gmra.mxu3 %vm2414_vm1, %v6508_v57 }
 0x530   : > { %v2549_v19 = vpop.f32.mrf.mxu3 }
 0x532   : > { %v2390_v61 = vpop.f32.mrf.mxu2 }
 0x533   : > { %v6513_v32 = vadd.f32 %v2390_v61, %v6308_v56 }
 0x535   : > { %3774 = vmatmul.msk.f32.gmra.mxu3 %vm2414_vm1, %v6513_v32 }
 0x53a   : > { %v2393_v26 = vpop.f32.mrf.mxu2 }
 0x53b   : > { %v6518_v33 = vadd.f32 %v2393_v26, %v6308_v56  ;;  %v2552_v26 = vpop.f32.mrf.mxu3 }
 0x53d   : > { %8053 = vst [vmem:[#allocation63_spill] sm:$0xff] %v6518_v33  ;;  %3775 = vmatmul.msk.f32.gmra.mxu3 %vm2414_vm1, %v6518_v33 }
 0x542   : > { %v2396_v23 = vpop.f32.mrf.mxu2 }
 0x543   : > { %v6523_v39 = vadd.f32 %v2396_v23, %v6308_v56 }
 0x545   : > { %8054 = vst [vmem:[#allocation64_spill] sm:$0xff] %v6523_v39  ;;  %3776 = vmatmul.msk.f32.gmra.mxu3 %vm2414_vm1, %v6523_v39  ;;  %v2555_v39 = vpop.f32.mrf.mxu3 }
 0x54a   : > { %v2399_v61 = vpop.f32.mrf.mxu2 }
 0x54b   : > { %v6528_v57 = vadd.f32 %v2399_v61, %v6308_v56 }
 0x54d   : > { %8055 = vst [vmem:[#allocation18_spill] sm:$0xff] %v6528_v57  ;;  %3777 = vmatmul.msk.f32.gmra.mxu3 %vm2414_vm1, %v6528_v57 }
 0x552   : > { %v2402_v31 = vpop.f32.mrf.mxu2 }
 0x553   : > { %v6533_v2 = vadd.f32 %v2402_v31, %v6308_v56  ;;  %v2558_v31 = vpop.f32.mrf.mxu3 }
 0x555   : > { %8056 = vst [vmem:[#allocation68_spill] sm:$0xff] %v6533_v2  ;;  %3778 = vmatmul.msk.f32.gmra.mxu3 %vm2414_vm1, %v6533_v2 }
 0x55a   : > { %v2405_v23 = vpop.f32.mrf.mxu2 }
 0x55b   : > { %v6538_v33 = vadd.f32 %v2405_v23, %v6308_v56 }
 0x55d   : > { %8057 = vst [vmem:[#allocation16_spill] sm:$0xff] %v6538_v33  ;;  %3779 = vmatmul.msk.f32.gmra.mxu3 %vm2414_vm1, %v6538_v33  ;;  %v2561_v33 = vpop.f32.mrf.mxu3 }
 0x562   : > { %v2408_v61 = vpop.f32.mrf.mxu2 }
 0x563   : > { %v6543_v17 = vadd.f32 %v2408_v61, %v6308_v56 }
 0x565   : > { %8058 = vst [vmem:[#allocation66_spill] sm:$0xff] %v6543_v17  ;;  %3780 = vmatmul.msk.f32.gmra.mxu3 %vm2414_vm1, %v6543_v17 }
 0x56a   : > { %v2411_v57 = vpop.f32.mrf.mxu2 }
 0x56b   : > { %v6548_v42 = vadd.f32 %v2411_v57, %v6308_v56  ;;  %v2657_v2 = vpop.permute.xlu0 %2656  ;;  %v2564_v57 = vpop.f32.mrf.mxu3 }
 0x56c   : > { %v2752_v23 = vadd.f32 %v2657_v2, %v6156_v54 }
 0x56d   : > { %8059 = vst [vmem:[#allocation67_spill] sm:$0xff] %v6548_v42  ;;  %3781 = vmatmul.msk.f32.gmra.mxu3 %vm2414_vm1, %v6548_v42 }
 0x56e   : > { %v2784_v58 = vmax.f32 %v2752_v23, 0.0 }
 0x570   : > { %2848 = vrot.lane.b32.xlu0 %v2784_v58, %s4062_s23 }
 0x573   : > { %v2659_v61 = vpop.permute.xlu0 %2658  ;;  %v2665_v54 = vpop.permute.xlu2 %2664 }
 0x574   : > { %v2753_v51 = vadd.f32 %v2659_v61, %v6165_v13  ;;  %v2756_v58 = vadd.f32 %v2665_v54, %v6198_v9  ;;  %v2567_v42 = vpop.f32.mrf.mxu3 }
 0x576   : > { %v2785_v20 = vmax.f32 %v2753_v51, 0.0  ;;  %v2788_v51 = vmax.f32 %v2756_v58, 0.0  ;;  %v439_v58 = vld [vmem:[#allocation2 + $0x870] sm:$0xff] }
 0x578   : > { %2850 = vrot.lane.b32.xlu2 %v2785_v20, %s4062_s23  ;;  %2670 = vrot.lane.b32.xlu0 %v2549_v19, %s4062_s23 }
 0x57b   : > { %v2661_v17 = vpop.permute.xlu1 %2660  ;;  %v2667_v61 = vpop.permute.xlu2 %2666 }
 0x57c   : > { %v2754_v38 = vadd.f32 %v2661_v17, %v6176_v28  ;;  %v441_v28 = vld [vmem:[#allocation2 + $0x8b0] sm:$0xff]  ;;  %v2570_v17 = vpop.f32.mrf.mxu3 }
 0x57d   : > { %2988 = vmatpush.msra.mxu0 %v441_v28 }
 0x57e   : > { %v2786_v2 = vmax.f32 %v2754_v38, 0.0  ;;  %v2757_v38 = vadd.f32 %v2667_v61, %v6207_v49  ;;  %v440_v49 = vld [vmem:[#allocation2 + $0x890] sm:$0xff] }
 0x57f   : > { %2989 = vmatpush.msra.mxu0 %v440_v49 }
 0x580   : > { %2852 = vrot.lane.b32.xlu1 %v2786_v2, %s4062_s23  ;;  %2672 = vrot.lane.b32.xlu2 %v2552_v26, %s4062_s23  ;;  %v2789_v19 = vmax.f32 %v2757_v38, 0.0 }
 0x581   : > { %2990 = vmatpush.msra.mxu0 %v439_v58 }
 0x583   : > { %v2663_v23 = vpop.permute.xlu1 %2662 }
 0x584   : > { %v2755_v13 = vadd.f32 %v2663_v23, %v6187_v36  ;;  %v2573_v36 = vpop.f32.mrf.mxu3  ;;  %v437_v23 = vld [vmem:[#allocation2 + $0x830] sm:$0xff] }
 0x586   : > { %v2787_v20 = vmax.f32 %v2755_v13, 0.0 }
 0x588   : > { %2854 = vrot.lane.b32.xlu0 %v2787_v20, %s4062_s23  ;;  %2856 = vrot.lane.b32.xlu2 %v2788_v51, %s4062_s23  ;;  %v434_v51 = vld [vmem:[#allocation2 + $0x7d0] sm:$0xff] }
 0x589   : > { %2674 = vrot.lane.b32.xlu1 %v2555_v39, %s4062_s23 }
 0x58c   : > { %v2576_v39 = vpop.f32.mrf.mxu3 }
 0x590   : > { %2676 = vrot.lane.b32.xlu0 %v2558_v31, %s4062_s23  ;;  %2678 = vrot.lane.b32.xlu2 %v2561_v33, %s4062_s23  ;;  %v438_v33 = vld [vmem:[#allocation2 + $0x850] sm:$0xff] }
 0x591   : > { %2858 = vrot.lane.b32.xlu1 %v2789_v19, %s4062_s23  ;;  %2991 = vmatpush.msra.mxu0 %v438_v33 }
 0x593   : > { %2992 = vmatpush.msra.mxu0 %v437_v23 }
 0x594   : > { %v2579_v2 = vpop.f32.mrf.mxu3 }
 0x599   : > { %2680 = vrot.lane.b32.xlu1 %v2564_v57, %s4062_s23  ;;  %v436_v57 = vld [vmem:[#allocation2 + $0x810] sm:$0xff] }
 0x59a   : > { %2993 = vmatpush.msra.mxu0 %v436_v57 }
 0x59b   : > { %v2669_v9 = vpop.permute.xlu1 %2668 }
 0x59c   : > { %v2758_v26 = vadd.f32 %v2669_v9, %v6218_v21  ;;  %v2582_v31 = vpop.f32.mrf.mxu3  ;;  %v435_v21 = vld [vmem:[#allocation2 + $0x7f0] sm:$0xff] }
 0x59d   : > { %2994 = vmatpush.msra.mxu0 %v435_v21 }
 0x59e   : > { %v2790_v54 = vmax.f32 %v2758_v26, 0.0 }
 0x59f   : > { %2995 = vmatpush.msra.mxu0 %v434_v51 }
 0x5a0   : > { %2860 = vrot.lane.b32.xlu0 %v2790_v54, %s4062_s23 }
 0x5a4   : > { %v2585_v13 = vpop.f32.mrf.mxu3 }
 0x5a8   : > { %2682 = vrot.lane.b32.xlu0 %v2567_v42, %s4062_s23 }
 0x5ac   : > { %v2588_v20 = vpop.f32.mrf.mxu3 }
 0x5b4   : > { %v2591_v42 = vpop.f32.mrf.mxu3 }
 0x5bc   : > { %v2594_v9 = vpop.f32.mrf.mxu3 }
 0x5c4   : > { %v2597_v49 = vpop.f32.mrf.mxu3 }
 0x5cc   : > { %v2600_v51 = vpop.f32.mrf.mxu3 }
 0x5d2   : > { %v2851_v61 = vpop.permute.xlu2 %2850 }
 0x5da   : > { %v2673_v28 = vpop.permute.xlu2 %2672 }
 0x5db   : > { %v2760_v38 = vadd.f32 %v2673_v28, %v6240_v30 }
 0x5dd   : > { %v2792_v19 = vmax.f32 %v2760_v38, 0.0 }
 0x5df   : > { %2864 = vrot.lane.b32.xlu1 %v2792_v19, %s4062_s23 }
 0x5e2   : > { %v2849_v26 = vpop.permute.xlu0 %2848  ;;  %v2857_v54 = vpop.permute.xlu2 %2856 }
 0x5e3   : > { %3782 = vmatmul.msk.f32.vlgmr.msra.gmra.mxu0 %vm2204_vm0, %v2849_v26 }
 0x5e7   : > { %2686 = vrot.lane.b32.xlu1 %v2573_v36, %s4062_s23 }
 0x5ea   : > { %v2671_v58 = vpop.permute.xlu0 %2670  ;;  %v2679_v33 = vpop.permute.xlu2 %2678 }
 0x5eb   : > { %v2759_v23 = vadd.f32 %v2671_v58, %v6229_v12  ;;  %v2763_v57 = vadd.f32 %v2679_v33, %v6267_v11  ;;  %3783 = vmatmul.msk.f32.gmra.mxu0 %vm2204_vm0, %v2851_v61  ;;  %v2603_v11 = vpop.f32.mrf.mxu3 }
 0x5ed   : > { %v2791_v30 = vmax.f32 %v2759_v23, 0.0  ;;  %v2795_v21 = vmax.f32 %v2763_v57, 0.0 }
 0x5ef   : > { %2862 = vrot.lane.b32.xlu2 %v2791_v30, %s4062_s23  ;;  %2870 = vrot.lane.b32.xlu1 %v2795_v21, %s4062_s23 }
 0x5f2   : > { %v2853_v28 = vpop.permute.xlu1 %2852 }
 0x5f3   : > { %3784 = vmatmul.msk.f32.gmra.mxu0 %vm2204_vm0, %v2853_v28  ;;  %v2606_v58 = vpop.f32.mrf.mxu3 }
 0x5f7   : > { %2684 = vrot.lane.b32.xlu2 %v2570_v17, %s4062_s23  ;;  %2692 = vrot.lane.b32.xlu1 %v2582_v31, %s4062_s23 }
 0x5fa   : > { %v2855_v36 = vpop.permute.xlu0 %2854 }
 0x5fb   : > { %v2675_v12 = vpop.permute.xlu1 %2674  ;;  %3785 = vmatmul.msk.f32.gmra.mxu0 %vm2204_vm0, %v2855_v36 }
 0x5fc   : > { %v2761_v61 = vadd.f32 %v2675_v12, %v6249_v5 }
 0x5fe   : > { %v2793_v38 = vmax.f32 %v2761_v61, 0.0 }
 0x5ff   : > { %2690 = vrot.lane.b32.xlu2 %v2579_v2, %s4062_s23  ;;  %2698 = vrot.lane.b32.xlu1 %v2591_v42, %s4062_s23  ;;  %v2609_v2 = vpop.f32.mrf.mxu3 }
 0x600   : > { %2866 = vrot.lane.b32.xlu0 %v2793_v38, %s4062_s23 }
 0x602   : > { %v2677_v19 = vpop.permute.xlu0 %2676 }
 0x603   : > { %v2762_v26 = vadd.f32 %v2677_v19, %v6258_v41  ;;  %3786 = vmatmul.msk.f32.gmra.mxu0 %vm2204_vm0, %v2857_v54  ;;  %v2859_v17 = vpop.permute.xlu1 %2858 }
 0x605   : > { %v2794_v31 = vmax.f32 %v2762_v26, 0.0 }
 0x607   : > { %2868 = vrot.lane.b32.xlu2 %v2794_v31, %s4062_s23  ;;  %v2612_v33 = vpop.f32.mrf.mxu3 }
 0x608   : > { %2688 = vrot.lane.b32.xlu0 %v2576_v39, %s4062_s23 }
 0x60b   : > { %3787 = vmatmul.msk.f32.gmra.mxu0 %vm2204_vm0, %v2859_v17  ;;  %v2681_v5 = vpop.permute.xlu1 %2680 }
 0x60c   : > { %v2764_v42 = vadd.f32 %v2681_v5, %v6276_v6 }
 0x60e   : > { %v2796_v54 = vmax.f32 %v2764_v42, 0.0 }
 0x60f   : > { %2696 = vrot.lane.b32.xlu2 %v2588_v20, %s4062_s23 }
 0x610   : > { %2694 = vrot.lane.b32.xlu0 %v2585_v13, %s4062_s23  ;;  %v2615_v13 = vpop.f32.mrf.mxu3 }
 0x612   : > { %v2861_v41 = vpop.permute.xlu0 %2860 }
 0x613   : > { %3788 = vmatmul.msk.f32.gmra.mxu0 %vm2204_vm0, %v2861_v41 }
 0x617   : > { %2702 = vrot.lane.b32.xlu2 %v2597_v49, %s4062_s23 }
 0x618   : > { %2872 = vrot.lane.b32.xlu0 %v2796_v54, %s4062_s23  ;;  %v2618_v6 = vpop.f32.mrf.mxu3 }
 0x61a   : > { %v2683_v39 = vpop.permute.xlu0 %2682 }
 0x61b   : > { %v2765_v23 = vadd.f32 %v2683_v39, %v6285_v50 }
 0x61d   : > { %v2797_v57 = vmax.f32 %v2765_v23, 0.0 }
 0x61f   : > { %2874 = vrot.lane.b32.xlu2 %v2797_v57, %s4062_s23 }
 0x620   : > { %2700 = vrot.lane.b32.xlu0 %v2594_v9, %s4062_s23  ;;  %v2621_v31 = vpop.f32.mrf.mxu3 }
 0x627   : > { %2712 = vrot.lane.b32.xlu2 %v2612_v33, %s4062_s23 }
 0x628   : > { %2706 = vrot.lane.b32.xlu0 %v2603_v11, %s4062_s23 }
 0x62f   : > { %2716 = vrot.lane.b32.xlu2 %v2618_v6, %s4062_s23 }
 0x649   : > { %v2863_v20 = vpop.permute.xlu2 %2862 }
 0x64a   : > { %3789 = vmatmul.msk.f32.gmra.mxu0 %vm2204_vm0, %v2863_v20 }
 0x651   : > { %v2865_v49 = vpop.permute.xlu1 %2864  ;;  %v2685_v30 = vpop.permute.xlu2 %2684 }
 0x652   : > { %v2766_v50 = vadd.f32 %v2685_v30, %v6293_v62  ;;  %3790 = vmatmul.msk.f32.gmra.mxu0 %vm2204_vm0, %v2865_v49  ;;  %v8061_v30 = vld [vmem:[#allocation57_spill] sm:$0xff] }
 0x654   : > { %v2798_v21 = vmax.f32 %v2766_v50, 0.0 }
 0x656   : > { %2876 = vrot.lane.b32.xlu1 %v2798_v21, %s4062_s23 }
 0x659   : > { %v2687_v9 = vpop.permute.xlu1 %2686  ;;  %v2691_v11 = vpop.permute.xlu2 %2690 }
 0x65a   : > { %v2767_v28 = vadd.f32 %v2687_v9, %v6299_v3  ;;  %v2769_v62 = vadd.f32 %v2691_v11, %v6311_v15 }
 0x65c   : > { %v2799_v36 = vmax.f32 %v2767_v28, 0.0  ;;  %v2801_v61 = vmax.f32 %v2769_v62, 0.0 }
 0x65e   : > { %2704 = vrot.lane.b32.xlu1 %v2600_v51, %s4062_s23  ;;  %2878 = vrot.lane.b32.xlu0 %v2799_v36, %s4062_s23  ;;  %v8062_v36 = vld [vmem:[#allocation60_spill] sm:$0xff] }
 0x661   : > { %v2871_v12 = vpop.permute.xlu1 %2870  ;;  %v2869_v51 = vpop.permute.xlu2 %2868 }
 0x666   : > { %2708 = vrot.lane.b32.xlu1 %v2606_v58, %s4062_s23  ;;  %2710 = vrot.lane.b32.xlu0 %v2609_v2, %s4062_s23 }
 0x669   : > { %v2693_v38 = vpop.permute.xlu1 %2692  ;;  %v2697_v5 = vpop.permute.xlu2 %2696 }
 0x66a   : > { %v2770_v3 = vadd.f32 %v2693_v38, %v6321_v59 }
 0x66c   : > { %v2802_v26 = vmax.f32 %v2770_v3, 0.0  ;;  %v8064_v3 = vld [vmem:[#allocation10_spill] sm:$0xff] }
 0x66e   : > { %2882 = vrot.lane.b32.xlu1 %v2801_v61, %s4062_s23  ;;  %2714 = vrot.lane.b32.xlu0 %v2615_v13, %s4062_s23 }
 0x672   : > { %v2867_v19 = vpop.permute.xlu0 %2866 }
 0x673   : > { %3791 = vmatmul.msk.f32.gmra.mxu0 %vm2204_vm0, %v2867_v19 }
 0x676   : > { %2913 = vrot.lane.b32.xlu1 %v6308_v56, %s4063_s24  ;;  %2884 = vrot.lane.b32.xlu0 %v2802_v26, %s4062_s23  ;;  %v2699_v56 = vpop.permute.xlu1 %2698 }
 0x67a   : > { %v2689_v17 = vpop.permute.xlu0 %2688 }
 0x67b   : > { %v2768_v15 = vadd.f32 %v2689_v17, %v6304_v46  ;;  %3792 = vmatmul.msk.f32.gmra.mxu0 %vm2204_vm0, %v2869_v51  ;;  %v2773_v46 = vadd.f32 %v2699_v56, %v6351_v34  ;;  %v8065_v17 = vld [vmem:[#allocation65_spill] sm:$0xff]  ;;  %v8068_v56 = vld [vmem:[#allocation18_spill] sm:$0xff] }
 0x67d   : > { %v2800_v58 = vmax.f32 %v2768_v15, 0.0  ;;  %v2805_v42 = vmax.f32 %v2773_v46, 0.0  ;;  %v8069_v46 = vld [vmem:[#allocation62_spill] sm:$0xff] }
 0x67e   : > { %3450 = vrot.lane.b32.xlu1 %v6334_v1, %s4064_s25  ;;  %2718 = vrot.lane.b32.xlu0 %v2621_v31, %s4062_s23  ;;  %v2703_v1 = vpop.permute.xlu2 %2702 }
 0x67f   : > { %2880 = vrot.lane.b32.xlu2 %v2800_v58, %s4062_s23 }
 0x682   : > { %v2695_v59 = vpop.permute.xlu0 %2694 }
 0x683   : > { %3793 = vmatmul.msk.f32.gmra.mxu0 %vm2204_vm0, %v2871_v12  ;;  %v2771_v34 = vadd.f32 %v2695_v59, %v6331_v44  ;;  %v8067_v59 = vld [vmem:[#allocation63_spill] sm:$0xff] }
 0x685   : > { %v2803_v54 = vmax.f32 %v2771_v34, 0.0 }
 0x686   : > { %3456 = vrot.lane.b32.xlu1 %v6364_v14, %s4064_s25  ;;  %3448 = vrot.lane.b32.xlu0 %v6324_v48, %s4064_s25  ;;  %v2875_v14 = vpop.permute.xlu2 %2874 }
 0x687   : > { %3446 = vrot.lane.b32.xlu2 %v6314_v37, %s4064_s25 }
 0x68a   : > { %v2873_v2 = vpop.permute.xlu0 %2872 }
 0x68b   : > { %3794 = vmatmul.msk.f32.gmra.mxu0 %vm2204_vm0, %v2873_v2 }
 0x68e   : > { %2890 = vrot.lane.b32.xlu1 %v2805_v42, %s4062_s23  ;;  %3452 = vrot.lane.b32.xlu0 %v6344_v0, %s4064_s25  ;;  %v2775_v0 = vadd.f32 %v2703_v1, %v6371_v27 }
 0x68f   : > { %3454 = vrot.lane.b32.xlu2 %v6354_v29, %s4064_s25 }
 0x690   : > { %v2807_v29 = vmax.f32 %v2775_v0, 0.0  ;;  %v8071_v0 = vld [vmem:[#allocation64_spill] sm:$0xff] }
 0x692   : > { %v2701_v48 = vpop.permute.xlu0 %2700 }
 0x693   : > { %v2774_v41 = vadd.f32 %v2701_v48, %v6361_v8  ;;  %3795 = vmatmul.msk.f32.gmra.mxu0 %vm2204_vm0, %v2875_v14  ;;  %v2772_v8 = vadd.f32 %v2697_v5, %v6341_v43  ;;  %v2713_v43 = vpop.permute.xlu2 %2712  ;;  %v8066_v5 = vld [vmem:[#allocation15_spill] sm:$0xff] }
 0x695   : > { %v2806_v37 = vmax.f32 %v2774_v41, 0.0 }
 0x696   : > { %3458 = vrot.lane.b32.xlu0 %v6374_v45, %s4064_s25  ;;  %v2804_v45 = vmax.f32 %v2772_v8, 0.0 }
 0x697   : > { %2892 = vrot.lane.b32.xlu1 %v2806_v37, %s4062_s23  ;;  %3460 = vrot.lane.b32.xlu2 %v6384_v25, %s4064_s25  ;;  %v6674_v25 = vpop.f32.mrf.mxu0  ;;  %v8070_v37 = vld [vmem:[#allocation13_spill] sm:$0xff] }
 0x69a   : > { %v2707_v33 = vpop.permute.xlu0 %2706 }
 0x69b   : > { %v2777_v44 = vadd.f32 %v2707_v33, %v6391_v16  ;;  %v2780_v16 = vadd.f32 %v2713_v43, %v6421_v52 }
 0x69d   : > { %v2809_v27 = vmax.f32 %v2777_v44, 0.0 }
 0x69e   : > { %3464 = vrot.lane.b32.xlu0 %v6404_v22, %s4064_s25 }
 0x69f   : > { %2894 = vrot.lane.b32.xlu1 %v2807_v29, %s4062_s23  ;;  %2886 = vrot.lane.b32.xlu2 %v2803_v54, %s4062_s23 }
 0x6a6   : > { %3470 = vrot.lane.b32.xlu0 %v6434_v4, %s4064_s25 }
 0x6a7   : > { %3462 = vrot.lane.b32.xlu1 %v6394_v60, %s4064_s25  ;;  %2888 = vrot.lane.b32.xlu2 %v2804_v45, %s4062_s23  ;;  %v2812_v60 = vmax.f32 %v2780_v16, 0.0 }
 0x6ae   : > { %2898 = vrot.lane.b32.xlu0 %v2809_v27, %s4062_s23 }
 0x6af   : > { %3468 = vrot.lane.b32.xlu1 %v6424_v24, %s4064_s25  ;;  %3466 = vrot.lane.b32.xlu2 %v6414_v47, %s4064_s25  ;;  %v6678_v24 = vpop.f32.mrf.mxu0 }
 0x6b6   : > { %3476 = vrot.lane.b32.xlu0 %v6461_v63, %s4064_s25 }
 0x6b7   : > { %3472 = vrot.lane.b32.xlu2 %v6444_v40, %s4064_s25  ;;  %v2717_v40 = vpop.permute.xlu2 %2716 }
 0x6b8   : > { %v2782_v1 = vadd.f32 %v2717_v40, %v8069_v46 }
 0x6ba   : > { %v2814_v42 = vmax.f32 %v2782_v1, 0.0 }
 0x6be   : > { %3482 = vrot.lane.b32.xlu0 %v6478_v7, %s4064_s25  ;;  %v6685_v7 = vpop.f32.mrf.mxu0 }
 0x6c6   : > { %2904 = vrot.lane.b32.xlu0 %v2812_v60, %s4062_s23  ;;  %v6692_v6 = vpop.f32.mrf.mxu0 }
 0x6c8   : > { %v2877_v22 = vpop.permute.xlu1 %2876 }
 0x6c9   : > { %3796 = vmatmul.msk.f32.gmra.mxu0 %vm2204_vm0, %v2877_v22 }
 0x6ce   : > { %3488 = vrot.lane.b32.xlu0 %v6496_v18, %s4064_s25 }
 0x6d0   : > { %v2705_v47 = vpop.permute.xlu1 %2704  ;;  %v2879_v4 = vpop.permute.xlu0 %2878 }
 0x6d1   : > { %v2776_v63 = vadd.f32 %v2705_v47, %v6381_v35  ;;  %3797 = vmatmul.msk.f32.gmra.mxu0 %vm2204_vm0, %v2879_v4 }
 0x6d3   : > { %v2808_v52 = vmax.f32 %v2776_v63, 0.0 }
 0x6d5   : > { %2896 = vrot.lane.b32.xlu2 %v2808_v52, %s4062_s23 }
 0x6d6   : > { %3494 = vrot.lane.b32.xlu0 %v6513_v32, %s4064_s25  ;;  %v6704_v32 = vpop.f32.mrf.mxu0 }
 0x6d8   : > { %v2709_v39 = vpop.permute.xlu1 %2708  ;;  %v2711_v23 = vpop.permute.xlu0 %2710 }
 0x6d9   : > { %v2778_v57 = vadd.f32 %v2709_v39, %v6401_v53  ;;  %v2881_v18 = vpop.permute.xlu2 %2880  ;;  %v8060_v53 = vld [vmem:[#allocation61_spill] sm:$0xff]  ;;  %v2779_v50 = vadd.f32 %v2711_v23, %v8061_v30 }
 0x6da   : > { %3798 = vmatmul.msk.f32.gmra.mxu0 %vm2204_vm0, %v2881_v18 }
 0x6db   : > { %v2810_v13 = vmax.f32 %v2778_v57, 0.0  ;;  %v2811_v28 = vmax.f32 %v2779_v50, 0.0 }
 0x6dd   : > { %2900 = vrot.lane.b32.xlu1 %v2810_v13, %s4062_s23  ;;  %3478 = vrot.lane.b32.xlu2 %v6466_v55, %s4064_s25 }
 0x6de   : > { %v3012_v38 = vpop.f32.mrf.mxu0 }
 0x6e0   : > { %v2883_v35 = vpop.permute.xlu1 %2882  ;;  %v2715_v20 = vpop.permute.xlu0 %2714 }
 0x6e1   : > { %v6697_v49 = vpop.permute.xlu2 %3446 }
 0x6e2   : > { %3799 = vmatmul.msk.f32.gmra.mxu0 %vm2204_vm0, %v2883_v35 }
 0x6e5   : > { %3474 = vrot.lane.b32.xlu1 %v6454_v10, %s4064_s25  ;;  %3484 = vrot.lane.b32.xlu2 %v8060_v53, %s4064_s25  ;;  %v8063_v10 = vld [vmem:[#allocation12_spill] sm:$0xff] }
 0x6e6   : > { %v2781_v12 = vadd.f32 %v2715_v20, %v8063_v10  ;;  %v3015_v58 = vpop.f32.mrf.mxu0 }
 0x6e8   : > { %v6707_v21 = vpop.permute.xlu1 %2913  ;;  %v2885_v9 = vpop.permute.xlu0 %2884  ;;  %v2813_v51 = vmax.f32 %v2781_v12, 0.0 }
 0x6e9   : > { %v6709_v55 = vpop.permute.xlu2 %3454  ;;  %v6760_v16 = vadd.f32 %v6678_v24, %v6707_v21  ;;  %v6768_v47 = vadd.f32 %v6674_v25, %v6707_v21  ;;  %v6771_v40 = vadd.f32 %v3012_v38, %v6707_v21  ;;  %v6782_v25 = vadd.f32 %v6685_v7, %v6707_v21 }
 0x6ea   : > { %3800 = vmatmul.msk.f32.gmra.mxu0 %vm2204_vm0, %v2885_v9  ;;  %v6793_v20 = vadd.f32 %v3015_v58, %v6707_v21 }
 0x6eb   : > { %v3097_v22 = vsel %vm3093_vm2, %v6760_v16, -inf  ;;  %v3094_v24 = vsel %vm3093_vm2, %v6768_v47, -inf  ;;  %v3109_v39 = vsel %vm3093_vm2, %v6771_v40, -inf  ;;  %v3100_v18 = vsel %vm3093_vm2, %v6782_v25, -inf }
 0x6ec   : > { %v3112_v9 = vsel %vm3093_vm2, %v6793_v20, -inf }
 0x6ed   : > { %3480 = vrot.lane.b32.xlu1 %v8062_v36, %s4064_s25  ;;  %2902 = vrot.lane.b32.xlu2 %v2811_v28, %s4062_s23 }
 0x6ee   : > { %v6736_v14 = vpop.f32.mrf.mxu0 }
 0x6f0   : > { %v6716_v11 = vpop.permute.xlu1 %3450  ;;  %v2719_v61 = vpop.permute.xlu0 %2718 }
 0x6f1   : > { %v6718_v62 = vpop.permute.xlu2 %3460  ;;  %v2783_v19 = vadd.f32 %v2719_v61, %v8064_v3  ;;  %v8072_v61 = vld [vmem:[#allocation68_spill] sm:$0xff] }
 0x6f3   : > { %v2815_v26 = vmax.f32 %v2783_v19, 0.0 }
 0x6f5   : > { %2906 = vrot.lane.b32.xlu1 %v2813_v51, %s4062_s23  ;;  %3490 = vrot.lane.b32.xlu2 %v8065_v17, %s4064_s25 }
 0x6f6   : > { %2910 = vrot.lane.b32.xlu0 %v2815_v26, %s4062_s23  ;;  %v3021_v34 = vpop.f32.mrf.mxu0 }
 0x6f7   : > { %v6785_v23 = vadd.f32 %v3021_v34, %v6707_v21 }
 0x6f8   : > { %v6726_v31 = vpop.permute.xlu1 %3456  ;;  %v6738_v48 = vpop.permute.xlu0 %3448 }
 0x6f9   : > { %v2887_v15 = vpop.permute.xlu2 %2886  ;;  %v3118_v35 = vsel %vm3093_vm2, %v6785_v23, -inf }
 0x6fa   : > { %3801 = vmatmul.msk.f32.gmra.mxu0 %vm2204_vm0, %v2887_v15 }
 0x6fd   : > { %3486 = vrot.lane.b32.xlu1 %v8066_v5, %s4064_s25  ;;  %3496 = vrot.lane.b32.xlu2 %v8067_v59, %s4064_s25 }
 0x6fe   : > { %3500 = vrot.lane.b32.xlu0 %v8068_v56, %s4064_s25  ;;  %v3024_v8 = vpop.f32.mrf.mxu0 }
 0x6ff   : > { %v6807_v36 = vadd.f32 %v3024_v8, %v6707_v21  ;;  %v6852_v8 = vadd.f32 %v6692_v6, %v6707_v21 }
 0x700   : > { %v2891_v41 = vpop.permute.xlu1 %2890  ;;  %v6746_v29 = vpop.permute.xlu0 %3452 }
 0x701   : > { %v2889_v2 = vpop.permute.xlu2 %2888  ;;  %v3121_v38 = vsel %vm3093_vm2, %v6807_v36, -inf }
 0x702   : > { %3802 = vmatmul.msk.f32.gmra.mxu0 %vm2204_vm0, %v2889_v2 }
 0x705   : > { %3492 = vrot.lane.b32.xlu1 %v8070_v37, %s4064_s25  ;;  %2908 = vrot.lane.b32.xlu2 %v2814_v42, %s4062_s23 }
 0x706   : > { %v6754_v27 = vpop.f32.mrf.mxu0 }
 0x708   : > { %v6749_v45 = vpop.permute.xlu0 %3458 }
 0x709   : > { %v2893_v54 = vpop.permute.xlu1 %2892  ;;  %v6752_v44 = vpop.permute.xlu2 %3466 }
 0x70a   : > { %3803 = vmatmul.msk.f32.gmra.mxu0 %vm2204_vm0, %v2891_v41 }
 0x70d   : > { %3498 = vrot.lane.b32.xlu1 %v8071_v0, %s4064_s25 }
 0x70e   : > { %v3030_v4 = vpop.f32.mrf.mxu0 }
 0x70f   : > { %v6796_v7 = vadd.f32 %v3030_v4, %v6707_v21 }
 0x710   : > { %v6756_v43 = vpop.permute.xlu0 %3464 }
 0x711   : > { %v2895_v33 = vpop.permute.xlu1 %2894  ;;  %v6762_v60 = vpop.permute.xlu2 %3472  ;;  %v3127_v28 = vsel %vm3093_vm2, %v6796_v7, -inf }
 0x712   : > { %3804 = vmatmul.msk.f32.gmra.mxu0 %vm2204_vm0, %v2893_v54 }
 0x716   : > { %v3033_v57 = vpop.f32.mrf.mxu0 }
 0x717   : > { %v6825_v17 = vadd.f32 %v3033_v57, %v6707_v21 }
 0x718   : > { %v6773_v63 = vpop.permute.xlu0 %3470 }
 0x719   : > { %v6798_v53 = vpop.permute.xlu1 %3462  ;;  %v3130_v15 = vsel %vm3093_vm2, %v6825_v17, -inf }
 0x71a   : > { %3805 = vmatmul.msk.f32.gmra.mxu0 %vm2204_vm0, %v2895_v33 }
 0x71e   : > { %v3036_v50 = vpop.f32.mrf.mxu0 }
 0x720   : > { %v2899_v13 = vpop.permute.xlu0 %2898 }
 0x721   : > { %v6815_v3 = vpop.permute.xlu1 %3468 }
 0x728   : > { %3098 = vmax.xlane.f32.xlu0 %v3097_v22  ;;  %v6809_v10 = vpop.permute.xlu0 %3476  ;;  %v3103_v22 = vsel %vm3093_vm2, %v6852_v8, -inf }
 0x72e   : > { %3095 = vmax.xlane.f32.xlu2 %v3094_v24 }
 0x72f   : > { %v2897_v52 = vpop.permute.xlu2 %2896 }
 0x730   : > { %3110 = vmax.xlane.f32.xlu0 %v3109_v39  ;;  %3806 = vmatmul.msk.f32.gmra.mxu0 %vm2204_vm0, %v2897_v52  ;;  %v6829_v59 = vpop.permute.xlu0 %3482  ;;  %v6861_v52 = vadd.f32 %v6704_v32, %v6707_v21  ;;  %v6874_v32 = vadd.f32 %v6754_v27, %v6707_v21 }
 0x732   : > { %v3106_v39 = vsel %vm3093_vm2, %v6861_v52, -inf }
 0x737   : > { %3101 = vmax.xlane.f32.xlu1 %v3100_v18  ;;  %v6800_v30 = vpop.permute.xlu2 %3478  ;;  %v6868_v18 = vadd.f32 %v6736_v14, %v6707_v21 }
 0x738   : > { %3119 = vmax.xlane.f32.xlu0 %v3118_v35  ;;  %3807 = vmatmul.msk.f32.gmra.mxu0 %vm2204_vm0, %v2899_v13  ;;  %v2905_v42 = vpop.permute.xlu0 %2904 }
 0x739   : > { %v3115_v13 = vsel %vm3093_vm2, %v6868_v18, -inf }
 0x73f   : > { %3113 = vmax.xlane.f32.xlu1 %v3112_v9  ;;  %v6817_v19 = vpop.permute.xlu2 %3484  ;;  %v3124_v9 = vsel %vm3093_vm2, %v6874_v32, -inf }
 0x740   : > { %3128 = vmax.xlane.f32.xlu0 %v3127_v28  ;;  %v6845_v0 = vpop.permute.xlu0 %3488  ;;  %v6879_v28 = vadd.f32 %v3036_v50, %v6707_v21 }
 0x741   : > { %8073 = vst [vmem:[#allocation21_spill] sm:$0xff] %v6845_v0 }
 0x742   : > { %v3133_v14 = vsel %vm3093_vm2, %v6879_v28, -inf }
 0x746   : > { %v3039_v12 = vpop.f32.mrf.mxu0  ;;  %3502 = vrot.lane.b32.xlu2 %v8072_v61, %s4064_s25 }
 0x747   : > { %v6820_v51 = vadd.f32 %v3039_v12, %v6707_v21  ;;  %3122 = vmax.xlane.f32.xlu1 %v3121_v38  ;;  %v2903_v56 = vpop.permute.xlu2 %2902 }
 0x748   : > { %v6854_v33 = vpop.permute.xlu0 %3494 }
 0x749   : > { %v3136_v26 = vsel %vm3093_vm2, %v6820_v51, -inf  ;;  %8075 = vst [vmem:[#allocation97_spill] sm:$0xff] %v6854_v33 }
 0x74a   : > { %3137 = vmax.xlane.f32.xlu0 %v3136_v26 }
 0x74e   : > { %v3042_v58 = vpop.f32.mrf.mxu0 }
 0x74f   : > { %v2901_v5 = vpop.permute.xlu1 %2900  ;;  %3131 = vmax.xlane.f32.xlu1 %v3130_v15  ;;  %v6833_v46 = vadd.f32 %v3042_v58, %v6707_v21  ;;  %v6840_v41 = vpop.permute.xlu2 %3490 }
 0x750   : > { %3808 = vmatmul.msk.f32.gmra.mxu0 %vm2204_vm0, %v2901_v5 }
 0x751   : > { %v3139_v1 = vsel %vm3093_vm2, %v6833_v46, -inf }
 0x757   : > { %v6837_v2 = vpop.permute.xlu1 %3474  ;;  %3140 = vmax.xlane.f32.xlu1 %v3139_v1  ;;  %v6847_v34 = vpop.permute.xlu2 %3496 }
 0x758   : > { %3809 = vmatmul.msk.f32.gmra.mxu0 %vm2204_vm0, %v2903_v56  ;;  %8074 = vst [vmem:[#allocation71_spill] sm:$0xff] %v6847_v34  ;;  %v3045_v4 = vpop.f32.mrf.mxu0 }
 0x759   : > { %v6886_v38 = vadd.f32 %v3045_v4, %v6707_v21 }
 0x75b   : > { %v3142_v15 = vsel %vm3093_vm2, %v6886_v38, -inf }
 0x75f   : > { %v6842_v37 = vpop.permute.xlu1 %3480  ;;  %v2909_v24 = vpop.permute.xlu2 %2908 }
 0x760   : > { %3810 = vmatmul.msk.f32.gmra.mxu0 %vm2204_vm0, %v2905_v42  ;;  %v3048_v6 = vpop.f32.mrf.mxu0 }
 0x767   : > { %v2907_v54 = vpop.permute.xlu1 %2906 }
 0x768   : > { %3811 = vmatmul.msk.f32.gmra.mxu0 %vm2204_vm0, %v2907_v54  ;;  %v2911_v57 = vpop.permute.xlu0 %2910  ;;  %v3051_v35 = vpop.f32.mrf.mxu0 }
 0x76f   : > { %3104 = vmax.xlane.f32.xlu2 %v3103_v22  ;;  %v6881_v61 = vpop.permute.xlu1 %3486 }
 0x770   : > { %3812 = vmatmul.msk.f32.gmra.mxu0 %vm2204_vm0, %v2909_v24  ;;  %8076 = vst [vmem:[#allocation69_spill] sm:$0xff] %v6881_v61  ;;  %v6888_v27 = vpop.permute.xlu0 %3500 }
 0x771   : > { %8077 = vst [vmem:[#allocation70_spill] sm:$0xff] %v6888_v27 }
 0x777   : > { %3107 = vmax.xlane.f32.xlu2 %v3106_v39  ;;  %v3054_v12 = vpop.f32.mrf.mxu0  ;;  %v6894_v50 = vpop.permute.xlu1 %3492 }
 0x778   : > { %3813 = vmatmul.msk.f32.gmra.mxu0 %vm2204_vm0, %v2911_v57  ;;  %8078 = vst [vmem:[#allocation24_spill] sm:$0xff] %v6894_v50 }
 0x77f   : > { %3116 = vmax.xlane.f32.xlu2 %v3115_v13  ;;  %v6890_v26 = vpop.f32.mrf.mxu0  ;;  %v6899_v54 = vpop.permute.xlu1 %3498 }
 0x780   : > { %8079 = vst [vmem:[#allocation75_spill] sm:$0xff] %v6899_v54 }
 0x787   : > { %3125 = vmax.xlane.f32.xlu2 %v3124_v9  ;;  %v6897_v1 = vpop.f32.mrf.mxu0 }
 0x78f   : > { %3134 = vmax.xlane.f32.xlu2 %v3133_v14  ;;  %v3063_v57 = vpop.f32.mrf.mxu0 }
 0x797   : > { %3143 = vmax.xlane.f32.xlu2 %v3142_v15 }
 0x79b   : > { %v3099_v58 = vpop.xlane.xlu0 %3098 }
 0x79c   : > { %v3191_v5 = vsub.f32 %v6760_v16, %v3099_v58  ;;  %v6907_v16 = vadd.f32 %v3051_v35, %v6707_v21  ;;  %v6919_v35 = vpop.f32.mrf.mxu0 }
 0x79e   : > { %v3224_v56 = vmul.f32 1.442695, %v3191_v5  ;;  %v3148_v58 = vsel %vm3093_vm2, %v6907_v16, -inf  ;;  %v6917_v5 = vadd.f32 %v3048_v6, %v6707_v21 }
 0x7a0   : > { %3888 = vpow2.f32 %v3224_v56 }
 0x7a1   : > { %v3096_v42 = vpop.xlane.xlu2 %3095 }
 0x7a2   : > { %v3190_v22 = vsub.f32 %v6768_v47, %v3096_v42 }
 0x7a3   : > { %v3111_v56 = vpop.xlane.xlu0 %3110 }
 0x7a4   : > { %v3222_v4 = vmul.f32 1.442695, %v3190_v22  ;;  %v3145_v22 = vsel %vm3093_vm2, %v6917_v5, -inf }
 0x7a6   : > { %v6902_v24 = vpop.eup %3888  ;;  %3890 = vpow2.f32 %v3222_v4 }
 0x7a7   : > { %v3289_v39 = vsel %vm3093_vm2, %v6902_v24, 0.0 }
 0x7a8   : > { %3290 = vadd.xlane.f32.xlu1 %v3289_v39 }
 0x7aa   : > { %v3102_v13 = vpop.xlane.xlu1 %3101 }
 0x7ab   : > { %v3192_v9 = vsub.f32 %v6782_v25, %v3102_v13  ;;  %v3195_v25 = vsub.f32 %v6771_v40, %v3111_v56  ;;  %v6929_v13 = vadd.f32 %v3054_v12, %v6707_v21  ;;  %v3120_v40 = vpop.xlane.xlu0 %3119  ;;  %v6941_v12 = vadd.f32 %v3063_v57, %v6707_v21 }
 0x7ac   : > { %v6910_v14 = vpop.eup %3890 }
 0x7ad   : > { %v3226_v15 = vmul.f32 1.442695, %v3192_v9  ;;  %v3286_v47 = vsel %vm3093_vm2, %v6910_v14, 0.0  ;;  %v3232_v39 = vmul.f32 1.442695, %v3195_v25  ;;  %v6931_v6 = vpop.f32.mrf.mxu0  ;;  %v3151_v9 = vsel %vm3093_vm2, %v6929_v13, -inf }
 0x7ae   : > { %3287 = vadd.xlane.f32.xlu0 %v3286_v47  ;;  %v3198_v47 = vsub.f32 %v6785_v23, %v3120_v40 }
 0x7af   : > { %3892 = vpow2.f32 %v3226_v15 }
 0x7b0   : > { %3149 = vmax.xlane.f32.xlu1 %v3148_v58  ;;  %3894 = vpow2.f32 %v3232_v39  ;;  %v3238_v25 = vmul.f32 1.442695, %v3198_v47 }
 0x7b2   : > { %3896 = vpow2.f32 %v3238_v25 }
 0x7b3   : > { %v3129_v39 = vpop.xlane.xlu0 %3128 }
 0x7b4   : > { %v3201_v23 = vsub.f32 %v6796_v7, %v3129_v39 }
 0x7b5   : > { %v6921_v42 = vpop.eup %3892  ;;  %v3072_v58 = vpop.f32.mrf.mxu0 }
 0x7b6   : > { %3146 = vmax.xlane.f32.xlu0 %v3145_v22  ;;  %v3292_v4 = vsel %vm3093_vm2, %v6921_v42, 0.0  ;;  %v6935_v15 = vpop.eup %3894  ;;  %v3244_v57 = vmul.f32 1.442695, %v3201_v23  ;;  %v6957_v25 = vadd.f32 %v3072_v58, %v6707_v21 }
 0x7b7   : > { %3293 = vadd.xlane.f32.xlu2 %v3292_v4  ;;  %v3301_v56 = vsel %vm3093_vm2, %v6935_v15, 0.0  ;;  %v3160_v4 = vsel %vm3093_vm2, %v6941_v12, -inf }
 0x7b8   : > { %3898 = vpow2.f32 %v3244_v57  ;;  %v3114_v57 = vpop.xlane.xlu1 %3113 }
 0x7bd   : > { %v3138_v39 = vpop.xlane.xlu0 %3137 }
 0x7be   : > { %v3204_v23 = vsub.f32 %v6820_v51, %v3138_v39 }
 0x7bf   : > { %3152 = vmax.xlane.f32.xlu2 %v3151_v9  ;;  %v6947_v9 = vpop.eup %3896 }
 0x7c0   : > { %v3310_v47 = vsel %vm3093_vm2, %v6947_v9, 0.0  ;;  %v6961_v7 = vpop.eup %3898  ;;  %v3250_v0 = vmul.f32 1.442695, %v3204_v23 }
 0x7c1   : > { %v3319_v58 = vsel %vm3093_vm2, %v6961_v7, 0.0 }
 0x7c7   : > { %3302 = vadd.xlane.f32.xlu2 %v3301_v56  ;;  %v6954_v56 = vpop.permute.xlu2 %3502 }
 0x7c8   : > { %8080 = vst [vmem:[#allocation102_spill] sm:$0xff] %v6954_v56 }
 0x7cd   : > { %v6943_v22 = vpop.f32.mrf.mxu0 }
 0x7cf   : > { %3161 = vmax.xlane.f32.xlu2 %v3160_v4  ;;  %v3169_v4 = vsel %vm3093_vm2, %v6957_v25, -inf }
 0x7d5   : > { %v6950_v40 = vpop.f32.mrf.mxu0 }
 0x7d7   : > { %3311 = vadd.xlane.f32.xlu2 %v3310_v47 }
 0x7dd   : > { %v3081_v27 = vpop.f32.mrf.mxu0 }
 0x7df   : > { %3170 = vmax.xlane.f32.xlu2 %v3169_v4  ;;  %v6970_v4 = vadd.f32 %v3081_v27, %v6707_v21 }
 0x7e2   : > { %v3105_v54 = vpop.xlane.xlu2 %3104 }
 0x7e3   : > { %v3193_v33 = vsub.f32 %v6852_v8, %v3105_v54  ;;  %v3196_v8 = vsub.f32 %v6793_v20, %v3114_v57  ;;  %v3178_v54 = vsel %vm3093_vm2, %v6970_v4, -inf }
 0x7e5   : > { %v3228_v50 = vmul.f32 1.442695, %v3193_v33  ;;  %v6964_v47 = vpop.f32.mrf.mxu0  ;;  %v3234_v27 = vmul.f32 1.442695, %v3196_v8  ;;  %v6999_v8 = vadd.f32 %v6897_v1, %v6707_v21 }
 0x7e7   : > { %3900 = vpow2.f32 %v3228_v50  ;;  %3320 = vadd.xlane.f32.xlu2 %v3319_v58 }
 0x7e8   : > { %3902 = vpow2.f32 %v3250_v0 }
 0x7ea   : > { %v3108_v61 = vpop.xlane.xlu2 %3107 }
 0x7eb   : > { %v3194_v56 = vsub.f32 %v6861_v52, %v3108_v61  ;;  %v6984_v52 = vadd.f32 %v6890_v26, %v6707_v21 }
 0x7ed   : > { %v6973_v34 = vpop.eup %3900  ;;  %v3230_v33 = vmul.f32 1.442695, %v3194_v56  ;;  %v6976_v51 = vpop.f32.mrf.mxu0  ;;  %v3154_v39 = vsel %vm3093_vm2, %v6984_v52, -inf }
 0x7ee   : > { %v3295_v50 = vsel %vm3093_vm2, %v6973_v34, 0.0  ;;  %v6986_v20 = vpop.eup %3902 }
 0x7ef   : > { %3904 = vpow2.f32 %v3230_v33  ;;  %3296 = vadd.xlane.f32.xlu0 %v3295_v50  ;;  %3179 = vmax.xlane.f32.xlu2 %v3178_v54  ;;  %v3328_v26 = vsel %vm3093_vm2, %v6986_v20, 0.0  ;;  %v3123_v33 = vpop.xlane.xlu1 %3122 }
 0x7f0   : > { %3906 = vpow2.f32 %v3234_v27  ;;  %v3199_v54 = vsub.f32 %v6807_v36, %v3123_v33 }
 0x7f2   : > { %v3117_v61 = vpop.xlane.xlu2 %3116 }
 0x7f3   : > { %v3197_v56 = vsub.f32 %v6868_v18, %v3117_v61  ;;  %v3157_v61 = vsel %vm3093_vm2, %v6999_v8, -inf }
 0x7f5   : > { %v6988_v0 = vpop.eup %3904  ;;  %v3090_v58 = vpop.f32.mrf.mxu0  ;;  %v3236_v57 = vmul.f32 1.442695, %v3197_v56  ;;  %v3240_v56 = vmul.f32 1.442695, %v3199_v54 }
 0x7f6   : > { %v3298_v23 = vsel %vm3093_vm2, %v6988_v0, 0.0  ;;  %v7001_v18 = vpop.eup %3906  ;;  %v7004_v50 = vadd.f32 %v3090_v58, %v6707_v21 }
 0x7f7   : > { %3155 = vmax.xlane.f32.xlu0 %v3154_v39  ;;  %3299 = vadd.xlane.f32.xlu1 %v3298_v23  ;;  %3908 = vpow2.f32 %v3236_v57  ;;  %v3304_v27 = vsel %vm3093_vm2, %v7001_v18, 0.0  ;;  %v7015_v39 = vadd.f32 %v6919_v35, %v6707_v21  ;;  %v3132_v33 = vpop.xlane.xlu1 %3131  ;;  %v7026_v35 = vadd.f32 %v6931_v6, %v6707_v21 }
 0x7f8   : > { %3329 = vadd.xlane.f32.xlu2 %v3328_v26  ;;  %v3187_v1 = vsel %vm3093_vm2, %v7004_v50, -inf  ;;  %3910 = vpow2.f32 %v3240_v56 }
 0x7f9   : > { %v3163_v58 = vsel %vm3093_vm2, %v7015_v39, -inf }
 0x7fa   : > { %v3126_v23 = vpop.xlane.xlu2 %3125 }
 0x7fb   : > { %v3200_v26 = vsub.f32 %v6874_v32, %v3126_v23  ;;  %v7037_v23 = vadd.f32 %v6943_v22, %v6707_v21  ;;  %v7048_v22 = vadd.f32 %v6950_v40, %v6707_v21 }
 0x7fd   : > { %v7017_v36 = vpop.eup %3908  ;;  %v3242_v54 = vmul.f32 1.442695, %v3200_v26 }
 0x7fe   : > { %v3307_v57 = vsel %vm3093_vm2, %v7017_v36, 0.0 }
 0x7ff   : > { %3305 = vadd.xlane.f32.xlu0 %v3304_v27  ;;  %3158 = vmax.xlane.f32.xlu1 %v3157_v61  ;;  %v7028_v27 = vpop.eup %3910  ;;  %v3202_v61 = vsub.f32 %v6825_v17, %v3132_v33  ;;  %3912 = vpow2.f32 %v3242_v54 }
 0x800   : > { %3188 = vmax.xlane.f32.xlu2 %v3187_v1  ;;  %v3313_v32 = vsel %vm3093_vm2, %v7028_v27, 0.0  ;;  %v3166_v1 = vsel %vm3093_vm2, %v7026_v35, -inf }
 0x801   : > { %v3246_v56 = vmul.f32 1.442695, %v3202_v61 }
 0x802   : > { %v3135_v6 = vpop.xlane.xlu2 %3134 }
 0x803   : > { %3914 = vpow2.f32 %v3246_v56  ;;  %v3203_v17 = vsub.f32 %v6879_v28, %v3135_v6  ;;  %v3175_v56 = vsel %vm3093_vm2, %v7048_v22, -inf }
 0x805   : > { %v7039_v26 = vpop.eup %3912  ;;  %v3248_v54 = vmul.f32 1.442695, %v3203_v17 }
 0x806   : > { %v3316_v33 = vsel %vm3093_vm2, %v7039_v26, 0.0 }
 0x807   : > { %3164 = vmax.xlane.f32.xlu0 %v3163_v58  ;;  %3308 = vadd.xlane.f32.xlu1 %v3307_v57  ;;  %v3141_v58 = vpop.xlane.xlu1 %3140  ;;  %v3172_v57 = vsel %vm3093_vm2, %v7037_v23, -inf }
 0x809   : > { %v7050_v61 = vpop.eup %3914 }
 0x80a   : > { %v3322_v28 = vsel %vm3093_vm2, %v7050_v61, 0.0  ;;  %v3144_v17 = vpop.xlane.xlu2 %3143 }
 0x80f   : > { %3314 = vadd.xlane.f32.xlu0 %v3313_v32  ;;  %3167 = vmax.xlane.f32.xlu1 %v3166_v1  ;;  %v3205_v1 = vsub.f32 %v6833_v46, %v3141_v58 }
 0x811   : > { %v3252_v6 = vmul.f32 1.442695, %v3205_v1 }
 0x817   : > { %3173 = vmax.xlane.f32.xlu0 %v3172_v57  ;;  %3317 = vadd.xlane.f32.xlu1 %v3316_v33  ;;  %v7059_v33 = vadd.f32 %v6964_v47, %v6707_v21 }
 0x81b   : > { %v3291_v32 = vpop.xlane.xlu1 %3290 }
 0x81c   : > { %3916 = vrcp.f32 %v3291_v32  ;;  %v3206_v32 = vsub.f32 %v6886_v38, %v3144_v17 }
 0x81d   : > { %3918 = vpow2.f32 %v3248_v54 }
 0x81e   : > { %v3254_v38 = vmul.f32 1.442695, %v3206_v32 }
 0x81f   : > { %3323 = vadd.xlane.f32.xlu0 %v3322_v28  ;;  %3176 = vmax.xlane.f32.xlu1 %v3175_v56 }
 0x821   : > { %v3288_v40 = vpop.xlane.xlu0 %3287 }
 0x822   : > { %v3917_v57 = vpop.eup %3916  ;;  %3920 = vrcp.f32 %v3288_v40 }
 0x823   : > { %v7061_v46 = vpop.eup %3918  ;;  %v3415_v58 = vmul.f32 %v3917_v57, %v6902_v24  ;;  %v3150_v54 = vpop.xlane.xlu1 %3149  ;;  %3922 = vpow2.f32 %v3252_v6  ;;  %v3181_v24 = vsel %vm3093_vm2, %v7059_v33, -inf }
 0x824   : > { %v3208_v1 = vsub.f32 %v6907_v16, %v3150_v54  ;;  %v3325_v56 = vsel %vm3093_vm2, %v7061_v46, 0.0  ;;  %v7084_v16 = vadd.f32 %v6976_v51, %v6707_v21 }
 0x825   : > { %v3543_v47 = vsel %vm3093_vm2, %v3415_v58, %v6738_v48 }
 0x826   : > { %v3576_v28 = vsel %vm3574_vm3, %v3543_v47, 0.0  ;;  %v3258_v17 = vmul.f32 1.442695, %v3208_v1 }
 0x827   : > { %3608 = vst [vmem:[%s7069_s28 + $0x8] sm:$0xff] %v3576_v28  ;;  %3182 = vmax.xlane.f32.xlu0 %v3181_v24  ;;  %3326 = vadd.xlane.f32.xlu1 %v3325_v56 }
 0x828   : > { %v3921_v40 = vpop.eup %3920 }
 0x829   : > { %v3414_v6 = vmul.f32 %v3921_v40, %v6910_v14  ;;  %v3147_v48 = vpop.xlane.xlu0 %3146  ;;  %v7087_v54 = vpop.eup %3922  ;;  %v3184_v14 = vsel %vm3093_vm2, %v7084_v16, -inf }
 0x82a   : > { %v3207_v57 = vsub.f32 %v6917_v5, %v3147_v48  ;;  %v3294_v58 = vpop.xlane.xlu2 %3293  ;;  %v3331_v21 = vsel %vm3093_vm2, %v7087_v54, 0.0 }
 0x82b   : > { %v3542_v47 = vsel %vm3093_vm2, %v3414_v6, %v6697_v49  ;;  %3924 = vrcp.f32 %v3294_v58 }
 0x82c   : > { %3926 = vpow2.f32 %v3254_v38  ;;  %v3575_v32 = vsel %vm3574_vm3, %v3542_v47, 0.0  ;;  %v3256_v28 = vmul.f32 1.442695, %v3207_v57 }
 0x82d   : > { %3607 = vst [vmem:[%s7069_s28] sm:$0xff] %v3575_v32  ;;  %3928 = vpow2.f32 %v3258_v17 }
 0x82e   : > { %3930 = vpow2.f32 %v3256_v28 }
 0x82f   : > { %3332 = vadd.xlane.f32.xlu0 %v3331_v21  ;;  %3185 = vmax.xlane.f32.xlu1 %v3184_v14 }
 0x831   : > { %v3925_v5 = vpop.eup %3924 }
 0x832   : > { %v7097_v51 = vpop.eup %3926  ;;  %v3416_v49 = vmul.f32 %v3925_v5, %v6921_v42  ;;  %v3153_v1 = vpop.xlane.xlu2 %3152 }
 0x833   : > { %v7100_v24 = vpop.eup %3928  ;;  %v3209_v56 = vsub.f32 %v6929_v13, %v3153_v1  ;;  %v3334_v42 = vsel %vm3093_vm2, %v7097_v51, 0.0 }
 0x834   : > { %v7103_v40 = vpop.eup %3930  ;;  %v3544_v38 = vsel %vm3093_vm2, %v3416_v49, %v6716_v11  ;;  %v3340_v57 = vsel %vm3093_vm2, %v7100_v24, 0.0 }
 0x835   : > { %v3577_v6 = vsel %vm3574_vm3, %v3544_v38, 0.0  ;;  %v3260_v17 = vmul.f32 1.442695, %v3209_v56  ;;  %v3337_v48 = vsel %vm3093_vm2, %v7103_v40, 0.0 }
 0x836   : > { %3609 = vst [vmem:[%s7069_s28 + $0x10] sm:$0xff] %v3577_v6  ;;  %3338 = vadd.xlane.f32.xlu2 %v3337_v48 }
 0x837   : > { %3932 = vpow2.f32 %v3260_v17  ;;  %3335 = vadd.xlane.f32.xlu1 %v3334_v42  ;;  %3341 = vadd.xlane.f32.xlu0 %v3340_v57 }
 0x83a   : > { %v3303_v13 = vpop.xlane.xlu2 %3302 }
 0x83b   : > { %3934 = vrcp.f32 %v3303_v13 }
 0x83d   : > { %v7115_v11 = vpop.eup %3932 }
 0x83e   : > { %v3343_v58 = vsel %vm3093_vm2, %v7115_v11, 0.0 }
 0x83f   : > { %3344 = vadd.xlane.f32.xlu1 %v3343_v58 }
 0x841   : > { %v3935_v47 = vpop.eup %3934 }
 0x842   : > { %v3419_v32 = vmul.f32 %v3935_v47, %v6935_v15  ;;  %v3162_v28 = vpop.xlane.xlu2 %3161 }
 0x843   : > { %v3212_v21 = vsub.f32 %v6941_v12, %v3162_v28 }
 0x844   : > { %v3547_v14 = vsel %vm3093_vm2, %v3419_v32, %v6726_v31 }
 0x845   : > { %v3580_v5 = vsel %vm3574_vm3, %v3547_v14, 0.0  ;;  %v3266_v49 = vmul.f32 1.442695, %v3212_v21 }
 0x846   : > { %3612 = vst [vmem:[%s7069_s28 + $0x28] sm:$0xff] %v3580_v5 }
 0x847   : > { %3936 = vpow2.f32 %v3266_v49 }
 0x84a   : > { %v3312_v1 = vpop.xlane.xlu2 %3311 }
 0x84b   : > { %3938 = vrcp.f32 %v3312_v1 }
 0x84d   : > { %v7125_v56 = vpop.eup %3936 }
 0x84e   : > { %v3352_v38 = vsel %vm3093_vm2, %v7125_v56, 0.0 }
 0x84f   : > { %3353 = vadd.xlane.f32.xlu1 %v3352_v38 }
 0x851   : > { %v3939_v15 = vpop.eup %3938 }
 0x852   : > { %v3422_v12 = vmul.f32 %v3939_v15, %v6947_v9  ;;  %v3171_v6 = vpop.xlane.xlu2 %3170 }
 0x853   : > { %v3215_v31 = vsub.f32 %v6957_v25, %v3171_v6 }
 0x854   : > { %v3550_v17 = vsel %vm3093_vm2, %v3422_v12, %v6798_v53 }
 0x855   : > { %v3583_v48 = vsel %vm3574_vm3, %v3550_v17, 0.0  ;;  %v3272_v42 = vmul.f32 1.442695, %v3215_v31 }
 0x856   : > { %3615 = vst [vmem:[%s7069_s28 + $0x40] sm:$0xff] %v3583_v48 }
 0x857   : > { %3940 = vpow2.f32 %v3272_v42 }
 0x85a   : > { %v3321_v57 = vpop.xlane.xlu2 %3320 }
 0x85b   : > { %3942 = vrcp.f32 %v3321_v57 }
 0x85d   : > { %v7135_v13 = vpop.eup %3940 }
 0x85e   : > { %v3361_v58 = vsel %vm3093_vm2, %v7135_v13, 0.0 }
 0x85f   : > { %3362 = vadd.xlane.f32.xlu1 %v3361_v58 }
 0x861   : > { %v3943_v9 = vpop.eup %3942 }
 0x862   : > { %v3425_v25 = vmul.f32 %v3943_v9, %v6961_v7  ;;  %v3180_v47 = vpop.xlane.xlu2 %3179  ;;  %v3297_v32 = vpop.xlane.xlu0 %3296 }
 0x863   : > { %v3218_v53 = vsub.f32 %v6970_v4, %v3180_v47  ;;  %3944 = vrcp.f32 %v3297_v32 }
 0x864   : > { %v3553_v28 = vsel %vm3093_vm2, %v3425_v25, %v6815_v3 }
 0x865   : > { %v3586_v21 = vsel %vm3574_vm3, %v3553_v28, 0.0  ;;  %v3278_v14 = vmul.f32 1.442695, %v3218_v53 }
 0x866   : > { %3618 = vst [vmem:[%s7069_s28 + $0x58] sm:$0xff] %v3586_v21 }
 0x867   : > { %3946 = vpow2.f32 %v3278_v14 }
 0x869   : > { %v3945_v5 = vpop.eup %3944 }
 0x86a   : > { %v3417_v49 = vmul.f32 %v3945_v5, %v6973_v34  ;;  %v3300_v1 = vpop.xlane.xlu1 %3299  ;;  %v3156_v38 = vpop.xlane.xlu0 %3155 }
 0x86b   : > { %3948 = vrcp.f32 %v3300_v1  ;;  %v3330_v7 = vpop.xlane.xlu2 %3329  ;;  %v3210_v15 = vsub.f32 %v6984_v52, %v3156_v38 }
 0x86c   : > { %v3545_v4 = vsel %vm3093_vm2, %v3417_v49, %v6746_v29  ;;  %3950 = vrcp.f32 %v3330_v7 }
 0x86d   : > { %v7149_v3 = vpop.eup %3946  ;;  %v3578_v12 = vsel %vm3574_vm3, %v3545_v4, 0.0  ;;  %v3262_v6 = vmul.f32 1.442695, %v3210_v15 }
 0x86e   : > { %3610 = vst [vmem:[%s7069_s28 + $0x18] sm:$0xff] %v3578_v12  ;;  %v3370_v31 = vsel %vm3093_vm2, %v7149_v3, 0.0 }
 0x86f   : > { %3952 = vpow2.f32 %v3262_v6  ;;  %3371 = vadd.xlane.f32.xlu1 %v3370_v31 }
 0x871   : > { %v3949_v34 = vpop.eup %3948 }
 0x872   : > { %v3951_v17 = vpop.eup %3950  ;;  %v3418_v52 = vmul.f32 %v3949_v34, %v6988_v0  ;;  %v3159_v48 = vpop.xlane.xlu1 %3158 }
 0x873   : > { %v3306_v29 = vpop.xlane.xlu0 %3305  ;;  %v3428_v42 = vmul.f32 %v3951_v17, %v6986_v20  ;;  %v3211_v57 = vsub.f32 %v6999_v8, %v3159_v48  ;;  %v3189_v58 = vpop.xlane.xlu2 %3188 }
 0x874   : > { %3954 = vrcp.f32 %v3306_v29  ;;  %v3546_v9 = vsel %vm3093_vm2, %v3418_v52, %v6709_v55  ;;  %v3221_v25 = vsub.f32 %v7004_v50, %v3189_v58 }
 0x875   : > { %v7161_v47 = vpop.eup %3952  ;;  %v3579_v32 = vsel %vm3574_vm3, %v3546_v9, 0.0  ;;  %v3556_v0 = vsel %vm3093_vm2, %v3428_v42, %v6837_v2  ;;  %v3264_v53 = vmul.f32 1.442695, %v3211_v57 }
 0x876   : > { %3611 = vst [vmem:[%s7069_s28 + $0x20] sm:$0xff] %v3579_v32  ;;  %v3589_v20 = vsel %vm3574_vm3, %v3556_v0, 0.0  ;;  %v3284_v28 = vmul.f32 1.442695, %v3221_v25  ;;  %v3346_v8 = vsel %vm3093_vm2, %v7161_v47, 0.0 }
 0x877   : > { %3621 = vst [vmem:[%s7069_s28 + $0x70] sm:$0xff] %v3589_v20  ;;  %3956 = vpow2.f32 %v3264_v53  ;;  %3347 = vadd.xlane.f32.xlu2 %v3346_v8 }
 0x878   : > { %3958 = vpow2.f32 %v3284_v28 }
 0x87a   : > { %v3955_v55 = vpop.eup %3954  ;;  %v3309_v21 = vpop.xlane.xlu1 %3308 }
 0x87b   : > { %v3420_v50 = vmul.f32 %v3955_v55, %v7001_v18  ;;  %v3165_v14 = vpop.xlane.xlu0 %3164  ;;  %3960 = vrcp.f32 %v3309_v21  ;;  %v8081_v21 = vld [vmem:[#allocation16_spill] sm:$0xff] }
 0x87c   : > { %v3213_v2 = vsub.f32 %v7015_v39, %v3165_v14 }
 0x87d   : > { %v3548_v5 = vsel %vm3093_vm2, %v3420_v50, %v6749_v45  ;;  %v7175_v49 = vpop.eup %3956 }
 0x87e   : > { %v3581_v1 = vsel %vm3574_vm3, %v3548_v5, 0.0  ;;  %v3268_v38 = vmul.f32 1.442695, %v3213_v2  ;;  %v7178_v7 = vpop.eup %3958  ;;  %v3349_v18 = vsel %vm3093_vm2, %v7175_v49, 0.0 }
 0x87f   : > { %3613 = vst [vmem:[%s7069_s28 + $0x30] sm:$0xff] %v3581_v1  ;;  %3350 = vadd.xlane.f32.xlu0 %v3349_v18  ;;  %v3379_v39 = vsel %vm3093_vm2, %v7178_v7, 0.0 }
 0x880   : > { %3962 = vpow2.f32 %v3268_v38  ;;  %3380 = vadd.xlane.f32.xlu1 %v3379_v39 }
 0x881   : > { %v3961_v15 = vpop.eup %3960 }
 0x882   : > { %v3421_v45 = vmul.f32 %v3961_v15, %v7017_v36  ;;  %v3168_v4 = vpop.xlane.xlu1 %3167 }
 0x883   : > { %v3315_v12 = vpop.xlane.xlu0 %3314  ;;  %v3214_v6 = vsub.f32 %v7026_v35, %v3168_v4 }
 0x884   : > { %3964 = vrcp.f32 %v3315_v12  ;;  %v3549_v31 = vsel %vm3093_vm2, %v3421_v45, %v6718_v62 }
 0x885   : > { %v3582_v17 = vsel %vm3574_vm3, %v3549_v31, 0.0  ;;  %v3270_v52 = vmul.f32 1.442695, %v3214_v6 }
 0x886   : > { %v7189_v34 = vpop.eup %3962  ;;  %3614 = vst [vmem:[%s7069_s28 + $0x38] sm:$0xff] %v3582_v17 }
 0x887   : > { %v3355_v48 = vsel %vm3093_vm2, %v7189_v34, 0.0  ;;  %3966 = vpow2.f32 %v3270_v52 }
 0x888   : > { %3356 = vadd.xlane.f32.xlu2 %v3355_v48 }
 0x88a   : > { %v3965_v36 = vpop.eup %3964  ;;  %v3318_v35 = vpop.xlane.xlu1 %3317 }
 0x88b   : > { %v3423_v29 = vmul.f32 %v3965_v36, %v7028_v27  ;;  %v3174_v42 = vpop.xlane.xlu0 %3173  ;;  %3968 = vrcp.f32 %v3318_v35 }
 0x88c   : > { %v3216_v62 = vsub.f32 %v7037_v23, %v3174_v42 }
 0x88d   : > { %v3551_v57 = vsel %vm3093_vm2, %v3423_v29, %v6756_v43  ;;  %v7199_v58 = vpop.eup %3966 }
 0x88e   : > { %v3584_v9 = vsel %vm3574_vm3, %v3551_v57, 0.0  ;;  %v3274_v25 = vmul.f32 1.442695, %v3216_v62  ;;  %v3358_v32 = vsel %vm3093_vm2, %v7199_v58, 0.0 }
 0x88f   : > { %3616 = vst [vmem:[%s7069_s28 + $0x48] sm:$0xff] %v3584_v9  ;;  %3359 = vadd.xlane.f32.xlu0 %v3358_v32 }
 0x890   : > { %3970 = vpow2.f32 %v3274_v25 }
 0x891   : > { %v3969_v27 = vpop.eup %3968 }
 0x892   : > { %v3424_v0 = vmul.f32 %v3969_v27, %v7039_v26  ;;  %v3177_v53 = vpop.xlane.xlu1 %3176 }
 0x893   : > { %v3324_v23 = vpop.xlane.xlu0 %3323  ;;  %v3217_v20 = vsub.f32 %v7048_v22, %v3177_v53 }
 0x894   : > { %3972 = vrcp.f32 %v3324_v23  ;;  %v3552_v43 = vsel %vm3093_vm2, %v3424_v0, %v6752_v44 }
 0x895   : > { %v3585_v8 = vsel %vm3574_vm3, %v3552_v43, 0.0  ;;  %v3276_v55 = vmul.f32 1.442695, %v3217_v20 }
 0x896   : > { %v7209_v28 = vpop.eup %3970  ;;  %3617 = vst [vmem:[%s7069_s28 + $0x50] sm:$0xff] %v3585_v8 }
 0x897   : > { %v3364_v50 = vsel %vm3093_vm2, %v7209_v28, 0.0  ;;  %3974 = vpow2.f32 %v3276_v55 }
 0x898   : > { %3365 = vadd.xlane.f32.xlu2 %v3364_v50 }
 0x899   : > { %3504 = vrot.lane.b32.xlu1 %v8081_v21, %s4064_s25 }
 0x89a   : > { %v3973_v26 = vpop.eup %3972  ;;  %v3327_v14 = vpop.xlane.xlu1 %3326 }
 0x89b   : > { %v3426_v22 = vmul.f32 %v3973_v26, %v7050_v61  ;;  %v3183_v44 = vpop.xlane.xlu0 %3182  ;;  %3976 = vrcp.f32 %v3327_v14  ;;  %v8084_v14 = vld [vmem:[#allocation71_spill] sm:$0xff] }
 0x89c   : > { %v3219_v2 = vsub.f32 %v7059_v33, %v3183_v44 }
 0x89d   : > { %v3554_v5 = vsel %vm3093_vm2, %v3426_v22, %v6773_v63  ;;  %v7221_v1 = vpop.eup %3974 }
 0x89e   : > { %v3587_v38 = vsel %vm3574_vm3, %v3554_v5, 0.0  ;;  %v3280_v18 = vmul.f32 1.442695, %v3219_v2  ;;  %v3367_v39 = vsel %vm3093_vm2, %v7221_v1, 0.0 }
 0x89f   : > { %3619 = vst [vmem:[%s7069_s28 + $0x60] sm:$0xff] %v3587_v38  ;;  %3368 = vadd.xlane.f32.xlu0 %v3367_v39 }
 0x8a0   : > { %3978 = vpow2.f32 %v3280_v18  ;;  %v8085_v18 = vld [vmem:[#allocation102_spill] sm:$0xff] }
 0x8a1   : > { %v3977_v61 = vpop.eup %3976 }
 0x8a2   : > { %v3427_v15 = vmul.f32 %v3977_v61, %v7061_v46  ;;  %v3186_v45 = vpop.xlane.xlu1 %3185 }
 0x8a3   : > { %v3333_v33 = vpop.xlane.xlu0 %3332  ;;  %v3220_v4 = vsub.f32 %v7084_v16, %v3186_v45 }
 0x8a4   : > { %3980 = vrcp.f32 %v3333_v33  ;;  %v3555_v63 = vsel %vm3093_vm2, %v3427_v15, %v6762_v60  ;;  %v8086_v33 = vld [vmem:[#allocation69_spill] sm:$0xff] }
 0x8a5   : > { %v3588_v6 = vsel %vm3574_vm3, %v3555_v63, 0.0  ;;  %v3282_v31 = vmul.f32 1.442695, %v3220_v4 }
 0x8a6   : > { %v7231_v12 = vpop.eup %3978  ;;  %3620 = vst [vmem:[%s7069_s28 + $0x68] sm:$0xff] %v3588_v6 }
 0x8a7   : > { %v3373_v17 = vsel %vm3093_vm2, %v7231_v12, 0.0  ;;  %3982 = vpow2.f32 %v3282_v31 }
 0x8a8   : > { %3374 = vadd.xlane.f32.xlu2 %v3373_v17  ;;  %v8087_v17 = vld [vmem:[#allocation21_spill] sm:$0xff] }
 0x8a9   : > { %v3339_v52 = vpop.xlane.xlu2 %3338 }
 0x8aa   : > { %v3981_v46 = vpop.eup %3980  ;;  %3984 = vrcp.f32 %v3339_v52  ;;  %v3336_v48 = vpop.xlane.xlu1 %3335 }
 0x8ab   : > { %v3429_v16 = vmul.f32 %v3981_v46, %v7087_v54  ;;  %v3342_v36 = vpop.xlane.xlu0 %3341  ;;  %3986 = vrcp.f32 %v3336_v48 }
 0x8ac   : > { %3988 = vrcp.f32 %v3342_v36  ;;  %v8088_v36 = vld [vmem:[#allocation24_spill] sm:$0xff] }
 0x8ad   : > { %v3557_v60 = vsel %vm3093_vm2, %v3429_v16, %v6809_v10  ;;  %v7240_v29 = vpop.eup %3982 }
 0x8ae   : > { %v3590_v35 = vsel %vm3574_vm3, %v3557_v60, 0.0  ;;  %v3376_v42 = vsel %vm3093_vm2, %v7240_v29, 0.0 }
 0x8af   : > { %3622 = vst [vmem:[%s7069_s28 + $0x78] sm:$0xff] %v3590_v35  ;;  %3377 = vadd.xlane.f32.xlu0 %v3376_v42 }
 0x8b0   : > { %v3985_v54 = vpop.eup %3984 }
 0x8b1   : > { %v3987_v62 = vpop.eup %3986  ;;  %v3431_v57 = vmul.f32 %v3985_v54, %v7103_v40 }
 0x8b2   : > { %v3989_v9 = vpop.eup %3988  ;;  %v3430_v10 = vmul.f32 %v3987_v62, %v7097_v51  ;;  %v3345_v25 = vpop.xlane.xlu1 %3344  ;;  %v8089_v62 = vld [vmem:[#allocation97_spill] sm:$0xff] }
 0x8b3   : > { %v3559_v32 = vsel %vm3093_vm2, %v3431_v57, %v6842_v37  ;;  %v3432_v27 = vmul.f32 %v3989_v9, %v7100_v24  ;;  %3990 = vrcp.f32 %v3345_v25 }
 0x8b4   : > { %v3592_v0 = vsel %vm3574_vm3, %v3559_v32, 0.0  ;;  %v3558_v53 = vsel %vm3093_vm2, %v3430_v10, %v6800_v30  ;;  %v8082_v30 = vld [vmem:[#allocation67_spill] sm:$0xff] }
 0x8b5   : > { %3624 = vst [vmem:[%s7069_s28 + $0x88] sm:$0xff] %v3592_v0  ;;  %v3591_v23 = vsel %vm3574_vm3, %v3558_v53, 0.0  ;;  %v3560_v40 = vsel %vm3093_vm2, %v3432_v27, %v6829_v59  ;;  %v8083_v59 = vld [vmem:[#allocation66_spill] sm:$0xff]  ;;  %v8090_v32 = vld [vmem:[#allocation75_spill] sm:$0xff] }
 0x8b6   : > { %3623 = vst [vmem:[%s7069_s28 + $0x80] sm:$0xff] %v3591_v23  ;;  %v3593_v51 = vsel %vm3574_vm3, %v3560_v40, 0.0 }
 0x8b7   : > { %3625 = vst [vmem:[%s7069_s28 + $0x90] sm:$0xff] %v3593_v51  ;;  %v8091_v51 = vld [vmem:[#allocation70_spill] sm:$0xff] }
 0x8b9   : > { %v3991_v37 = vpop.eup %3990 }
 0x8ba   : > { %v3433_v24 = vmul.f32 %v3991_v37, %v7115_v11 }
 0x8bc   : > { %v3561_v20 = vsel %vm3093_vm2, %v3433_v24, %v6817_v19 }
 0x8bd   : > { %v3594_v43 = vsel %vm3574_vm3, %v3561_v20, 0.0 }
 0x8be   : > { %3626 = vst [vmem:[%s7069_s28 + $0x98] sm:$0xff] %v3594_v43 }
 0x8c0   : > { %3508 = vrot.lane.b32.xlu2 %v8082_v30, %s4064_s25 }
 0x8c2   : > { %v3354_v8 = vpop.xlane.xlu1 %3353 }
 0x8c3   : > { %3992 = vrcp.f32 %v3354_v8  ;;  %3506 = vrot.lane.b32.xlu0 %v8083_v59, %s4064_s25 }
 0x8c9   : > { %v3993_v55 = vpop.eup %3992 }
 0x8ca   : > { %v3436_v50 = vmul.f32 %v3993_v55, %v7125_v56 }
 0x8cc   : > { %v3564_v11 = vsel %vm3093_vm2, %v3436_v50, %v6840_v41 }
 0x8cd   : > { %v3597_v19 = vsel %vm3574_vm3, %v3564_v11, 0.0 }
 0x8ce   : > { %3629 = vst [vmem:[%s7069_s28 + $0xb0] sm:$0xff] %v3597_v19 }
 0x8d2   : > { %v3363_v26 = vpop.xlane.xlu1 %3362 }
 0x8d3   : > { %3994 = vrcp.f32 %v3363_v26 }
 0x8d9   : > { %v3995_v21 = vpop.eup %3994 }
 0x8da   : > { %v3439_v22 = vmul.f32 %v3995_v21, %v7135_v13 }
 0x8dc   : > { %v3567_v44 = vsel %vm3093_vm2, %v3439_v22, %v8084_v14 }
 0x8dd   : > { %v3600_v2 = vsel %vm3574_vm3, %v3567_v44, 0.0 }
 0x8de   : > { %3632 = vst [vmem:[%s7069_s28 + $0xc8] sm:$0xff] %v3600_v2 }
 0x8e2   : > { %v3372_v56 = vpop.xlane.xlu1 %3371 }
 0x8e3   : > { %3996 = vrcp.f32 %v3372_v56 }
 0x8e9   : > { %v3997_v5 = vpop.eup %3996 }
 0x8ea   : > { %v3442_v41 = vmul.f32 %v3997_v5, %v7149_v3  ;;  %v3348_v38 = vpop.xlane.xlu2 %3347 }
 0x8eb   : > { %3998 = vrcp.f32 %v3348_v38 }
 0x8ec   : > { %v3570_v39 = vsel %vm3093_vm2, %v3442_v41, %v8085_v18 }
 0x8ed   : > { %v3603_v13 = vsel %vm3574_vm3, %v3570_v39, 0.0 }
 0x8ee   : > { %3635 = vst [vmem:[%s7069_s28 + $0xe0] sm:$0xff] %v3603_v13 }
 0x8f1   : > { %v3999_v61 = vpop.eup %3998 }
 0x8f2   : > { %v3434_v15 = vmul.f32 %v3999_v61, %v7161_v47  ;;  %v3351_v45 = vpop.xlane.xlu0 %3350 }
 0x8f3   : > { %4000 = vrcp.f32 %v3351_v45  ;;  %v3381_v0 = vpop.xlane.xlu1 %3380 }
 0x8f4   : > { %v3562_v4 = vsel %vm3093_vm2, %v3434_v15, %v8086_v33 }
 0x8f5   : > { %v3595_v3 = vsel %vm3574_vm3, %v3562_v4, 0.0 }
 0x8f6   : > { %3627 = vst [vmem:[%s7069_s28 + $0xa0] sm:$0xff] %v3595_v3 }
 0x8f9   : > { %v4001_v63 = vpop.eup %4000 }
 0x8fa   : > { %v3435_v6 = vmul.f32 %v4001_v63, %v7175_v49 }
 0x8fb   : > { %v3357_v31 = vpop.xlane.xlu2 %3356 }
 0x8fc   : > { %4002 = vrcp.f32 %v3357_v31  ;;  %v3563_v46 = vsel %vm3093_vm2, %v3435_v6, %v8087_v17 }
 0x8fd   : > { %v3596_v47 = vsel %vm3574_vm3, %v3563_v46, 0.0 }
 0x8fe   : > { %3628 = vst [vmem:[%s7069_s28 + $0xa8] sm:$0xff] %v3596_v47 }
 0x902   : > { %v4003_v52 = vpop.eup %4002  ;;  %v3360_v48 = vpop.xlane.xlu0 %3359 }
 0x903   : > { %v3437_v16 = vmul.f32 %v4003_v52, %v7189_v34  ;;  %4004 = vrcp.f32 %v3360_v48 }
 0x905   : > { %v3565_v60 = vsel %vm3093_vm2, %v3437_v16, %v8088_v36 }
 0x906   : > { %v3598_v35 = vsel %vm3574_vm3, %v3565_v60, 0.0 }
 0x907   : > { %3630 = vst [vmem:[%s7069_s28 + $0xb8] sm:$0xff] %v3598_v35 }
 0x909   : > { %v4005_v49 = vpop.eup %4004 }
 0x90a   : > { %v3438_v42 = vmul.f32 %v4005_v49, %v7199_v58 }
 0x90b   : > { %v3366_v54 = vpop.xlane.xlu2 %3365  ;;  %v3505_v59 = vpop.permute.xlu1 %3504 }
 0x90c   : > { %4006 = vrcp.f32 %v3366_v54  ;;  %v3566_v57 = vsel %vm3093_vm2, %v3438_v42, %v8089_v62 }
 0x90d   : > { %v3599_v9 = vsel %vm3574_vm3, %v3566_v57, 0.0 }
 0x90e   : > { %3631 = vst [vmem:[%s7069_s28 + $0xc0] sm:$0xff] %v3599_v9 }
 0x912   : > { %v4007_v34 = vpop.eup %4006  ;;  %v3369_v25 = vpop.xlane.xlu0 %3368 }
 0x913   : > { %v3440_v10 = vmul.f32 %v4007_v34, %v7209_v28  ;;  %4008 = vrcp.f32 %v3369_v25 }
 0x914   : > { %4010 = vrcp.f32 %v3381_v0 }
 0x915   : > { %v3568_v27 = vsel %vm3093_vm2, %v3440_v10, %v8090_v32 }
 0x916   : > { %v3601_v58 = vsel %vm3574_vm3, %v3568_v27, 0.0 }
 0x917   : > { %3633 = vst [vmem:[%s7069_s28 + $0xd0] sm:$0xff] %v3601_v58 }
 0x919   : > { %v4009_v53 = vpop.eup %4008 }
 0x91a   : > { %v3441_v23 = vmul.f32 %v4009_v53, %v7221_v1  ;;  %v4011_v24 = vpop.eup %4010 }
 0x91b   : > { %v3375_v40 = vpop.xlane.xlu2 %3374  ;;  %v3445_v43 = vmul.f32 %v4011_v24, %v7178_v7 }
 0x91c   : > { %4012 = vrcp.f32 %v3375_v40  ;;  %v3569_v28 = vsel %vm3093_vm2, %v3441_v23, %v8091_v51 }
 0x91d   : > { %v3602_v37 = vsel %vm3574_vm3, %v3569_v28, 0.0 }
 0x91e   : > { %3634 = vst [vmem:[%s7069_s28 + $0xd8] sm:$0xff] %v3602_v37 }
 0x922   : > { %v4013_v20 = vpop.eup %4012  ;;  %v3378_v19 = vpop.xlane.xlu0 %3377 }
 0x923   : > { %v3443_v30 = vmul.f32 %v4013_v20, %v7231_v12  ;;  %v3509_v8 = vpop.permute.xlu2 %3508  ;;  %4014 = vrcp.f32 %v3378_v19 }
 0x924   : > { %v3573_v1 = vsel %vm3093_vm2, %v3445_v43, %v3509_v8 }
 0x925   : > { %v3571_v55 = vsel %vm3093_vm2, %v3443_v30, %v3505_v59  ;;  %v3606_v50 = vsel %vm3574_vm3, %v3573_v1, 0.0 }
 0x926   : > { %v3604_v11 = vsel %vm3574_vm3, %v3571_v55, 0.0  ;;  %3638 = vst [vmem:[%s7069_s28 + $0xf8] sm:$0xff] %v3606_v50 }
 0x927   : > { %3636 = vst [vmem:[%s7069_s28 + $0xe8] sm:$0xff] %v3604_v11 }
 0x929   : > { %v4015_v26 = vpop.eup %4014 }
 0x92a   : > { %v3444_v7 = vmul.f32 %v4015_v26, %v7240_v29 }
 0x935   : > { %v3507_v21 = vpop.permute.xlu0 %3506 }
 0x936   : > { %v3572_v12 = vsel %vm3093_vm2, %v3444_v7, %v3507_v21 }
 0x937   : > { %v3605_v22 = vsel %vm3574_vm3, %v3572_v12, 0.0 }
 0x938   : > { %3637 = vst [vmem:[%s7069_s28 + $0xf0] sm:$0xff] %v3605_v22 }
 0x939 PF: > { %s13_s9 = sadd.s32 1, %s4057_s9  }
 0x93a   : > { %p10_p7 = scmp.ge.s32.totalorder %s13_s9, 4  }
 0x93c   :  { %12 = sbr.rel (!%p10_p7) target bundleno = 1 (0x1), region = 65 }
 0x941   :  { %3661 = vsyncpa [#allocation3], 1 }
 0x942   :  { %3663 = vsyncpa [#allocation3 + $0x1], 1 }

</bundles_post_ra>
